<compile_context>
chip_gen: v6e
topology: v6e:2x2x1
jax: 0.10.0
libtpu: 0.0.40
codegen_flags: <defaults>
</compile_context>

<pallas_src>
import jax
import jax.numpy as jnp
from jax import lax
from jax.experimental import pallas as pl
from jax.experimental.pallas import tpu as pltpu


# ------------------------------------------------------------------ fused kernel

def _fused_kernel(xph_ref, w1_ref, b1_ref, w2_ref, b2_ref,
                  fc1w_ref, fc1b_ref, fc2w_ref, fc2b_ref, o_ref):
    """Entire SampleConvNet forward for TB batch elements, fully VMEM-resident.

    xph_ref : [TB, 2, 17, 34]  padded 28x28 input, rows split into even/odd phases
    w1_ref  : [8, 34, 224]     conv1 packed as 8 row-window matmuls (224 = 14*16 = (ow, co))
    w2_ref  : [4, 208, 160]    conv2 packed as 4 row-window matmuls (208 = 13*16, 160 = 5*32)
    fc1w_ref: [4, 128, 32]     fc1 packed per pooled output row (128 = 4*32 = (ow, c))
    fc2w_ref: [32, 128]        fc2, N padded 10 -> 128 (lane-dense store)
    o_ref   : [TB, 128]
    """
    f32 = jnp.float32
    TB = xph_ref.shape[0]
    x = xph_ref[...]                                            # [TB, 2, 17, 34]

    # ---------------- conv1 (8x8, stride 2, pad 3 pre-applied) + bias + ReLU ----------------
    # Piece (phase, a) holds padded rows i = 2a + phase of every output-row window; the
    # stride-2 column selection lives in the zero-padded weight slice w1_ref[phase*4 + a].
    acc1 = jnp.zeros((TB * 14, 224), f32)
    for phase in range(2):
        for a in range(4):
            piece = x[:, phase, a:a + 14, :].reshape(TB * 14, 34)
            acc1 = acc1 + jnp.dot(piece, w1_ref[phase * 4 + a],
                                  preferred_element_type=f32)
    h1 = jnp.maximum(acc1 + b1_ref[...], 0.0)                   # [TB*14, 224], lanes=(ow, co)
    h1 = h1.reshape(TB, 14, 224)

    # ---------------- maxpool 2x2, stride 1  ->  [TB, 13, 208] ----------------
    h1 = jnp.maximum(h1[:, :13, :], h1[:, 1:, :])               # pool over output rows
    h1 = jnp.maximum(h1[:, :, :208], h1[:, :, 16:])             # pool over output cols (16-lane shift)

    # ---------------- conv2 (4x4, stride 2) + bias + ReLU ----------------
    # Output row oh2 uses input rows 2*oh2 + i; gather them with unit-stride row slices.
    acc2 = jnp.zeros((TB * 5, 160), f32)
    for i in range(4):
        rows = jnp.concatenate(
            [h1[:, 2 * q + i:2 * q + i + 1, :] for q in range(5)], axis=1)   # [TB, 5, 208]
        acc2 = acc2 + jnp.dot(rows.reshape(TB * 5, 208), w2_ref[i],
                              preferred_element_type=f32)
    h2 = jnp.maximum(acc2 + b2_ref[...], 0.0)                   # [TB*5, 160], lanes=(ow, co)
    h2 = h2.reshape(TB, 5, 160)

    # ---------------- maxpool 2x2, stride 1  ->  [TB, 4, 128] ----------------
    h2 = jnp.maximum(h2[:, :4, :], h2[:, 1:, :])
    h2 = jnp.maximum(h2[:, :, :128], h2[:, :, 32:])             # lanes = (ow, c), exactly 128

    # ---------------- fc1 + ReLU (sum over the 4 pooled rows) ----------------
    acc3 = jnp.zeros((TB, 32), f32)
    for h in range(4):
        acc3 = acc3 + jnp.dot(h2[:, h, :], fc1w_ref[h], preferred_element_type=f32)
    f1 = jnp.maximum(acc3 + fc1b_ref[...], 0.0)                 # [TB, 32]

    # ---------------- fc2 (N padded to 128 -> unmasked lane-dense store) ----------------
    o_ref[...] = (jnp.dot(f1, fc2w_ref[...], preferred_element_type=f32)
                  + fc2b_ref[...]).astype(o_ref.dtype)


# ------------------------------------------------------------------ weight packing (wrapper)

def pack_params(params):
    """One-time repack of the PyTorch-layout weights into the kernel's matmul layout.

    In a training loop this would be hoisted out of the step; here it is a handful of tiny
    XLA ops fused into the same jit.
    """
    f32 = jnp.float32
    w1 = params["conv1_w"].astype(f32)          # [16, 1, 8, 8]
    b1 = params["conv1_b"].astype(f32)          # [16]
    w2 = params["conv2_w"].astype(f32)          # [32, 16, 4, 4]
    b2 = params["conv2_b"].astype(f32)          # [32]
    fc1w = params["fc1_w"].astype(f32)          # [32, 512]
    fc1b = params["fc1_b"].astype(f32)          # [32]
    fc2w = params["fc2_w"].astype(f32)          # [10, 32]
    fc2b = params["fc2_b"].astype(f32)          # [10]

    # conv1 -> [8, 34, 224]: piece index = phase*4 + a (kernel row i = 2a+phase),
    # entry [w, ow*16+co] = w1[co, i, w - 2*ow] if 0 <= w-2*ow < 8 else 0.
    w1r = w1.reshape(16, 8, 8)                                  # [co, i, j]
    j1 = jnp.arange(34)[:, None] - 2 * jnp.arange(14)[None, :]  # [34, 14]
    v1 = ((j1 >= 0) & (j1 < 8)).astype(f32)
    g1 = jnp.take(w1r, jnp.clip(j1, 0, 7), axis=2)              # [co, i, 34, 14]
    g1 = g1 * v1[None, None]
    g1 = g1.reshape(16, 4, 2, 34, 14).transpose(2, 1, 3, 4, 0)  # [phase, a, w, ow, co]
    w1p = g1.reshape(8, 34, 14 * 16)                            # [8, 34, 224]
    b1p = jnp.tile(b1, 14)[None, :]                             # [1, 224]

    # conv2 -> [4, 208, 160]: piece index = kernel row i,
    # entry [ow1*16+ci, ow2*32+co] = w2[co, ci, i, ow1 - 2*ow2] if 0 <= . < 4 else 0.
    j2 = jnp.arange(13)[:, None] - 2 * jnp.arange(5)[None, :]   # [13, 5]
    v2 = ((j2 >= 0) & (j2 < 4)).astype(f32)
    g2 = jnp.take(w2, jnp.clip(j2, 0, 3), axis=3)               # [co, ci, i, 13, 5]
    g2 = g2 * v2[None, None, None]
    g2 = g2.transpose(2, 3, 1, 4, 0)                            # [i, ow1, ci, ow2, co]
    w2p = g2.reshape(4, 13 * 16, 5 * 32)                        # [4, 208, 160]
    b2p = jnp.tile(b2, 5)[None, :]                              # [1, 160]

    # fc1 -> [4, 128, 32]: torch flatten is (c, h, w); internal layout is (h, (w, c)).
    fc1p = fc1w.reshape(32, 32, 4, 4).transpose(2, 3, 1, 0).reshape(4, 128, 32)
    fc1bp = fc1b[None, :]                                       # [1, 32]

    # fc2 -> [32, 128] with N padded 10 -> 128.
    fc2p = jnp.zeros((32, 128), f32).at[:, :10].set(fc2w.T)
    fc2bp = jnp.zeros((1, 128), f32).at[0, :10].set(fc2b)

    return (w1p, b1p, w2p, b2p, fc1p, fc1bp, fc2p, fc2bp)


# ------------------------------------------------------------------ forward wrapper

def _fused_forward(packed, x):
    w1p, b1p, w2p, b2p, fc1p, fc1bp, fc2p, fc2bp = packed
    B = x.shape[0]

    # Input prep (the only per-activation wrapper ops): pad 28->34 and split padded rows
    # into even/odd phases so all stride-2 row accesses inside the kernel are unit-stride.
    xp = jnp.pad(x[:, 0].astype(jnp.float32), ((0, 0), (3, 3), (3, 3)))   # [B, 34, 34]
    xph = jnp.stack([xp[:, 0::2, :], xp[:, 1::2, :]], axis=1)             # [B, 2, 17, 34]

    TB = B if B <= 128 else 128          # batch tile: whole batch if small, else 128 per step
    Bp = ((B + TB - 1) // TB) * TB
    if Bp != B:
        xph = jnp.pad(xph, ((0, Bp - B), (0, 0), (0, 0), (0, 0)))
    grid = (Bp // TB,)

    flops = 2 * Bp * (14 * 272 * 224 + 5 * 832 * 160 + 512 * 32 + 32 * 128)
    bytes_accessed = 4 * (Bp * (2 * 17 * 34 + 128)
                          + 8 * 34 * 224 + 224 + 4 * 208 * 160 + 160
                          + 4 * 128 * 32 + 32 + 32 * 128 + 128)

    out = pl.pallas_call(
        _fused_kernel,
        out_shape=jax.ShapeDtypeStruct((Bp, 128), jnp.float32),
        grid=grid,
        in_specs=[
            pl.BlockSpec((TB, 2, 17, 34), lambda m: (m, 0, 0, 0)),
            pl.BlockSpec((8, 34, 224), lambda m: (0, 0, 0)),
            pl.BlockSpec((1, 224), lambda m: (0, 0)),
            pl.BlockSpec((4, 208, 160), lambda m: (0, 0, 0)),
            pl.BlockSpec((1, 160), lambda m: (0, 0)),
            pl.BlockSpec((4, 128, 32), lambda m: (0, 0, 0)),
            pl.BlockSpec((1, 32), lambda m: (0, 0)),
            pl.BlockSpec((32, 128), lambda m: (0, 0)),
            pl.BlockSpec((1, 128), lambda m: (0, 0)),
        ],
        out_specs=pl.BlockSpec((TB, 128), lambda m: (m, 0)),
        compiler_params=pltpu.CompilerParams(dimension_semantics=("parallel",)),
        cost_estimate=pl.CostEstimate(flops=flops, transcendentals=0,
                                      bytes_accessed=bytes_accessed),
    )(xph, w1p, b1p, w2p, b2p, fc1p, fc1bp, fc2p, fc2bp)

    return out[:B, :10]


def sample_convnet_forward(params, x):
    """Drop-in forward: x [B, 1, 28, 28] -> logits [B, 10]."""
    return _fused_forward(pack_params(params), x)


# ------------------------------------------------------------------ pure-JAX reference

def reference_forward(params, x):
    def conv(x, w, b, stride, pad):
        y = lax.conv_general_dilated(
            x, w, (stride, stride), [(pad, pad), (pad, pad)],
            dimension_numbers=("NCHW", "OIHW", "NCHW"))
        return y + b.reshape(1, -1, 1, 1)

    def pool(x):
        return lax.reduce_window(x, -jnp.inf, lax.max, (1, 1, 2, 2), (1, 1, 1, 1), "VALID")

    x = jax.nn.relu(conv(x, params["conv1_w"], params["conv1_b"], 2, 3))
    x = pool(x)
    x = jax.nn.relu(conv(x, params["conv2_w"], params["conv2_b"], 2, 0))
    x = pool(x)
    x = x.reshape(-1, 32 * 4 * 4)
    x = jax.nn.relu(x @ params["fc1_w"].T + params["fc1_b"])
    x = x @ params["fc2_w"].T + params["fc2_b"]
    return x


# ------------------------------------------------------------------ main

def init_params(key):
    ks = jax.random.split(key, 8)

    def u(k, shape, fan_in):
        bound = 1.0 / jnp.sqrt(fan_in)
        return jax.random.uniform(k, shape, jnp.float32, -bound, bound)

    return {
        "conv1_w": u(ks[0], (16, 1, 8, 8), 1 * 8 * 8),
        "conv1_b": u(ks[1], (16,), 1 * 8 * 8),
        "conv2_w": u(ks[2], (32, 16, 4, 4), 16 * 4 * 4),
        "conv2_b": u(ks[3], (32,), 16 * 4 * 4),
        "fc1_w":   u(ks[4], (32, 512), 512),
        "fc1_b":   u(ks[5], (32,), 512),
        "fc2_w":   u(ks[6], (10, 32), 32),
        "fc2_b":   u(ks[7], (10,), 32),
    }


if __name__ == "__main__":
    key = jax.random.PRNGKey(0)
    kp, kx = jax.random.split(key)
    params = init_params(kp)
    # MNIST-shaped input (28x28 is required by the 32*4*4 flatten); small batch.
    x = jax.random.normal(kx, (2, 1, 28, 28), jnp.float32)

    out = jax.block_until_ready(jax.jit(sample_convnet_forward)(params, x))
    assert out.shape == (2, 10), out.shape

    ref = jax.block_until_ready(jax.jit(reference_forward)(params, x))
    err = jnp.max(jnp.abs(out - ref))
    assert jnp.allclose(out, ref, atol=1e-4, rtol=1e-4), f"max abs err = {err}"

    print("KERNEL_OK")
</pallas_src>

<mosaic_0001>
module attributes {stable_mosaic.version = 11 : i64} {
  func.func @_fused_kernel(%arg0: i32, %arg1: memref<2x2x17x34xf32, #tpu.memory_space<vmem>>, %arg2: memref<8x34x224xf32, #tpu.memory_space<vmem>>, %arg3: memref<1x224xf32, #tpu.memory_space<vmem>>, %arg4: memref<4x208x160xf32, #tpu.memory_space<vmem>>, %arg5: memref<1x160xf32, #tpu.memory_space<vmem>>, %arg6: memref<4x128x32xf32, #tpu.memory_space<vmem>>, %arg7: memref<1x32xf32, #tpu.memory_space<vmem>>, %arg8: memref<32x128xf32, #tpu.memory_space<vmem>>, %arg9: memref<1x128xf32, #tpu.memory_space<vmem>>, %arg10: memref<2x128xf32, #tpu.memory_space<vmem>>) attributes {dimension_semantics = [#tpu.dimension_semantics<parallel>], iteration_bounds = array<i64: 1>, scalar_prefetch = 0 : i64, scratch_operands = 0 : i64, tpu.core_type = #tpu.core_type<tc>, window_params = [{transform_indices = @transform_0, window_bounds = array<i64: 2, 2, 17, 34>}, {pipeline_mode = #tpu.pipeline_mode<synchronous>, transform_indices = @transform_1, window_bounds = array<i64: 8, 34, 224>}, {pipeline_mode = #tpu.pipeline_mode<synchronous>, transform_indices = @transform_2, window_bounds = array<i64: 1, 224>}, {pipeline_mode = #tpu.pipeline_mode<synchronous>, transform_indices = @transform_3, window_bounds = array<i64: 4, 208, 160>}, {pipeline_mode = #tpu.pipeline_mode<synchronous>, transform_indices = @transform_4, window_bounds = array<i64: 1, 160>}, {pipeline_mode = #tpu.pipeline_mode<synchronous>, transform_indices = @transform_5, window_bounds = array<i64: 4, 128, 32>}, {pipeline_mode = #tpu.pipeline_mode<synchronous>, transform_indices = @transform_6, window_bounds = array<i64: 1, 32>}, {pipeline_mode = #tpu.pipeline_mode<synchronous>, transform_indices = @transform_7, window_bounds = array<i64: 32, 128>}, {pipeline_mode = #tpu.pipeline_mode<synchronous>, transform_indices = @transform_8, window_bounds = array<i64: 1, 128>}, {transform_indices = @transform_9, window_bounds = array<i64: 2, 128>}]} {
    %c0 = arith.constant 0 : index
    %c0_0 = arith.constant 0 : index
    %c0_1 = arith.constant 0 : index
    %c0_2 = arith.constant 0 : index
    %0 = vector.load %arg1[%c0, %c0_0, %c0_1, %c0_2] : memref<2x2x17x34xf32, #tpu.memory_space<vmem>>, vector<2x2x17x34xf32>
    %cst = arith.constant 0.000000e+00 : f32
    %1 = vector.broadcast %cst : f32 to vector<28x224xf32>
    %2 = vector.extract_strided_slice %0 {offsets = [0, 0, 0, 0], sizes = [2, 1, 14, 34], strides = [1, 1, 1, 1]} : vector<2x2x17x34xf32> to vector<2x1x14x34xf32>
    %3 = vector.shape_cast %2 : vector<2x1x14x34xf32> to vector<2x14x34xf32>
    %4 = vector.shape_cast %3 : vector<2x14x34xf32> to vector<28x34xf32>
    %c0_3 = arith.constant 0 : index
    %c0_4 = arith.constant 0 : index
    %c0_5 = arith.constant 0 : index
    %5 = vector.load %arg2[%c0_3, %c0_4, %c0_5] : memref<8x34x224xf32, #tpu.memory_space<vmem>>, vector<1x34x224xf32>
    %6 = vector.shape_cast %5 : vector<1x34x224xf32> to vector<34x224xf32>
    %cst_6 = arith.constant dense<0.000000e+00> : vector<28x224xf32>
    %7 = tpu.matmul %4, %6, %cst_6 {dimension_numbers = #tpu.dot_dimension_numbers<[1], [0], [0], [1], [0, 0, 1, 1], [], []>} : vector<28x34xf32>, vector<34x224xf32>, vector<28x224xf32> -> vector<28x224xf32>
    %8 = arith.addf %1, %7 : vector<28x224xf32>
    %9 = vector.extract_strided_slice %0 {offsets = [0, 0, 1, 0], sizes = [2, 1, 14, 34], strides = [1, 1, 1, 1]} : vector<2x2x17x34xf32> to vector<2x1x14x34xf32>
    %10 = vector.shape_cast %9 : vector<2x1x14x34xf32> to vector<2x14x34xf32>
    %11 = vector.shape_cast %10 : vector<2x14x34xf32> to vector<28x34xf32>
    %c1 = arith.constant 1 : index
    %c0_7 = arith.constant 0 : index
    %c0_8 = arith.constant 0 : index
    %12 = vector.load %arg2[%c1, %c0_7, %c0_8] : memref<8x34x224xf32, #tpu.memory_space<vmem>>, vector<1x34x224xf32>
    %13 = vector.shape_cast %12 : vector<1x34x224xf32> to vector<34x224xf32>
    %cst_9 = arith.constant dense<0.000000e+00> : vector<28x224xf32>
    %14 = tpu.matmul %11, %13, %cst_9 {dimension_numbers = #tpu.dot_dimension_numbers<[1], [0], [0], [1], [0, 0, 1, 1], [], []>} : vector<28x34xf32>, vector<34x224xf32>, vector<28x224xf32> -> vector<28x224xf32>
    %15 = arith.addf %8, %14 : vector<28x224xf32>
    %16 = vector.extract_strided_slice %0 {offsets = [0, 0, 2, 0], sizes = [2, 1, 14, 34], strides = [1, 1, 1, 1]} : vector<2x2x17x34xf32> to vector<2x1x14x34xf32>
    %17 = vector.shape_cast %16 : vector<2x1x14x34xf32> to vector<2x14x34xf32>
    %18 = vector.shape_cast %17 : vector<2x14x34xf32> to vector<28x34xf32>
    %c2 = arith.constant 2 : index
    %c0_10 = arith.constant 0 : index
    %c0_11 = arith.constant 0 : index
    %19 = vector.load %arg2[%c2, %c0_10, %c0_11] : memref<8x34x224xf32, #tpu.memory_space<vmem>>, vector<1x34x224xf32>
    %20 = vector.shape_cast %19 : vector<1x34x224xf32> to vector<34x224xf32>
    %cst_12 = arith.constant dense<0.000000e+00> : vector<28x224xf32>
    %21 = tpu.matmul %18, %20, %cst_12 {dimension_numbers = #tpu.dot_dimension_numbers<[1], [0], [0], [1], [0, 0, 1, 1], [], []>} : vector<28x34xf32>, vector<34x224xf32>, vector<28x224xf32> -> vector<28x224xf32>
    %22 = arith.addf %15, %21 : vector<28x224xf32>
    %23 = vector.extract_strided_slice %0 {offsets = [0, 0, 3, 0], sizes = [2, 1, 14, 34], strides = [1, 1, 1, 1]} : vector<2x2x17x34xf32> to vector<2x1x14x34xf32>
    %24 = vector.shape_cast %23 : vector<2x1x14x34xf32> to vector<2x14x34xf32>
    %25 = vector.shape_cast %24 : vector<2x14x34xf32> to vector<28x34xf32>
    %c3 = arith.constant 3 : index
    %c0_13 = arith.constant 0 : index
    %c0_14 = arith.constant 0 : index
    %26 = vector.load %arg2[%c3, %c0_13, %c0_14] : memref<8x34x224xf32, #tpu.memory_space<vmem>>, vector<1x34x224xf32>
    %27 = vector.shape_cast %26 : vector<1x34x224xf32> to vector<34x224xf32>
    %cst_15 = arith.constant dense<0.000000e+00> : vector<28x224xf32>
    %28 = tpu.matmul %25, %27, %cst_15 {dimension_numbers = #tpu.dot_dimension_numbers<[1], [0], [0], [1], [0, 0, 1, 1], [], []>} : vector<28x34xf32>, vector<34x224xf32>, vector<28x224xf32> -> vector<28x224xf32>
    %29 = arith.addf %22, %28 : vector<28x224xf32>
    %30 = vector.extract_strided_slice %0 {offsets = [0, 1, 0, 0], sizes = [2, 1, 14, 34], strides = [1, 1, 1, 1]} : vector<2x2x17x34xf32> to vector<2x1x14x34xf32>
    %31 = vector.shape_cast %30 : vector<2x1x14x34xf32> to vector<2x14x34xf32>
    %32 = vector.shape_cast %31 : vector<2x14x34xf32> to vector<28x34xf32>
    %c4 = arith.constant 4 : index
    %c0_16 = arith.constant 0 : index
    %c0_17 = arith.constant 0 : index
    %33 = vector.load %arg2[%c4, %c0_16, %c0_17] : memref<8x34x224xf32, #tpu.memory_space<vmem>>, vector<1x34x224xf32>
    %34 = vector.shape_cast %33 : vector<1x34x224xf32> to vector<34x224xf32>
    %cst_18 = arith.constant dense<0.000000e+00> : vector<28x224xf32>
    %35 = tpu.matmul %32, %34, %cst_18 {dimension_numbers = #tpu.dot_dimension_numbers<[1], [0], [0], [1], [0, 0, 1, 1], [], []>} : vector<28x34xf32>, vector<34x224xf32>, vector<28x224xf32> -> vector<28x224xf32>
    %36 = arith.addf %29, %35 : vector<28x224xf32>
    %37 = vector.extract_strided_slice %0 {offsets = [0, 1, 1, 0], sizes = [2, 1, 14, 34], strides = [1, 1, 1, 1]} : vector<2x2x17x34xf32> to vector<2x1x14x34xf32>
    %38 = vector.shape_cast %37 : vector<2x1x14x34xf32> to vector<2x14x34xf32>
    %39 = vector.shape_cast %38 : vector<2x14x34xf32> to vector<28x34xf32>
    %c5 = arith.constant 5 : index
    %c0_19 = arith.constant 0 : index
    %c0_20 = arith.constant 0 : index
    %40 = vector.load %arg2[%c5, %c0_19, %c0_20] : memref<8x34x224xf32, #tpu.memory_space<vmem>>, vector<1x34x224xf32>
    %41 = vector.shape_cast %40 : vector<1x34x224xf32> to vector<34x224xf32>
    %cst_21 = arith.constant dense<0.000000e+00> : vector<28x224xf32>
    %42 = tpu.matmul %39, %41, %cst_21 {dimension_numbers = #tpu.dot_dimension_numbers<[1], [0], [0], [1], [0, 0, 1, 1], [], []>} : vector<28x34xf32>, vector<34x224xf32>, vector<28x224xf32> -> vector<28x224xf32>
    %43 = arith.addf %36, %42 : vector<28x224xf32>
    %44 = vector.extract_strided_slice %0 {offsets = [0, 1, 2, 0], sizes = [2, 1, 14, 34], strides = [1, 1, 1, 1]} : vector<2x2x17x34xf32> to vector<2x1x14x34xf32>
    %45 = vector.shape_cast %44 : vector<2x1x14x34xf32> to vector<2x14x34xf32>
    %46 = vector.shape_cast %45 : vector<2x14x34xf32> to vector<28x34xf32>
    %c6 = arith.constant 6 : index
    %c0_22 = arith.constant 0 : index
    %c0_23 = arith.constant 0 : index
    %47 = vector.load %arg2[%c6, %c0_22, %c0_23] : memref<8x34x224xf32, #tpu.memory_space<vmem>>, vector<1x34x224xf32>
    %48 = vector.shape_cast %47 : vector<1x34x224xf32> to vector<34x224xf32>
    %cst_24 = arith.constant dense<0.000000e+00> : vector<28x224xf32>
    %49 = tpu.matmul %46, %48, %cst_24 {dimension_numbers = #tpu.dot_dimension_numbers<[1], [0], [0], [1], [0, 0, 1, 1], [], []>} : vector<28x34xf32>, vector<34x224xf32>, vector<28x224xf32> -> vector<28x224xf32>
    %50 = arith.addf %43, %49 : vector<28x224xf32>
    %51 = vector.extract_strided_slice %0 {offsets = [0, 1, 3, 0], sizes = [2, 1, 14, 34], strides = [1, 1, 1, 1]} : vector<2x2x17x34xf32> to vector<2x1x14x34xf32>
    %52 = vector.shape_cast %51 : vector<2x1x14x34xf32> to vector<2x14x34xf32>
    %53 = vector.shape_cast %52 : vector<2x14x34xf32> to vector<28x34xf32>
    %c7 = arith.constant 7 : index
    %c0_25 = arith.constant 0 : index
    %c0_26 = arith.constant 0 : index
    %54 = vector.load %arg2[%c7, %c0_25, %c0_26] : memref<8x34x224xf32, #tpu.memory_space<vmem>>, vector<1x34x224xf32>
    %55 = vector.shape_cast %54 : vector<1x34x224xf32> to vector<34x224xf32>
    %cst_27 = arith.constant dense<0.000000e+00> : vector<28x224xf32>
    %56 = tpu.matmul %53, %55, %cst_27 {dimension_numbers = #tpu.dot_dimension_numbers<[1], [0], [0], [1], [0, 0, 1, 1], [], []>} : vector<28x34xf32>, vector<34x224xf32>, vector<28x224xf32> -> vector<28x224xf32>
    %57 = arith.addf %50, %56 : vector<28x224xf32>
    %c0_28 = arith.constant 0 : index
    %c0_29 = arith.constant 0 : index
    %58 = vector.load %arg3[%c0_28, %c0_29] : memref<1x224xf32, #tpu.memory_space<vmem>>, vector<1x224xf32>
    %59 = vector.broadcast %58 : vector<1x224xf32> to vector<28x224xf32>
    %60 = arith.addf %57, %59 : vector<28x224xf32>
    %cst_30 = arith.constant 0.000000e+00 : f32
    %61 = vector.broadcast %cst_30 : f32 to vector<28x224xf32>
    %62 = arith.maximumf %60, %61 : vector<28x224xf32>
    %63 = vector.shape_cast %62 : vector<28x224xf32> to vector<2x14x224xf32>
    %64 = vector.extract_strided_slice %63 {offsets = [0, 0, 0], sizes = [2, 13, 224], strides = [1, 1, 1]} : vector<2x14x224xf32> to vector<2x13x224xf32>
    %65 = vector.extract_strided_slice %63 {offsets = [0, 1, 0], sizes = [2, 13, 224], strides = [1, 1, 1]} : vector<2x14x224xf32> to vector<2x13x224xf32>
    %66 = arith.maximumf %64, %65 : vector<2x13x224xf32>
    %67 = vector.extract_strided_slice %66 {offsets = [0, 0, 0], sizes = [2, 13, 208], strides = [1, 1, 1]} : vector<2x13x224xf32> to vector<2x13x208xf32>
    %68 = vector.extract_strided_slice %66 {offsets = [0, 0, 16], sizes = [2, 13, 208], strides = [1, 1, 1]} : vector<2x13x224xf32> to vector<2x13x208xf32>
    %69 = arith.maximumf %67, %68 : vector<2x13x208xf32>
    %cst_31 = arith.constant 0.000000e+00 : f32
    %70 = vector.broadcast %cst_31 : f32 to vector<10x160xf32>
    %71 = vector.extract_strided_slice %69 {offsets = [0, 0, 0], sizes = [2, 1, 208], strides = [1, 1, 1]} : vector<2x13x208xf32> to vector<2x1x208xf32>
    %72 = vector.extract_strided_slice %69 {offsets = [0, 2, 0], sizes = [2, 1, 208], strides = [1, 1, 1]} : vector<2x13x208xf32> to vector<2x1x208xf32>
    %73 = vector.extract_strided_slice %69 {offsets = [0, 4, 0], sizes = [2, 1, 208], strides = [1, 1, 1]} : vector<2x13x208xf32> to vector<2x1x208xf32>
    %74 = vector.extract_strided_slice %69 {offsets = [0, 6, 0], sizes = [2, 1, 208], strides = [1, 1, 1]} : vector<2x13x208xf32> to vector<2x1x208xf32>
    %75 = vector.extract_strided_slice %69 {offsets = [0, 8, 0], sizes = [2, 1, 208], strides = [1, 1, 1]} : vector<2x13x208xf32> to vector<2x1x208xf32>
    %76 = tpu.concatenate %71, %72, %73, %74, %75 in 1 : vector<2x1x208xf32>, vector<2x1x208xf32>, vector<2x1x208xf32>, vector<2x1x208xf32>, vector<2x1x208xf32> -> vector<2x5x208xf32>
    %77 = vector.shape_cast %76 : vector<2x5x208xf32> to vector<10x208xf32>
    %c0_32 = arith.constant 0 : index
    %c0_33 = arith.constant 0 : index
    %c0_34 = arith.constant 0 : index
    %78 = vector.load %arg4[%c0_32, %c0_33, %c0_34] : memref<4x208x160xf32, #tpu.memory_space<vmem>>, vector<1x208x160xf32>
    %79 = vector.shape_cast %78 : vector<1x208x160xf32> to vector<208x160xf32>
    %cst_35 = arith.constant dense<0.000000e+00> : vector<10x160xf32>
    %80 = tpu.matmul %77, %79, %cst_35 {dimension_numbers = #tpu.dot_dimension_numbers<[1], [0], [0], [1], [0, 0, 1, 1], [], []>} : vector<10x208xf32>, vector<208x160xf32>, vector<10x160xf32> -> vector<10x160xf32>
    %81 = arith.addf %70, %80 : vector<10x160xf32>
    %82 = vector.extract_strided_slice %69 {offsets = [0, 1, 0], sizes = [2, 1, 208], strides = [1, 1, 1]} : vector<2x13x208xf32> to vector<2x1x208xf32>
    %83 = vector.extract_strided_slice %69 {offsets = [0, 3, 0], sizes = [2, 1, 208], strides = [1, 1, 1]} : vector<2x13x208xf32> to vector<2x1x208xf32>
    %84 = vector.extract_strided_slice %69 {offsets = [0, 5, 0], sizes = [2, 1, 208], strides = [1, 1, 1]} : vector<2x13x208xf32> to vector<2x1x208xf32>
    %85 = vector.extract_strided_slice %69 {offsets = [0, 7, 0], sizes = [2, 1, 208], strides = [1, 1, 1]} : vector<2x13x208xf32> to vector<2x1x208xf32>
    %86 = vector.extract_strided_slice %69 {offsets = [0, 9, 0], sizes = [2, 1, 208], strides = [1, 1, 1]} : vector<2x13x208xf32> to vector<2x1x208xf32>
    %87 = tpu.concatenate %82, %83, %84, %85, %86 in 1 : vector<2x1x208xf32>, vector<2x1x208xf32>, vector<2x1x208xf32>, vector<2x1x208xf32>, vector<2x1x208xf32> -> vector<2x5x208xf32>
    %88 = vector.shape_cast %87 : vector<2x5x208xf32> to vector<10x208xf32>
    %c1_36 = arith.constant 1 : index
    %c0_37 = arith.constant 0 : index
    %c0_38 = arith.constant 0 : index
    %89 = vector.load %arg4[%c1_36, %c0_37, %c0_38] : memref<4x208x160xf32, #tpu.memory_space<vmem>>, vector<1x208x160xf32>
    %90 = vector.shape_cast %89 : vector<1x208x160xf32> to vector<208x160xf32>
    %cst_39 = arith.constant dense<0.000000e+00> : vector<10x160xf32>
    %91 = tpu.matmul %88, %90, %cst_39 {dimension_numbers = #tpu.dot_dimension_numbers<[1], [0], [0], [1], [0, 0, 1, 1], [], []>} : vector<10x208xf32>, vector<208x160xf32>, vector<10x160xf32> -> vector<10x160xf32>
    %92 = arith.addf %81, %91 : vector<10x160xf32>
    %93 = vector.extract_strided_slice %69 {offsets = [0, 2, 0], sizes = [2, 1, 208], strides = [1, 1, 1]} : vector<2x13x208xf32> to vector<2x1x208xf32>
    %94 = vector.extract_strided_slice %69 {offsets = [0, 4, 0], sizes = [2, 1, 208], strides = [1, 1, 1]} : vector<2x13x208xf32> to vector<2x1x208xf32>
    %95 = vector.extract_strided_slice %69 {offsets = [0, 6, 0], sizes = [2, 1, 208], strides = [1, 1, 1]} : vector<2x13x208xf32> to vector<2x1x208xf32>
    %96 = vector.extract_strided_slice %69 {offsets = [0, 8, 0], sizes = [2, 1, 208], strides = [1, 1, 1]} : vector<2x13x208xf32> to vector<2x1x208xf32>
    %97 = vector.extract_strided_slice %69 {offsets = [0, 10, 0], sizes = [2, 1, 208], strides = [1, 1, 1]} : vector<2x13x208xf32> to vector<2x1x208xf32>
    %98 = tpu.concatenate %93, %94, %95, %96, %97 in 1 : vector<2x1x208xf32>, vector<2x1x208xf32>, vector<2x1x208xf32>, vector<2x1x208xf32>, vector<2x1x208xf32> -> vector<2x5x208xf32>
    %99 = vector.shape_cast %98 : vector<2x5x208xf32> to vector<10x208xf32>
    %c2_40 = arith.constant 2 : index
    %c0_41 = arith.constant 0 : index
    %c0_42 = arith.constant 0 : index
    %100 = vector.load %arg4[%c2_40, %c0_41, %c0_42] : memref<4x208x160xf32, #tpu.memory_space<vmem>>, vector<1x208x160xf32>
    %101 = vector.shape_cast %100 : vector<1x208x160xf32> to vector<208x160xf32>
    %cst_43 = arith.constant dense<0.000000e+00> : vector<10x160xf32>
    %102 = tpu.matmul %99, %101, %cst_43 {dimension_numbers = #tpu.dot_dimension_numbers<[1], [0], [0], [1], [0, 0, 1, 1], [], []>} : vector<10x208xf32>, vector<208x160xf32>, vector<10x160xf32> -> vector<10x160xf32>
    %103 = arith.addf %92, %102 : vector<10x160xf32>
    %104 = vector.extract_strided_slice %69 {offsets = [0, 3, 0], sizes = [2, 1, 208], strides = [1, 1, 1]} : vector<2x13x208xf32> to vector<2x1x208xf32>
    %105 = vector.extract_strided_slice %69 {offsets = [0, 5, 0], sizes = [2, 1, 208], strides = [1, 1, 1]} : vector<2x13x208xf32> to vector<2x1x208xf32>
    %106 = vector.extract_strided_slice %69 {offsets = [0, 7, 0], sizes = [2, 1, 208], strides = [1, 1, 1]} : vector<2x13x208xf32> to vector<2x1x208xf32>
    %107 = vector.extract_strided_slice %69 {offsets = [0, 9, 0], sizes = [2, 1, 208], strides = [1, 1, 1]} : vector<2x13x208xf32> to vector<2x1x208xf32>
    %108 = vector.extract_strided_slice %69 {offsets = [0, 11, 0], sizes = [2, 1, 208], strides = [1, 1, 1]} : vector<2x13x208xf32> to vector<2x1x208xf32>
    %109 = tpu.concatenate %104, %105, %106, %107, %108 in 1 : vector<2x1x208xf32>, vector<2x1x208xf32>, vector<2x1x208xf32>, vector<2x1x208xf32>, vector<2x1x208xf32> -> vector<2x5x208xf32>
    %110 = vector.shape_cast %109 : vector<2x5x208xf32> to vector<10x208xf32>
    %c3_44 = arith.constant 3 : index
    %c0_45 = arith.constant 0 : index
    %c0_46 = arith.constant 0 : index
    %111 = vector.load %arg4[%c3_44, %c0_45, %c0_46] : memref<4x208x160xf32, #tpu.memory_space<vmem>>, vector<1x208x160xf32>
    %112 = vector.shape_cast %111 : vector<1x208x160xf32> to vector<208x160xf32>
    %cst_47 = arith.constant dense<0.000000e+00> : vector<10x160xf32>
    %113 = tpu.matmul %110, %112, %cst_47 {dimension_numbers = #tpu.dot_dimension_numbers<[1], [0], [0], [1], [0, 0, 1, 1], [], []>} : vector<10x208xf32>, vector<208x160xf32>, vector<10x160xf32> -> vector<10x160xf32>
    %114 = arith.addf %103, %113 : vector<10x160xf32>
    %c0_48 = arith.constant 0 : index
    %c0_49 = arith.constant 0 : index
    %115 = vector.load %arg5[%c0_48, %c0_49] : memref<1x160xf32, #tpu.memory_space<vmem>>, vector<1x160xf32>
    %116 = vector.broadcast %115 : vector<1x160xf32> to vector<10x160xf32>
    %117 = arith.addf %114, %116 : vector<10x160xf32>
    %cst_50 = arith.constant 0.000000e+00 : f32
    %118 = vector.broadcast %cst_50 : f32 to vector<10x160xf32>
    %119 = arith.maximumf %117, %118 : vector<10x160xf32>
    %120 = vector.shape_cast %119 : vector<10x160xf32> to vector<2x5x160xf32>
    %121 = vector.extract_strided_slice %120 {offsets = [0, 0, 0], sizes = [2, 4, 160], strides = [1, 1, 1]} : vector<2x5x160xf32> to vector<2x4x160xf32>
    %122 = vector.extract_strided_slice %120 {offsets = [0, 1, 0], sizes = [2, 4, 160], strides = [1, 1, 1]} : vector<2x5x160xf32> to vector<2x4x160xf32>
    %123 = arith.maximumf %121, %122 : vector<2x4x160xf32>
    %124 = vector.extract_strided_slice %123 {offsets = [0, 0, 0], sizes = [2, 4, 128], strides = [1, 1, 1]} : vector<2x4x160xf32> to vector<2x4x128xf32>
    %125 = vector.extract_strided_slice %123 {offsets = [0, 0, 32], sizes = [2, 4, 128], strides = [1, 1, 1]} : vector<2x4x160xf32> to vector<2x4x128xf32>
    %126 = arith.maximumf %124, %125 : vector<2x4x128xf32>
    %cst_51 = arith.constant 0.000000e+00 : f32
    %127 = vector.broadcast %cst_51 : f32 to vector<2x32xf32>
    %128 = vector.extract_strided_slice %126 {offsets = [0, 0, 0], sizes = [2, 1, 128], strides = [1, 1, 1]} : vector<2x4x128xf32> to vector<2x1x128xf32>
    %129 = vector.shape_cast %128 : vector<2x1x128xf32> to vector<2x128xf32>
    %c0_52 = arith.constant 0 : index
    %c0_53 = arith.constant 0 : index
    %c0_54 = arith.constant 0 : index
    %130 = vector.load %arg6[%c0_52, %c0_53, %c0_54] : memref<4x128x32xf32, #tpu.memory_space<vmem>>, vector<1x128x32xf32>
    %131 = vector.shape_cast %130 : vector<1x128x32xf32> to vector<128x32xf32>
    %cst_55 = arith.constant dense<0.000000e+00> : vector<2x32xf32>
    %132 = tpu.matmul %129, %131, %cst_55 {dimension_numbers = #tpu.dot_dimension_numbers<[1], [0], [0], [1], [0, 0, 1, 1], [], []>} : vector<2x128xf32>, vector<128x32xf32>, vector<2x32xf32> -> vector<2x32xf32>
    %133 = arith.addf %127, %132 : vector<2x32xf32>
    %134 = vector.extract_strided_slice %126 {offsets = [0, 1, 0], sizes = [2, 1, 128], strides = [1, 1, 1]} : vector<2x4x128xf32> to vector<2x1x128xf32>
    %135 = vector.shape_cast %134 : vector<2x1x128xf32> to vector<2x128xf32>
    %c1_56 = arith.constant 1 : index
    %c0_57 = arith.constant 0 : index
    %c0_58 = arith.constant 0 : index
    %136 = vector.load %arg6[%c1_56, %c0_57, %c0_58] : memref<4x128x32xf32, #tpu.memory_space<vmem>>, vector<1x128x32xf32>
    %137 = vector.shape_cast %136 : vector<1x128x32xf32> to vector<128x32xf32>
    %cst_59 = arith.constant dense<0.000000e+00> : vector<2x32xf32>
    %138 = tpu.matmul %135, %137, %cst_59 {dimension_numbers = #tpu.dot_dimension_numbers<[1], [0], [0], [1], [0, 0, 1, 1], [], []>} : vector<2x128xf32>, vector<128x32xf32>, vector<2x32xf32> -> vector<2x32xf32>
    %139 = arith.addf %133, %138 : vector<2x32xf32>
    %140 = vector.extract_strided_slice %126 {offsets = [0, 2, 0], sizes = [2, 1, 128], strides = [1, 1, 1]} : vector<2x4x128xf32> to vector<2x1x128xf32>
    %141 = vector.shape_cast %140 : vector<2x1x128xf32> to vector<2x128xf32>
    %c2_60 = arith.constant 2 : index
    %c0_61 = arith.constant 0 : index
    %c0_62 = arith.constant 0 : index
    %142 = vector.load %arg6[%c2_60, %c0_61, %c0_62] : memref<4x128x32xf32, #tpu.memory_space<vmem>>, vector<1x128x32xf32>
    %143 = vector.shape_cast %142 : vector<1x128x32xf32> to vector<128x32xf32>
    %cst_63 = arith.constant dense<0.000000e+00> : vector<2x32xf32>
    %144 = tpu.matmul %141, %143, %cst_63 {dimension_numbers = #tpu.dot_dimension_numbers<[1], [0], [0], [1], [0, 0, 1, 1], [], []>} : vector<2x128xf32>, vector<128x32xf32>, vector<2x32xf32> -> vector<2x32xf32>
    %145 = arith.addf %139, %144 : vector<2x32xf32>
    %146 = vector.extract_strided_slice %126 {offsets = [0, 3, 0], sizes = [2, 1, 128], strides = [1, 1, 1]} : vector<2x4x128xf32> to vector<2x1x128xf32>
    %147 = vector.shape_cast %146 : vector<2x1x128xf32> to vector<2x128xf32>
    %c3_64 = arith.constant 3 : index
    %c0_65 = arith.constant 0 : index
    %c0_66 = arith.constant 0 : index
    %148 = vector.load %arg6[%c3_64, %c0_65, %c0_66] : memref<4x128x32xf32, #tpu.memory_space<vmem>>, vector<1x128x32xf32>
    %149 = vector.shape_cast %148 : vector<1x128x32xf32> to vector<128x32xf32>
    %cst_67 = arith.constant dense<0.000000e+00> : vector<2x32xf32>
    %150 = tpu.matmul %147, %149, %cst_67 {dimension_numbers = #tpu.dot_dimension_numbers<[1], [0], [0], [1], [0, 0, 1, 1], [], []>} : vector<2x128xf32>, vector<128x32xf32>, vector<2x32xf32> -> vector<2x32xf32>
    %151 = arith.addf %145, %150 : vector<2x32xf32>
    %c0_68 = arith.constant 0 : index
    %c0_69 = arith.constant 0 : index
    %152 = vector.load %arg7[%c0_68, %c0_69] : memref<1x32xf32, #tpu.memory_space<vmem>>, vector<1x32xf32>
    %153 = vector.broadcast %152 : vector<1x32xf32> to vector<2x32xf32>
    %154 = arith.addf %151, %153 : vector<2x32xf32>
    %cst_70 = arith.constant 0.000000e+00 : f32
    %155 = vector.broadcast %cst_70 : f32 to vector<2x32xf32>
    %156 = arith.maximumf %154, %155 : vector<2x32xf32>
    %c0_71 = arith.constant 0 : index
    %c0_72 = arith.constant 0 : index
    %157 = vector.load %arg8[%c0_71, %c0_72] : memref<32x128xf32, #tpu.memory_space<vmem>>, vector<32x128xf32>
    %cst_73 = arith.constant dense<0.000000e+00> : vector<2x128xf32>
    %158 = tpu.matmul %156, %157, %cst_73 {dimension_numbers = #tpu.dot_dimension_numbers<[1], [0], [0], [1], [0, 0, 1, 1], [], []>} : vector<2x32xf32>, vector<32x128xf32>, vector<2x128xf32> -> vector<2x128xf32>
    %c0_74 = arith.constant 0 : index
    %c0_75 = arith.constant 0 : index
    %159 = vector.load %arg9[%c0_74, %c0_75] : memref<1x128xf32, #tpu.memory_space<vmem>>, vector<1x128xf32>
    %160 = vector.broadcast %159 : vector<1x128xf32> to vector<2x128xf32>
    %161 = arith.addf %158, %160 : vector<2x128xf32>
    %c0_76 = arith.constant 0 : index
    %c0_77 = arith.constant 0 : index
    %162 = vector.load %arg10[%c0_76, %c0_77] : memref<2x128xf32, #tpu.memory_space<vmem>>, vector<2x128xf32>
    tpu.vector_store %arg10[%c0_76, %c0_77], %161 {strides = array<i32>} : memref<2x128xf32, #tpu.memory_space<vmem>>, vector<2x128xf32>,
    return
  }
  func.func @transform_0(%arg0: i32) -> (i32, i32, i32, i32) {
    %c0_i32 = arith.constant 0 : i32
    %c0_i32_0 = arith.constant 0 : i32
    %c0_i32_1 = arith.constant 0 : i32
    %c0_i32_2 = arith.constant 0 : i32
    return %arg0, %c0_i32, %c0_i32_0, %c0_i32_1 : i32, i32, i32, i32
  }
  func.func @transform_1(%arg0: i32) -> (i32, i32, i32) {
    %c0_i32 = arith.constant 0 : i32
    %c0_i32_0 = arith.constant 0 : i32
    %c0_i32_1 = arith.constant 0 : i32
    %c0_i32_2 = arith.constant 0 : i32
    return %c0_i32, %c0_i32_0, %c0_i32_1 : i32, i32, i32
  }
  func.func @transform_2(%arg0: i32) -> (i32, i32) {
    %c0_i32 = arith.constant 0 : i32
    %c0_i32_0 = arith.constant 0 : i32
    %c0_i32_1 = arith.constant 0 : i32
    return %c0_i32, %c0_i32_0 : i32, i32
  }
  func.func @transform_3(%arg0: i32) -> (i32, i32, i32) {
    %c0_i32 = arith.constant 0 : i32
    %c0_i32_0 = arith.constant 0 : i32
    %c0_i32_1 = arith.constant 0 : i32
    %c0_i32_2 = arith.constant 0 : i32
    return %c0_i32, %c0_i32_0, %c0_i32_1 : i32, i32, i32
  }
  func.func @transform_4(%arg0: i32) -> (i32, i32) {
    %c0_i32 = arith.constant 0 : i32
    %c0_i32_0 = arith.constant 0 : i32
    %c0_i32_1 = arith.constant 0 : i32
    return %c0_i32, %c0_i32_0 : i32, i32
  }
  func.func @transform_5(%arg0: i32) -> (i32, i32, i32) {
    %c0_i32 = arith.constant 0 : i32
    %c0_i32_0 = arith.constant 0 : i32
    %c0_i32_1 = arith.constant 0 : i32
    %c0_i32_2 = arith.constant 0 : i32
    return %c0_i32, %c0_i32_0, %c0_i32_1 : i32, i32, i32
  }
  func.func @transform_6(%arg0: i32) -> (i32, i32) {
    %c0_i32 = arith.constant 0 : i32
    %c0_i32_0 = arith.constant 0 : i32
    %c0_i32_1 = arith.constant 0 : i32
    return %c0_i32, %c0_i32_0 : i32, i32
  }
  func.func @transform_7(%arg0: i32) -> (i32, i32) {
    %c0_i32 = arith.constant 0 : i32
    %c0_i32_0 = arith.constant 0 : i32
    %c0_i32_1 = arith.constant 0 : i32
    return %c0_i32, %c0_i32_0 : i32, i32
  }
  func.func @transform_8(%arg0: i32) -> (i32, i32) {
    %c0_i32 = arith.constant 0 : i32
    %c0_i32_0 = arith.constant 0 : i32
    %c0_i32_1 = arith.constant 0 : i32
    return %c0_i32, %c0_i32_0 : i32, i32
  }
  func.func @transform_9(%arg0: i32) -> (i32, i32) {
    %c0_i32 = arith.constant 0 : i32
    %c0_i32_0 = arith.constant 0 : i32
    return %arg0, %c0_i32 : i32, i32
  }
}

</mosaic_0001>

<bundles_post_ra>
// kernel: tile.13
= control target key start
LH: loop header
LB: loop body
LE: loop exit
PB: predicated region body
PF: predicated region fallthrough
CT: control target
= control target key end

     0   :  { %s28_s0 = inlined_call_operand.vmem [shape: f32[16], index: 0, kind: input, shape index: {}]   ;;  %s29_s1 = inlined_call_operand.vmem [shape: f32[14,16], index: 1, kind: output, shape index: {}]  }
   0x1   :  { %v4_v0 = vld [vmem:[%s28_s0] ss:$0 sm:$0xff] }
   0x2   :  { %5 = vst [vmem:[%s29_s1] sm:$0xff] %v4_v0  ;;  %8 = vst [vmem:[%s29_s1 + $0x8] sm:$0xff] %v4_v0 }

// kernel: tile.14
= control target key start
LH: loop header
LB: loop body
LE: loop exit
PB: predicated region body
PF: predicated region fallthrough
CT: control target
= control target key end

     0   :  { %s19_s8 = smov 3  ;;  %s82_s9 = smov 112   ;;  %vm4_vm0 = vcmask 130048   ;;  %vm10_vm1 = vcmask 1048448   ;;  %vm16_vm2 = vcmask 917248   ;;  %vm23_vm3 = vcmask 786048   ;;  %s129_s0 = inlined_call_operand.vmem [shape: f32[14,16], index: 0, kind: input, shape index: {}]   ;;  %s130_s1 = inlined_call_operand.vmem [shape: f32[1,224], index: 1, kind: output, shape index: {}]  }
   0x1   :  { %v67_v0 = vld [vmem:[%s129_s0 + $0x7] sm:$0x1]   ;;  %v69_v1 = vld [vmem:[%s129_s0 + $0x5] ss:$8 sm:%s19_s8]   ;;  %s83_s12 = smov 80   ;;  %s26_s15 = smov 3 }
   0x2   :  { %8 = vrot.lane.b32.xlu0 %v67_v0, %s82_s9  ;;  %21 = vrot.lane.b32.xlu1 %v69_v1, %s83_s12  ;;  %v68_v2 = vld [vmem:[%s129_s0 + $0x6] sm:$0x1]   ;;  %s33_s18 = smov 3  ;;  %s40_s19 = smov 3  ;;  %vm30_vm4 = vcmask 654848   ;;  %vm37_vm5 = vcmask 523648  }
   0x3   :  { %v70_v3 = vld [vmem:[%s129_s0 + $0x4] ss:$8 sm:%s26_s15]   ;;  %s84_s20 = smov 96   ;;  %s85_s21 = smov 64   ;;  %v71_v4 = vld [vmem:[%s129_s0 + $0x3] ss:$8 sm:%s33_s18]  }
   0x4   :  { %s2_s24 = smov 3  ;;  %v72_v5 = vld [vmem:[%s129_s0 + $0x2] ss:$8 sm:%s40_s19]   ;;  %s47_s27 = smov 3  ;;  %vm44_vm6 = vcmask 392448   ;;  %vm51_vm7 = vcmask 261248  }
   0x5   :  { %v3_v6 = vld [vmem:[%s129_s0] ss:$8 sm:%s2_s24]   ;;  %s86_s30 = smov 48   ;;  %s87_s2 = smov 32   ;;  %v73_v7 = vld [vmem:[%s129_s0 + $0x1] ss:$8 sm:%s47_s27]  }
   0x6   :  { %14 = vrot.lane.b32.xlu0 %v68_v2, %s84_s20  ;;  %28 = vrot.lane.b32.xlu1 %v70_v3, %s85_s21  ;;  %5 = vst.msk [vmem:[#allocation0] ss:$8 sm:$0x3] %vm4_vm0, %v3_v6   ;;  %s88_s0 = smov 16  }
   0xa   :  { %35 = vrot.lane.b32.xlu0 %v71_v4, %s86_s30  ;;  %42 = vrot.lane.b32.xlu1 %v72_v5, %s87_s2 }
   0xe   :  { %49 = vrot.lane.b32.xlu0 %v73_v7, %s88_s0 }
  0x74   :  { %v9_v8 = vpop.permute.xlu0 %8   ;;  %v22_v9 = vpop.permute.xlu1 %21  }
  0x75   :  { %11 = vst.msk [vmem:[#allocation0] sm:$0x1] %vm10_vm1, %v9_v8  }
  0x78   :  { %v15_v10 = vpop.permute.xlu0 %14   ;;  %v29_v11 = vpop.permute.xlu1 %28  }
  0x79   :  { %17 = vst.msk [vmem:[#allocation0] sm:$0x1] %vm16_vm2, %v15_v10  }
  0x7a   :  { %24 = vst.msk [vmem:[#allocation0] ss:$8 sm:$0x3] %vm23_vm3, %v22_v9  }
  0x7b   :  { %31 = vst.msk [vmem:[#allocation0] ss:$8 sm:$0x3] %vm30_vm4, %v29_v11  }
  0x7c   :  { %v36_v12 = vpop.permute.xlu0 %35   ;;  %v43_v13 = vpop.permute.xlu1 %42  }
  0x7d   :  { %38 = vst.msk [vmem:[#allocation0] ss:$8 sm:$0x3] %vm37_vm5, %v36_v12  }
  0x7e   :  { %45 = vst.msk [vmem:[#allocation0] ss:$8 sm:$0x3] %vm44_vm6, %v43_v13  }
  0x80   :  { %v50_v14 = vpop.permute.xlu0 %49  }
  0x81   :  { %52 = vst.msk [vmem:[#allocation0] ss:$8 sm:$0x3] %vm51_vm7, %v50_v14  }
  0x88   :  { %v57_v15 = vld [vmem:[#allocation0] sm:$0x1]  ;;  %v62_v16 = vld [vmem:[#allocation0 + $0x8] sm:$0x1] }
  0x89   :  { %60 = vst [vmem:[%s130_s1] sm:$0x1] %v57_v15  ;;  %74 = vst [vmem:[%s130_s1 + $0x1] sm:$0x1] %v62_v16 }

// kernel: tile.18
= control target key start
LH: loop header
LB: loop body
LE: loop exit
PB: predicated region body
PF: predicated region fallthrough
CT: control target
= control target key end

     0   :  { %s22_s0 = inlined_call_operand.vmem [shape: f32[32], index: 0, kind: input, shape index: {}]   ;;  %s23_s1 = inlined_call_operand.vmem [shape: f32[5,32], index: 1, kind: output, shape index: {}]  }
   0x1   :  { %v4_v0 = vld [vmem:[%s22_s0] ss:$0 sm:$0xff] }
   0x2   :  { %5 = vst [vmem:[%s23_s1] sm:$0xff] %v4_v0 }

// kernel: tile.19
= control target key start
LH: loop header
LB: loop body
LE: loop exit
PB: predicated region body
PF: predicated region fallthrough
CT: control target
= control target key end

     0   :  { %s45_s8 = smov 96   ;;  %s2_s11 = smov 3  ;;  %vm4_vm0 = vcmask 261120   ;;  %vm10_vm1 = vcmask 1048320   ;;  %vm16_vm2 = vcmask 785920   ;;  %vm22_vm3 = vcmask 523520   ;;  %s76_s0 = inlined_call_operand.vmem [shape: f32[5,32], index: 0, kind: input, shape index: {}]   ;;  %s77_s1 = inlined_call_operand.vmem [shape: f32[1,160], index: 1, kind: output, shape index: {}]  }
   0x1   :  { %v38_v0 = vld [vmem:[%s76_s0 + $0x3] sm:$0x1]   ;;  %v40_v1 = vld [vmem:[%s76_s0 + $0x1] sm:$0x1]   ;;  %v39_v2 = vld [vmem:[%s76_s0 + $0x2] sm:$0x1]  }
   0x2   :  { %8 = vrot.lane.b32.xlu0 %v38_v0, %s45_s8  ;;  %s46_s14 = smov 32   ;;  %v3_v3 = vld [vmem:[%s76_s0] ss:$4 sm:%s2_s11]   ;;  %s47_s0 = smov 64  }
   0x3   :  { %20 = vrot.lane.b32.xlu1 %v40_v1, %s46_s14  ;;  %5 = vst.msk [vmem:[#allocation0] ss:$8 sm:$0x3] %vm4_vm0, %v3_v3  }
   0x6   :  { %14 = vrot.lane.b32.xlu0 %v39_v2, %s47_s0 }
   0xa   :  { %v33_v4 = vld [vmem:[#allocation0 + $0x8] sm:$0x1] }
   0xb   :  { %41 = vst [vmem:[%s77_s1 + $0x1] sm:$0x1] %v33_v4 }
  0x74   :  { %v9_v5 = vpop.permute.xlu0 %8  }
  0x75   :  { %11 = vst.msk [vmem:[#allocation0] sm:$0x1] %vm10_vm1, %v9_v5   ;;  %v21_v6 = vpop.permute.xlu1 %20  }
  0x78   :  { %v15_v7 = vpop.permute.xlu0 %14  }
  0x79   :  { %17 = vst.msk [vmem:[#allocation0] sm:$0x1] %vm16_vm2, %v15_v7  }
  0x7a   :  { %23 = vst.msk [vmem:[#allocation0] sm:$0x1] %vm22_vm3, %v21_v6  }
  0x81   :  { %v28_v8 = vld [vmem:[#allocation0] sm:$0x1] }
  0x82   :  { %31 = vst [vmem:[%s77_s1] sm:$0x1] %v28_v8 }

// kernel: sample_convnet_forward.1
= control target key start
LH: loop header
LB: loop body
LE: loop exit
PB: predicated region body
PF: predicated region fallthrough
CT: control target
= control target key end

     0   :  { %vm257_vm0 = vcmask 1041408   ;;  %v53_v3 = vlaneseq  ;;  %v4893_v12 = vmov 1983009808   ;;  %vm127_vm1 = vcmask 1040384   ;;  %s7282_s0 = inlined_call_operand.vmem [shape: f32[2,2,17,34], index: 0, kind: input, shape index: {}]   ;;  %s7283_s1 = inlined_call_operand.vmem [shape: f32[8,34,224], index: 1, kind: input, shape index: {}]   ;;  %s7284_s2 = inlined_call_operand.vmem [shape: f32[1,224], index: 2, kind: input, shape index: {}]   ;;  %s7285_s3 = inlined_call_operand.vmem [shape: f32[4,208,160], index: 3, kind: input, shape index: {}]   ;;  %s7286_s4 = inlined_call_operand.vmem [shape: f32[1,160], index: 4, kind: input, shape index: {}]   ;;  %s7287_s5 = inlined_call_operand.vmem [shape: f32[4,128,32], index: 5, kind: input, shape index: {}]   ;;  %s7288_s6 = inlined_call_operand.vmem [shape: f32[1,32], index: 6, kind: input, shape index: {}]   ;;  %s7289_s7 = inlined_call_operand.vmem [shape: f32[32,128], index: 7, kind: input, shape index: {}]   ;;  %s7290_s8 = inlined_call_operand.vmem [shape: f32[1,128], index: 8, kind: input, shape index: {}]   ;;  %s7291_s9 = inlined_call_operand.hbm [shape: f32[2,128], index: 9, kind: output, shape index: {}]  }
   0x1   :  { %v4294_v0 = vld [vmem:[%s7283_s1 + $0x98] sm:$0x3]  ;;  %v4293_v1 = vld [vmem:[%s7283_s1 + $0x90] sm:$0x3]  ;;  %v4292_v2 = vld [vmem:[%s7283_s1 + $0x88] sm:$0xff]  ;;  %v51_v13 = vunpack.c.l.s4 %v4893_v12  ;;  %vm128_vm2 = vcmask 1042434  }
   0x2   :  { %4295 = vmatprep.subr.msk.mxu0 %vm257_vm0, %v4294_v0  ;;  %v124_v4 = vld [vmem:[%s7283_s1 + $0x48] sm:$0x3]  ;;  %v123_v5 = vld [vmem:[%s7283_s1 + $0x40] sm:$0x3]  ;;  %v122_v7 = vld [vmem:[%s7283_s1 + $0x38] sm:$0xff]  ;;  %v4987_v14 = vshrl.u32 %v53_v3, 7 }
   0x3   :  { %v4291_v6 = vld [vmem:[%s7283_s1 + $0x80] sm:$0xff]  ;;  %4296 = vmatpush1.msk.msra.mxu0 %vm257_vm0, %v4293_v1  ;;  %4301 = vmatprep.subr.msk.mxu1 %vm257_vm0, %v124_v4  ;;  %v4290_v8 = vld [vmem:[%s7283_s1 + $0x78] sm:$0xff]  ;;  %v121_v9 = vld [vmem:[%s7283_s1 + $0x30] sm:$0xff]  ;;  %v52_v20 = vunpack.c.0.s8 %v51_v13  ;;  %vm130_vm3 = vcmask 1044484   ;;  %vm132_vm6 = vcmask 1046534   ;;  %vm248_vm7 = vcmask 277504  }
   0x4   :  { %288 = vmatprep.subr.mxu0 %v4292_v2  ;;  %4302 = vmatpush1.msk.msra.mxu1 %vm257_vm0, %v123_v5  ;;  %v4289_v10 = vld [vmem:[%s7283_s1 + $0x70] sm:$0xff]  ;;  %v120_v11 = vld [vmem:[%s7283_s1 + $0x28] sm:$0xff]  ;;  %v119_v16 = vld [vmem:[%s7283_s1 + $0x20] sm:$0xff]  ;;  %v4894_v38 = vmov 0.0  }
   0x5   :  { %289 = vmatpush1.msra.mxu0 %v4291_v6  ;;  %450 = vmatprep.subr.mxu1 %v122_v7  ;;  %v4288_v15 = vld [vmem:[%s7283_s1 + $0x68] sm:$0xff]  ;;  %v4287_v17 = vld [vmem:[%s7283_s1 + $0x60] sm:$0xff]  ;;  %v118_v18 = vld [vmem:[%s7283_s1 + $0x18] sm:$0xff]  ;;  %v5020_v26 = vsub.s32 %v52_v20, %v4987_v14 }
   0x6   :  { %290 = vmatprep.subr.mxu0 %v4290_v8  ;;  %451 = vmatpush1.msra.mxu1 %v121_v9  ;;  %v4286_v19 = vld [vmem:[%s7283_s1 + $0x58] sm:$0xff]  ;;  %v117_v21 = vld [vmem:[%s7283_s1 + $0x10] sm:$0xff]  ;;  %v116_v23 = vld [vmem:[%s7283_s1 + $0x8] sm:$0xff] }
   0x7   :  { %291 = vmatpush1.msra.mxu0 %v4289_v10  ;;  %452 = vmatprep.subr.mxu1 %v120_v11  ;;  %v4285_v22 = vld [vmem:[%s7283_s1 + $0x50] sm:$0xff]  ;;  %v33_v24 = vld [vmem:[%s7282_s0] sm:$0xff]  ;;  %v34_v25 = vld [vmem:[%s7282_s0 + $0x8] sm:$0xff] }
   0x8   :  { %292 = vmatprep.subr.mxu0 %v4288_v15  ;;  %453 = vmatpush1.msra.mxu1 %v119_v16  ;;  %vm129_vm4 = vmor %vm127_vm1, %vm128_vm2  ;;  %v115_v27 = vld [vmem:[%s7283_s1] sm:$0xff]  ;;  %v49_v28 = vcombine.high %v33_v24, %v33_v24  ;;  %v66_v29 = vcombine.high %v34_v25, %v34_v25  ;;  %v4316_v30 = vld [vmem:[%s7283_s1 + $0xe8] sm:$0x3]  ;;  %v56_v31 = vrot.slane %v33_v24, %v5020_v26 }
   0x9   :  { %293 = vmatpush1.msra.mxu0 %v4287_v17  ;;  %454 = vmatprep.subr.mxu1 %v118_v18  ;;  %v5032_v32 = vrot.slane %v34_v25, %v5020_v26  ;;  %vm5035_vm5 = vmor %vm129_vm4, %vm130_vm3  ;;  %v4335_v36 = vld [vmem:[%s7283_s1 + $0x138] sm:$0x3]  ;;  %v5051_v37 = vld [vmem:[%s7282_s0 + $0x30] sm:$0xff] }
   0xa   :  { %294 = vmatprep.subr.mxu0 %v4286_v19  ;;  %455 = vmatpush1.msra.mxu1 %v117_v21  ;;  %v5040_v34 = vrot.slane %v49_v28, %v5020_v26  ;;  %v5043_v35 = vrot.slane %v66_v29, %v5020_v26  ;;  %v5054_v39 = vcombine.high %v56_v31, %v56_v31  ;;  %v4283_v40 = vrot.slane %v56_v31, 9  ;;  %vm5070_vm8 = vmor %vm5035_vm5, %vm132_vm6  ;;  %v4334_v8 = vld [vmem:[%s7283_s1 + $0x130] sm:$0x3]  ;;  %v4333_v13 = vld [vmem:[%s7283_s1 + $0x128] sm:$0xff] }
   0xb   :  { %295 = vmatpush1.msra.mxu0 %v4285_v22  ;;  %456 = vmatprep.subr.mxu1 %v116_v23  ;;  %v145_v41 = vrot.slane %v5032_v32, 7  ;;  %v5059_v42 = vcombine.high %v5032_v32, %v5032_v32  ;;  %v5077_v46 = vrot.slane %v5051_v37, %v5020_v26  ;;  %v4332_v19 = vld [vmem:[%s7283_s1 + $0x120] sm:$0xff]  ;;  %v40_v20 = vld [vmem:[%s7282_s0 + $0x38] sm:$0xff] }
   0xc   :  { %328 = vmatprep.mubr.f32.mxu0 %v4894_v38  ;;  %457 = vmatpush1.msra.mxu1 %v115_v27  ;;  %v5065_v43 = vcombine.high %v5040_v34, %v5040_v34  ;;  %v139_v45 = vrot.slane %v5040_v34, 7  ;;  %v125_v47 = vcombine.high %v5043_v35, %v5043_v35  ;;  %v136_v48 = vrot.slane %v5054_v39, 7  ;;  %v4331_v25 = vld [vmem:[%s7283_s1 + $0x118] sm:$0xff] }
   0xd   :  { %490 = vmatprep.mubr.f32.mxu1 %v4894_v38  ;;  %4318 = vmatprep.subr.msk.mxu0 %vm257_vm0, %v4316_v30  ;;  %v353_v49 = vcombine.low %v56_v31, %v5054_v39  ;;  %v147_v50 = vrot.slane %v145_v41, 2  ;;  %v148_v51 = vrot.slane %v5059_v42, 7  ;;  %v5090_v55 = vcombine.high %v5077_v46, %v5077_v46  ;;  %v4330_v31 = vld [vmem:[%s7283_s1 + $0x110] sm:$0xff] }
   0xe   :  { %4336 = vmatprep.subr.msk.mxu1 %vm257_vm0, %v4335_v36  ;;  %v141_v52 = vrot.slane %v139_v45, 2  ;;  %v142_v53 = vrot.slane %v5065_v43, 7  ;;  %v354_v54 = vcombine.low %v5040_v34, %v5065_v43  ;;  %v137_v56 = vsel %vm5070_vm8, %v4283_v40, %v136_v48  ;;  %v4315_v36 = vld [vmem:[%s7283_s1 + $0xe0] sm:$0x3] }
   0xf   :  { %v138_v57 = vrot.slane %v136_v48, 2  ;;  %v361_v58 = vrot.slane %v353_v49, %v5020_v26  ;;  %v149_v59 = vsel %vm5070_vm8, %v147_v50, %v148_v51  ;;  %v150_v63 = vrot.slane %v148_v51, 2  ;;  %v4329_v50 = vld [vmem:[%s7283_s1 + $0x108] sm:$0xff] }
  0x10   :  { %v143_v60 = vsel %vm5070_vm8, %v141_v52, %v142_v53  ;;  %v144_v61 = vrot.slane %v142_v53, 2  ;;  %v368_v62 = vrot.slane %v354_v54, %v5020_v26  ;;  %v151_v1 = vrot.slane %v5043_v35, 7  ;;  %v4313_v53 = vld [vmem:[%s7283_s1 + $0xd0] sm:$0xff] }
  0x11   :  { %v140_v0 = vsel %vm5070_vm8, %v138_v57, %v139_v45  ;;  %v5103_v2 = vrot.slane %v125_v47, 7  ;;  %v4284_v3 = vrot.slane %v5077_v46, 9  ;;  %v158_v12 = vrot.slane %v5090_v55, 7  ;;  %v4314_v47 = vld [vmem:[%s7283_s1 + $0xd8] sm:$0xff] }
  0x12   :  { %v146_v4 = vsel %vm5070_vm8, %v144_v61, %v145_v41  ;;  %v189_v5 = vcombine.low %v137_v56, %v140_v0  ;;  %v729_v6 = vcombine.low %v140_v0, %v143_v60  ;;  %v369_v7 = vcombine.low %v361_v58, %v368_v62  ;;  %v4328_v58 = vld [vmem:[%s7283_s1 + $0x100] sm:$0xff] }
  0x13   :  { %v190_v9 = vcombine.low %v143_v60, %v146_v4  ;;  %v5113_v10 = vsel %vm5070_vm8, %v150_v63, %v151_v1  ;;  %v153_v11 = vrot.slane %v151_v1, 2  ;;  %v730_v18 = vcombine.low %v146_v4, %v149_v59  ;;  %v4312_v63 = vld [vmem:[%s7283_s1 + $0xc8] sm:$0xff]  ;;  %v4311_v4 = vld [vmem:[%s7283_s1 + $0xc0] sm:$0xff] }
  0x14   :  { %v197_v15 = vrot.slane %v189_v5, %v5020_v26  ;;  %v5121_v16 = vrot.slane %v729_v6, %v5020_v26  ;;  %4303 = vmatmul.mubr.msk.f32.vlgmr.msra.gmra.mxu1 %vm248_vm7, %v369_v7  ;;  %v206_v17 = vcombine.low %v149_v59, %v5113_v10  ;;  %v159_v23 = vsel %vm5070_vm8, %v4284_v3, %v158_v12  ;;  %v4310_v7 = vld [vmem:[%s7283_s1 + $0xb8] sm:$0xff] }
  0x15   :  { %v204_v21 = vrot.slane %v190_v9, %v5020_v26  ;;  %4337 = vmatpush1.msk.msra.mxu1 %vm257_vm0, %v4334_v8  ;;  %496 = vmatprep.mubr.f32.mxu1 %v4894_v38  ;;  %v5137_v22 = vsel %vm5070_vm8, %v153_v11, %v5103_v2  ;;  %v160_v24 = vrot.slane %v158_v12, 2  ;;  %v5147_v29 = vrot.slane %v730_v18, %v5020_v26  ;;  %v4326_v18 = vld [vmem:[%s7283_s1 + $0xf0] sm:$0xff] }
  0x16   :  { %v207_v27 = vcombine.low %v5137_v22, %v159_v23  ;;  %v214_v28 = vrot.slane %v206_v17, %v5020_v26  ;;  %v370_v30 = vcombine.low %v5032_v32, %v5059_v42  ;;  %826 = vmatprep.subr.mxu1 %v4333_v13  ;;  %v371_v40 = vcombine.low %v5043_v35, %v5077_v46  ;;  %v4327_v17 = vld [vmem:[%s7283_s1 + $0xf8] sm:$0xff] }
  0x17   :  { %v205_v33 = vcombine.low %v197_v15, %v204_v21  ;;  %827 = vmatpush1.msra.mxu1 %v4332_v19  ;;  %v82_v41 = vcombine.high %v5051_v37, %v5051_v37  ;;  %v5162_v45 = vrot.slane %v40_v20, %v5020_v26  ;;  %v99_v51 = vcombine.high %v40_v20, %v40_v20  ;;  %v4309_v15 = vld [vmem:[%s7283_s1 + $0xb0] sm:$0xff] }
  0x18   :  { %v221_v48 = vrot.slane %v207_v27, %v5020_v26  ;;  %v378_v49 = vrot.slane %v370_v30, %v5020_v26  ;;  %828 = vmatprep.subr.mxu1 %v4331_v25  ;;  %v526_v37 = vcombine.low %v5054_v39, %v5040_v34  ;;  %v385_v52 = vrot.slane %v371_v40, %v5020_v26 }
  0x19   :  { %4297 = vmatmul.mubr.msk.f32.vlgmr.msra.gmra.mxu0 %vm248_vm7, %v205_v33  ;;  %v5180_v54 = vrot.slane %v82_v41, %v5020_v26  ;;  %v5184_v56 = vcombine.high %v5162_v45, %v5162_v45  ;;  %v167_v57 = vrot.slane %v5162_v45, 7  ;;  %829 = vmatpush1.msra.mxu1 %v4330_v31  ;;  %v5193_v60 = vrot.slane %v99_v51, %v5020_v26  ;;  %v4308_v31 = vld [vmem:[%s7283_s1 + $0xa8] sm:$0xff] }
  0x1a   :  { %4319 = vmatpush1.msk.msra.mxu0 %vm257_vm0, %v4315_v36  ;;  %334 = vmatprep.mubr.f32.mxu0 %v4894_v38  ;;  %v222_v59 = vcombine.low %v214_v28, %v221_v48  ;;  %v527_v61 = vcombine.low %v5065_v43, %v5032_v32  ;;  %v386_v62 = vcombine.low %v378_v49, %v385_v52 }
  0x1b   :  { %623 = vmatprep.subr.mxu0 %v4314_v47  ;;  %v5202_v0 = vcombine.high %v5180_v54, %v5180_v54  ;;  %v161_v1 = vrot.slane %v5180_v54, 7  ;;  %v169_v3 = vrot.slane %v167_v57, 2  ;;  %830 = vmatprep.subr.mxu1 %v4329_v50  ;;  %v170_v5 = vrot.slane %v5184_v56, 7 }
  0x1c   :  { %624 = vmatpush1.msra.mxu0 %v4313_v53  ;;  %v387_v6 = vcombine.low %v5090_v55, %v5180_v54  ;;  %v5216_v8 = vcombine.high %v5193_v60, %v5193_v60  ;;  %v173_v9 = vrot.slane %v5193_v60, 7  ;;  %831 = vmatpush1.msra.mxu1 %v4328_v58 }
  0x1d   :  { %4298 = vmatmul.mubr.msk.f32.gmra.mxu0 %vm248_vm7, %v222_v59  ;;  %4304 = vmatmul.mubr.msk.f32.gmra.mxu1 %vm248_vm7, %v386_v62  ;;  %v5223_v11 = vsel %vm5070_vm8, %v160_v24, %v161_v1  ;;  %v163_v55 = vrot.slane %v161_v1, 2  ;;  %v164_v12 = vrot.slane %v5202_v0, 7  ;;  %v388_v13 = vcombine.low %v5202_v0, %v5162_v45  ;;  %v4324_v24 = vld.sshfl [vmem:[%s7282_s0 + $0x10] sm:$0x1 pattern:$0x76325410] }
  0x1e   :  { %625 = vmatprep.subr.mxu0 %v4312_v63  ;;  %340 = vmatprep.mubr.f32.mxu0 %v4894_v38  ;;  %v5240_v19 = vsel %vm5070_vm8, %v169_v3, %v170_v5  ;;  %v395_v20 = vrot.slane %v387_v6, %v5020_v26  ;;  %v172_v21 = vrot.slane %v170_v5, 2  ;;  %v175_v23 = vrot.slane %v173_v9, 2 }
  0x1f   :  { %502 = vmatprep.mubr.f32.mxu1 %v4894_v38  ;;  %626 = vmatpush1.msra.mxu0 %v4311_v4  ;;  %v5249_v25 = vsel %vm5070_vm8, %v163_v55, %v164_v12  ;;  %v166_v27 = vrot.slane %v164_v12, 2  ;;  %v402_v28 = vrot.slane %v388_v13, %v5020_v26  ;;  %v176_v30 = vrot.slane %v5216_v8, 7 }
  0x20   :  { %14 = vsyncpa [#allocation3], 0  ;;  %v223_v33 = vcombine.low %v5223_v11, %v5249_v25  ;;  %627 = vmatprep.subr.mxu0 %v4310_v7  ;;  %v174_v36 = vsel %vm5070_vm8, %v172_v21, %v173_v9  ;;  %v404_v40 = vcombine.low %v5184_v56, %v5193_v60  ;;  %v4307_v41 = vld [vmem:[%s7283_s1 + $0xa0] sm:$0xff]  ;;  %832 = vmatprep.subr.mxu1 %v4327_v17  ;;  %v712_v47 = vrot.slane %v5103_v2, 2  ;;  %v4351_v51 = vld [vmem:[%s7283_s1 + $0x188] sm:$0x3] }
  0x21   :  { %v168_v48 = vsel %vm5070_vm8, %v166_v27, %v167_v57  ;;  %v403_v49 = vcombine.low %v395_v20, %v402_v28  ;;  %628 = vmatpush1.msra.mxu0 %v4309_v15  ;;  %v5270_v50 = vsel %vm5070_vm8, %v175_v23, %v176_v30  ;;  %833 = vmatpush1.msra.mxu1 %v4326_v18  ;;  %v713_v52 = vrot.slane %v4324_v24, 7  ;;  %v4369_v57 = vld [vmem:[%s7283_s1 + $0x1d8] sm:$0x3]  ;;  %v4367_v18 = vld [vmem:[%s7283_s1 + $0x1c8] sm:$0xff]  ;;  %s4895_s25 = smov 112   ;;  %s4897_s14 = smov 96  }
  0x22   :  { %v224_v53 = vcombine.low %v168_v48, %v5240_v19  ;;  %v231_v58 = vrot.slane %v223_v33, %v5020_v26  ;;  %v240_v2 = vcombine.low %v174_v36, %v5270_v50  ;;  %629 = vmatprep.subr.mxu0 %v4308_v31  ;;  %v4325_v59 = vld.sshfl [vmem:[%s7282_s0 + $0x40] sm:$0x1 pattern:$0x76325410]  ;;  %v411_v62 = vrot.slane %v404_v40, %v5020_v26  ;;  %v5373_v24 = vld [vmem:[%s7282_s0 + $0x48] sm:$0xff]  ;;  %s4899_s24 = smov [#allocation2]  }
  0x23   :  { %4305 = vmatmul.mubr.msk.f32.gmra.mxu1 %vm248_vm7, %v403_v49  ;;  %630 = vmatpush1.msra.mxu0 %v4307_v41  ;;  %v5290_v63 = vrot.slane %v526_v37, %v5020_v26  ;;  %v5296_v1 = vrot.slane %v527_v61, %v5020_v26  ;;  %v745_v4 = vcombine.low %v5121_v16, %v5147_v29  ;;  %v715_v39 = vrot.slane %v176_v30, 2  ;;  %v4350_v33 = vld [vmem:[%s7283_s1 + $0x180] sm:$0x3]  ;;  %v4418_v44 = vld [vmem:[%s7285_s3 + $0x1c8] sm:$0xff] }
  0x24   :  { %v238_v3 = vrot.slane %v224_v53, %v5020_v26  ;;  %508 = vmatprep.mubr.f32.mxu1 %v4894_v38  ;;  %4352 = vmatprep.subr.msk.mxu0 %vm257_vm0, %v4351_v51  ;;  %v543_v34 = vcombine.low %v5059_v42, %v5043_v35  ;;  %v4317_v32 = vcombine.high %v5043_v35, %v5077_v46  ;;  %v716_v61 = vrot.slane %v4325_v59, 7  ;;  %v4348_v53 = vld [vmem:[%s7283_s1 + $0x170] sm:$0xff] }
  0x25   :  { %4370 = vmatprep.subr.msk.mxu1 %vm257_vm0, %v4369_v57  ;;  %v714_v43 = vsel %vm5070_vm8, %v712_v47, %v713_v52  ;;  %v746_v37 = vcombine.low %v5113_v10, %v5137_v22  ;;  %v247_v6 = vrot.slane %v240_v2, %v5020_v26  ;;  %v560_v42 = vcombine.low %v5180_v54, %v5202_v0  ;;  %v36_v22 = vld [vmem:[%s7282_s0 + $0x18] sm:$0xff] }
  0x26   :  { %v239_v5 = vcombine.low %v231_v58, %v238_v3  ;;  %v747_v16 = vcombine.low %v714_v43, %v5223_v11  ;;  %v5318_v29 = vrot.slane %v543_v34, %v5020_v26  ;;  %v561_v46 = vcombine.low %v5162_v45, %v5184_v56  ;;  %v4368_v45 = vld [vmem:[%s7283_s1 + $0x1d0] sm:$0x3]  ;;  %v37_v11 = vld [vmem:[%s7282_s0 + $0x20] sm:$0xff] }
  0x27   :  { %4306 = vmatmul.mubr.msk.f32.gmra.mxu1 %vm248_vm7, %v411_v62  ;;  %v754_v35 = vrot.slane %v746_v37, %v5020_v26  ;;  %v763_v10 = vcombine.low %v5249_v25, %v168_v48  ;;  %v5330_v54 = vrot.slane %v4317_v32, %v5020_v26  ;;  %v764_v7 = vcombine.low %v5240_v19, %v174_v36  ;;  %v4366_v25 = vld [vmem:[%s7283_s1 + $0x1c0] sm:$0xff]  ;;  %v4349_v48 = vld [vmem:[%s7283_s1 + $0x178] sm:$0xff]  ;;  %v4347_v62 = vld [vmem:[%s7283_s1 + $0x168] sm:$0xff] }
  0x28   :  { %4299 = vmatmul.mubr.msk.f32.gmra.mxu0 %vm248_vm7, %v239_v5  ;;  %866 = vmatprep.mubr.f32.mxu1 %v4894_v38  ;;  %v761_v0 = vrot.slane %v747_v16, %v5020_v26  ;;  %v5339_v56 = vrot.slane %v560_v42, %v5020_v26  ;;  %v5342_v9 = vrot.slane %v561_v46, %v5020_v26  ;;  %v4346_v34 = vld [vmem:[%s7283_s1 + $0x160] sm:$0xff]  ;;  %v4345_v5 = vld [vmem:[%s7283_s1 + $0x158] sm:$0xff]  ;;  %v4344_v46 = vld [vmem:[%s7283_s1 + $0x150] sm:$0xff]  ;;  %vm1982_vm9 = vcmask 916480  }
  0x29   :  { %346 = vmatprep.mubr.f32.mxu0 %v4894_v38  ;;  %v542_v55 = vcombine.low %v5290_v63, %v5296_v1  ;;  %v771_v12 = vrot.slane %v763_v10, %v5020_v26  ;;  %v577_v13 = vcombine.low %v5193_v60, %v5216_v8  ;;  %v903_v15 = vcombine.high %v36_v22, %v36_v22 }
  0x2a   :  { %v762_v17 = vcombine.low %v754_v35, %v761_v0  ;;  %v778_v19 = vrot.slane %v764_v7, %v5020_v26  ;;  %v717_v20 = vsel %vm5070_vm8, %v715_v39, %v716_v61  ;;  %v910_v21 = vrot.slane %v36_v22, %v5020_v26  ;;  %v4365_v61 = vld [vmem:[%s7283_s1 + $0x1b8] sm:$0xff]  ;;  %v4364_v35 = vld [vmem:[%s7283_s1 + $0x1b0] sm:$0xff] }
  0x2b   :  { %4338 = vmatmul.mubr.msk.f32.vlgmr.msra.gmra.mxu1 %vm248_vm7, %v745_v4  ;;  %v559_v60 = vcombine.low %v5318_v29, %v5330_v54  ;;  %v5365_v8 = vrot.slane %v903_v15, %v5020_v26  ;;  %v5368_v23 = vrot.slane %v37_v11, %v5020_v26  ;;  %v576_v27 = vcombine.low %v5339_v56, %v5342_v9  ;;  %v5523_v9 = vld.sshfl [vmem:[%s7282_s0 + $0x28] sm:$0x1 pattern:$0x76325410] }
  0x2c   :  { %4300 = vmatmul.mubr.msk.f32.gmra.mxu0 %vm248_vm7, %v247_v6  ;;  %4371 = vmatpush1.msk.msra.mxu1 %vm257_vm0, %v4368_v45  ;;  %v5382_v28 = vcombine.high %v910_v21, %v910_v21  ;;  %v4358_v30 = vrot.slane %v910_v21, 9  ;;  %v920_v31 = vcombine.high %v37_v11, %v37_v11  ;;  %v5388_v36 = vrot.slane %v577_v13, %v5020_v26 }
  0x2d   :  { %663 = vmatprep.mubr.f32.mxu0 %v4894_v38  ;;  %872 = vmatprep.mubr.f32.mxu1 %v4894_v38  ;;  %v780_v40 = vcombine.low %v5270_v50, %v717_v20  ;;  %v5393_v41 = vcombine.high %v5365_v8, %v5365_v8  ;;  %v1157_v47 = vrot.slane %v5365_v8, 7  ;;  %v779_v49 = vcombine.low %v771_v12, %v778_v19  ;;  %v4363_v12 = vld [vmem:[%s7283_s1 + $0x1a8] sm:$0xff]  ;;  %v4362_v20 = vld [vmem:[%s7283_s1 + $0x1a0] sm:$0xff] }
  0x2e   :  { %1304 = vmatprep.subr.mxu1 %v4367_v18  ;;  %v980_v51 = vcombine.low %v910_v21, %v5382_v28  ;;  %v1154_v52 = vrot.slane %v5382_v28, 7  ;;  %v5404_v50 = vrot.slane %v5373_v24, %v5020_v26  ;;  %v1163_v57 = vrot.slane %v5368_v23, 7  ;;  %v4343_v19 = vld [vmem:[%s7283_s1 + $0x148] sm:$0xff] }
  0x2f   :  { %4339 = vmatmul.mubr.msk.f32.gmra.mxu1 %vm248_vm7, %v762_v17  ;;  %v1159_v58 = vrot.slane %v1157_v47, 2  ;;  %v1160_v2 = vrot.slane %v5393_v41, 7  ;;  %v5414_v59 = vcombine.high %v5368_v23, %v5368_v23  ;;  %v981_v63 = vcombine.low %v5365_v8, %v5393_v41 }
  0x30   :  { %4320 = vmatmul.mubr.msk.f32.vlgmr.msra.gmra.mxu0 %vm248_vm7, %v542_v55  ;;  %1305 = vmatpush1.msra.mxu1 %v4366_v25  ;;  %v1155_v1 = vsel %vm5070_vm8, %v4358_v30, %v1154_v52  ;;  %v1156_v3 = vrot.slane %v1154_v52, 2  ;;  %v5426_v4 = vrot.slane %v920_v31, %v5020_v26  ;;  %v787_v39 = vrot.slane %v780_v40, %v5020_v26  ;;  %v4342_v31 = vld [vmem:[%s7283_s1 + $0x140] sm:$0xff] }
  0x31   :  { %4353 = vmatpush1.msk.msra.mxu0 %vm257_vm0, %v4350_v33  ;;  %669 = vmatprep.mubr.f32.mxu0 %v4894_v38  ;;  %v5435_v32 = vsel %vm5070_vm8, %v1159_v58, %v1160_v2  ;;  %v1162_v43 = vrot.slane %v1160_v2, 2  ;;  %v997_v37 = vcombine.low %v5368_v23, %v5414_v59  ;;  %v5447_v6 = vrot.slane %v980_v51, %v5020_v26  ;;  %v4360_v51 = vld [vmem:[%s7283_s1 + $0x190] sm:$0xff]  ;;  %v4385_v2 = vld [vmem:[%s7283_s1 + $0x228] sm:$0x3] }
  0x32   :  { %1077 = vmatprep.subr.mxu0 %v4349_v48  ;;  %878 = vmatprep.mubr.f32.mxu1 %v4894_v38  ;;  %v5451_v16 = vsel %vm5070_vm8, %v1156_v3, %v1157_v47  ;;  %v5455_v42 = vcombine.high %v5404_v50, %v5404_v50  ;;  %v1165_v29 = vrot.slane %v1163_v57, 2  ;;  %v998_v54 = vcombine.low %v5426_v4, %v5404_v50  ;;  %v43_v47 = vld [vmem:[%s7282_s0 + $0x50] sm:$0xff] }
  0x33   :  { %1078 = vmatpush1.msra.mxu0 %v4348_v53  ;;  %4340 = vmatmul.mubr.msk.f32.gmra.mxu1 %vm248_vm7, %v779_v49  ;;  %v5466_v10 = vsel %vm5070_vm8, %v1162_v43, %v1163_v57  ;;  %v1207_v22 = vcombine.low %v1155_v1, %v5451_v16  ;;  %v1166_v0 = vrot.slane %v5414_v59, 7  ;;  %v5474_v7 = vrot.slane %v981_v63, %v5020_v26 }
  0x34   :  { %4321 = vmatmul.mubr.msk.f32.gmra.mxu0 %vm248_vm7, %v559_v60  ;;  %1079 = vmatprep.subr.mxu0 %v4347_v62  ;;  %v1208_v45 = vcombine.low %v5435_v32, %v5466_v10  ;;  %v1150_v11 = vcombine.high %v5426_v4, %v5426_v4  ;;  %v1169_v55 = vrot.slane %v5426_v4, 7  ;;  %v4359_v18 = vrot.slane %v5404_v50, 9 }
  0x35   :  { %675 = vmatprep.mubr.f32.mxu0 %v4894_v38  ;;  %1080 = vmatpush1.msra.mxu0 %v4346_v34  ;;  %v1215_v13 = vrot.slane %v1207_v22, %v5020_v26  ;;  %v5487_v15 = vsel %vm5070_vm8, %v1165_v29, %v1166_v0  ;;  %v1168_v17 = vrot.slane %v1166_v0, 2  ;;  %v1176_v30 = vrot.slane %v5455_v42, 7  ;;  %v4404_v34 = vld [vmem:[%s7283_s1 + $0x278] sm:$0x3] }
  0x36   :  { %1306 = vmatprep.subr.mxu1 %v4365_v61  ;;  %1081 = vmatprep.subr.mxu0 %v4345_v5  ;;  %v1222_v21 = vrot.slane %v1208_v45, %v5020_v26  ;;  %v1171_v60 = vrot.slane %v1169_v55, 2  ;;  %v5497_v25 = vrot.slane %v1150_v11, 7  ;;  %v5509_v33 = vrot.slane %v997_v37, %v5020_v26  ;;  %v4383_v0 = vld [vmem:[%s7283_s1 + $0x218] sm:$0xff] }
  0x37   :  { %1307 = vmatpush1.msra.mxu1 %v4364_v35  ;;  %1082 = vmatpush1.msra.mxu0 %v4344_v46  ;;  %v5513_v40 = vsel %vm5070_vm8, %v1168_v17, %v1169_v55  ;;  %v936_v56 = vcombine.high %v5373_v24, %v5373_v24  ;;  %v5530_v48 = vrot.slane %v998_v54, %v5020_v26  ;;  %v1575_v1 = vrot.slane %v5523_v9, 7  ;;  %v4384_v35 = vld [vmem:[%s7283_s1 + $0x220] sm:$0x3] }
  0x38   :  { %4322 = vmatmul.mubr.msk.f32.gmra.mxu0 %vm248_vm7, %v576_v27  ;;  %884 = vmatprep.mubr.f32.mxu1 %v4894_v38  ;;  %v4361_v27 = vld [vmem:[%s7283_s1 + $0x198] sm:$0xff]  ;;  %v5535_v49 = vsel %vm5070_vm8, %v1171_v60, %v5497_v25  ;;  %v1177_v24 = vsel %vm5070_vm8, %v4359_v18, %v1176_v30  ;;  %v1223_v52 = vcombine.low %v1215_v13, %v1222_v21  ;;  %v1178_v37 = vrot.slane %v1176_v30, 2  ;;  %v4376_v9 = vld [vmem:[%s7283_s1 + $0x1e0] sm:$0xff] }
  0x39   :  { %681 = vmatprep.mubr.f32.mxu0 %v4894_v38  ;;  %1308 = vmatprep.subr.mxu1 %v4363_v12  ;;  %v1224_v53 = vcombine.low %v5487_v15, %v5513_v40  ;;  %v1225_v58 = vcombine.low %v5535_v49, %v1177_v24  ;;  %v5550_v57 = vrot.slane %v936_v56, %v5020_v26  ;;  %v4382_v12 = vld [vmem:[%s7283_s1 + $0x210] sm:$0xff]  ;;  %vm2137_vm10 = vcmask 1042432  }
  0x3a   :  { %4341 = vmatmul.mubr.msk.f32.gmra.mxu1 %vm248_vm7, %v787_v39  ;;  %1083 = vmatprep.subr.mxu0 %v4343_v19  ;;  %v5553_v62 = vrot.slane %v43_v47, %v5020_v26  ;;  %v953_v63 = vcombine.high %v43_v47, %v43_v47  ;;  %v996_v3 = vcombine.low %v5447_v6, %v5474_v7  ;;  %v4401_v47 = vld [vmem:[%s7283_s1 + $0x260] sm:$0xff]  ;;  %vm2142_vm11 = vcmask 1043456  }
  0x3b   :  { %1309 = vmatpush1.msra.mxu1 %v4362_v20  ;;  %1084 = vmatpush1.msra.mxu0 %v4342_v31  ;;  %v1232_v39 = vrot.slane %v1224_v53, %v5020_v26  ;;  %v1239_v43 = vrot.slane %v1225_v58, %v5020_v26  ;;  %v5571_v61 = vcombine.high %v5550_v57, %v5550_v57  ;;  %v1179_v29 = vrot.slane %v5550_v57, 7  ;;  %v4402_v20 = vld [vmem:[%s7283_s1 + $0x268] sm:$0xff]  ;;  %v4380_v58 = vld [vmem:[%s7283_s1 + $0x200] sm:$0xff] }
  0x3c   :  { %4323 = vmatmul.mubr.msk.f32.gmra.mxu0 %vm248_vm7, %v5388_v36  ;;  %1310 = vmatprep.subr.mxu1 %v4361_v27  ;;  %v4403_v36 = vld [vmem:[%s7283_s1 + $0x270] sm:$0x3]  ;;  %v1014_v5 = vcombine.low %v5455_v42, %v5550_v57  ;;  %v5577_v6 = vcombine.high %v5553_v62, %v5553_v62  ;;  %v1013_v46 = vcombine.low %v5509_v33, %v5530_v48  ;;  %v1185_v22 = vrot.slane %v5553_v62, 7  ;;  %v4381_v33 = vld [vmem:[%s7283_s1 + $0x208] sm:$0xff] }
  0x3d   :  { %1117 = vmatprep.mubr.f32.mxu0 %v4894_v38  ;;  %1311 = vmatpush1.msra.mxu1 %v4360_v51  ;;  %v1592_v42 = vcombine.low %v5466_v10, %v5487_v15  ;;  %v5591_v54 = vrot.slane %v953_v63, %v5020_v26  ;;  %v1240_v7 = vcombine.low %v1232_v39, %v1239_v43  ;;  %v1181_v55 = vrot.slane %v1179_v29, 2  ;;  %v4379_v43 = vld [vmem:[%s7283_s1 + $0x1f8] sm:$0xff] }
  0x3e   :  { %1344 = vmatprep.mubr.f32.mxu1 %v4894_v38  ;;  %4387 = vmatprep.subr.msk.mxu0 %vm257_vm0, %v4385_v2  ;;  %v1015_v45 = vcombine.low %v5571_v61, %v5553_v62  ;;  %v1022_v11 = vrot.slane %v1014_v5, %v5020_v26  ;;  %v5608_v13 = vsel %vm5070_vm8, %v1178_v37, %v1179_v29  ;;  %v1182_v17 = vrot.slane %v5571_v61, 7 }
  0x3f   :  { %4372 = vmatmul.mubr.msk.f32.vlgmr.msra.gmra.mxu1 %vm248_vm7, %v1223_v52  ;;  %4405 = vmatprep.subr.msk.mxu1 %vm257_vm0, %v4404_v34  ;;  %v1187_v18 = vrot.slane %v1185_v22, 2  ;;  %v1188_v19 = vrot.slane %v5577_v6, 7  ;;  %v5620_v60 = vcombine.high %v5591_v54, %v5591_v54  ;;  %v1191_v30 = vrot.slane %v5591_v54, 7 }
  0x40   :  { %4354 = vmatmul.mubr.msk.f32.vlgmr.msra.gmra.mxu0 %vm248_vm7, %v996_v3  ;;  %4406 = vmatpush1.msk.msra.mxu1 %vm257_vm0, %v4403_v36  ;;  %v1029_v21 = vrot.slane %v1015_v45, %v5020_v26  ;;  %v1574_v31 = vrot.slane %v5497_v25, 2  ;;  %v5633_v56 = vsel %vm5070_vm8, %v1181_v55, %v1182_v17  ;;  %v1184_v27 = vrot.slane %v1182_v17, 2 }
  0x41   :  { %4388 = vmatpush1.msk.msra.mxu0 %vm257_vm0, %v4384_v35  ;;  %1123 = vmatprep.mubr.f32.mxu0 %v4894_v38  ;;  %v5637_v48 = vsel %vm5070_vm8, %v1187_v18, %v1188_v19  ;;  %v1388_v25 = vcombine.low %v5382_v28, %v5365_v8  ;;  %v1241_v24 = vcombine.low %v5608_v13, %v5633_v56  ;;  %v1190_v52 = vrot.slane %v1188_v19, 2  ;;  %v4400_v28 = vld [vmem:[%s7283_s1 + $0x258] sm:$0xff]  ;;  %v4395_v18 = vld [vmem:[%s7283_s1 + $0x230] sm:$0xff] }
  0x42   :  { %1350 = vmatprep.mubr.f32.mxu1 %v4894_v38  ;;  %1485 = vmatprep.subr.mxu0 %v4383_v0  ;;  %v1031_v51 = vcombine.low %v5577_v6, %v5591_v54  ;;  %v1193_v53 = vrot.slane %v1191_v30, 2  ;;  %v1030_v2 = vcombine.low %v1022_v11, %v1029_v21  ;;  %v5652_v8 = vsel %vm5070_vm8, %v1184_v27, %v1185_v22 }
  0x43   :  { %4373 = vmatmul.mubr.msk.f32.gmra.mxu1 %vm248_vm7, %v1240_v7  ;;  %1486 = vmatpush1.msra.mxu0 %v4382_v12  ;;  %v1194_v63 = vrot.slane %v5620_v60, 7  ;;  %v1389_v3 = vcombine.low %v5393_v41, %v5368_v23  ;;  %v1242_v34 = vcombine.low %v5652_v8, %v5637_v48  ;;  %v1249_v39 = vrot.slane %v1241_v24, %v5020_v26  ;;  %v4399_v23 = vld [vmem:[%s7283_s1 + $0x250] sm:$0xff] }
  0x44   :  { %4355 = vmatmul.mubr.msk.f32.gmra.mxu0 %vm248_vm7, %v1013_v46  ;;  %1688 = vmatprep.subr.mxu1 %v4402_v20  ;;  %v5668_v37 = vsel %vm5070_vm8, %v1190_v52, %v1191_v30  ;;  %v4378_v41 = vld [vmem:[%s7283_s1 + $0x1f0] sm:$0xff]  ;;  %v1396_v5 = vrot.slane %v1388_v25, %v5020_v26  ;;  %v1591_v29 = vcombine.low %v5451_v16, %v5435_v32  ;;  %v4398_v46 = vld [vmem:[%s7283_s1 + $0x248] sm:$0xff]  ;;  %vm2627_vm12 = vcmask 654336  }
  0x45   :  { %1487 = vmatprep.subr.mxu0 %v4381_v33  ;;  %1689 = vmatpush1.msra.mxu1 %v4401_v47  ;;  %v5682_v36 = vsel %vm5070_vm8, %v1193_v53, %v1194_v63  ;;  %v1256_v35 = vrot.slane %v1242_v34, %v5020_v26  ;;  %v1038_v22 = vrot.slane %v1031_v51, %v5020_v26  ;;  %v4377_v32 = vld [vmem:[%s7283_s1 + $0x1e8] sm:$0xff]  ;;  %v4441_v34 = vld [vmem:[%s7285_s3 + $0x280] sm:$0xff]  ;;  %vm4898_vm13 = vmmov 0  }
  0x46   :  { %1129 = vmatprep.mubr.f32.mxu0 %v4894_v38  ;;  %1356 = vmatprep.mubr.f32.mxu1 %v4894_v38  ;;  %v1258_v0 = vcombine.low %v5668_v37, %v5682_v36  ;;  %v1403_v16 = vrot.slane %v1389_v3, %v5020_v26  ;;  %v1405_v7 = vcombine.low %v5414_v59, %v5426_v4  ;;  %v4397_v59 = vld [vmem:[%s7283_s1 + $0x240] sm:$0xff]  ;;  %v2260_v3 = vld [vmem:[%s7285_s3 + $0xe8] sm:$0xff]  ;;  %vm3728_vm14 = vcmask 785408  }
  0x47   :  { %1488 = vmatpush1.msra.mxu0 %v4380_v58  ;;  %1690 = vmatprep.subr.mxu1 %v4400_v28  ;;  %v1576_v45 = vsel %vm5070_vm8, %v1574_v31, %v1575_v1  ;;  %v1257_v11 = vcombine.low %v1249_v39, %v1256_v35  ;;  %v4386_v55 = vcombine.high %v5426_v4, %v5404_v50  ;;  %v4396_v4 = vld [vmem:[%s7283_s1 + $0x238] sm:$0xff]  ;;  %v2261_v28 = vld [vmem:[%s7285_s3 + $0xf0] sm:$0xff]  ;;  %v2259_v39 = vld [vmem:[%s7285_s3 + $0xe0] sm:$0xff]  ;;  %vm4194_vm15 = vcmask 261120  }
  0x48   :  { %4356 = vmatmul.mubr.msk.f32.gmra.mxu0 %vm248_vm7, %v1030_v2  ;;  %1489 = vmatprep.subr.mxu0 %v4379_v43  ;;  %v1606_v12 = vrot.slane %v1592_v42, %v5020_v26  ;;  %v1599_v1 = vrot.slane %v1591_v29, %v5020_v26  ;;  %v1265_v50 = vrot.slane %v1258_v0, %v5020_v26 }
  0x49   :  { %1691 = vmatpush1.msra.mxu1 %v4399_v23  ;;  %1490 = vmatpush1.msra.mxu0 %v4378_v41  ;;  %v1608_v10 = vcombine.low %v5513_v40, %v5535_v49  ;;  %v1609_v15 = vcombine.low %v1576_v45, %v5608_v13  ;;  %v1404_v42 = vcombine.low %v1396_v5, %v1403_v16  ;;  %v4394_v13 = vld.sshfl [vmem:[%s7282_s0 + $0x58] sm:$0x1 pattern:$0x76325410] }
  0x4a   :  { %1135 = vmatprep.mubr.f32.mxu0 %v4894_v38  ;;  %1692 = vmatprep.subr.mxu1 %v4398_v46  ;;  %v1413_v17 = vrot.slane %v1405_v7, %v5020_v26  ;;  %v1420_v19 = vrot.slane %v4386_v55, %v5020_v26  ;;  %v1422_v40 = vcombine.low %v5550_v57, %v5571_v61  ;;  %v1577_v61 = vrot.slane %v1194_v63, 2  ;;  %v4442_v63 = vld [vmem:[%s7285_s3 + $0x288] sm:$0xff] }
  0x4b   :  { %4374 = vmatmul.mubr.msk.f32.gmra.mxu1 %vm248_vm7, %v1257_v11  ;;  %1491 = vmatprep.subr.mxu0 %v4377_v32  ;;  %v1423_v49 = vcombine.low %v5553_v62, %v5577_v6  ;;  %v1607_v20 = vcombine.low %v1599_v1, %v1606_v12  ;;  %v1616_v21 = vrot.slane %v1608_v10, %v5020_v26  ;;  %v1578_v6 = vrot.slane %v4394_v13, 7 }
  0x4c   :  { %1362 = vmatprep.mubr.f32.mxu1 %v4894_v38  ;;  %4357 = vmatmul.mubr.msk.f32.gmra.mxu0 %vm248_vm7, %v1038_v22  ;;  %v1623_v30 = vrot.slane %v1609_v15, %v5020_v26  ;;  %v1625_v57 = vcombine.low %v5633_v56, %v5652_v8  ;;  %v1626_v62 = vcombine.low %v5637_v48, %v5668_v37  ;;  %v4443_v8 = vld [vmem:[%s7285_s3 + $0x290] sm:$0xff] }
  0x4d   :  { %1693 = vmatpush1.msra.mxu1 %v4397_v59  ;;  %1492 = vmatpush1.msra.mxu0 %v4376_v9  ;;  %v1421_v31 = vcombine.low %v1413_v17, %v1420_v19  ;;  %v1430_v33 = vrot.slane %v1422_v40, %v5020_v26  ;;  %v1437_v47 = vrot.slane %v1423_v49, %v5020_v26 }
  0x4e   :  { %1694 = vmatprep.subr.mxu1 %v4396_v4  ;;  %1525 = vmatprep.mubr.f32.mxu0 %v4894_v38  ;;  %v1624_v56 = vcombine.low %v1616_v21, %v1623_v30  ;;  %v1633_v27 = vrot.slane %v1625_v57, %v5020_v26  ;;  %v1640_v48 = vrot.slane %v1626_v62, %v5020_v26 }
  0x4f   :  { %4375 = vmatmul.mubr.msk.f32.gmra.mxu1 %vm248_vm7, %v1265_v50  ;;  %v1579_v25 = vsel %vm5070_vm8, %v1577_v61, %v1578_v6  ;;  %v1438_v24 = vcombine.low %v1430_v33, %v1437_v47  ;;  %v1439_v51 = vcombine.low %v5591_v54, %v5620_v60  ;;  %v4444_v54 = vld [vmem:[%s7285_s3 + $0x298] sm:$0xff] }
  0x50   :  { %1695 = vmatpush1.msra.mxu1 %v4395_v18  ;;  %1728 = vmatprep.mubr.f32.mxu1 %v4894_v38  ;;  %v1641_v52 = vcombine.low %v1633_v27, %v1640_v48  ;;  %v1642_v53 = vcombine.low %v5682_v36, %v1579_v25  ;;  %v2262_v60 = vld [vmem:[%s7285_s3 + $0xf8] sm:$0xff] }
  0x51   :  { %4389 = vmatmul.mubr.msk.f32.vlgmr.msra.gmra.mxu0 %vm248_vm7, %v1404_v42  ;;  %v1446_v58 = vrot.slane %v1439_v51, %v5020_v26  ;;  %2632 = vmatprep.subr.mxu0 %v4444_v54 }
  0x52   :  { %1531 = vmatprep.mubr.f32.mxu0 %v4894_v38  ;;  %v1649_v2 = vrot.slane %v1642_v53, %v5020_v26  ;;  %2804 = vmatprep.subr.mxu1 %v2262_v60 }
  0x53   :  { %4407 = vmatmul.mubr.msk.f32.vlgmr.msra.gmra.mxu1 %vm248_vm7, %v1607_v20  ;;  %2633 = vmatpush1.msra.mxu0 %v4443_v8 }
  0x54   :  { %1734 = vmatprep.mubr.f32.mxu1 %v4894_v38  ;;  %2805 = vmatpush1.msra.mxu1 %v2261_v28 }
  0x55   :  { %4390 = vmatmul.mubr.msk.f32.gmra.mxu0 %vm248_vm7, %v1421_v31  ;;  %2634 = vmatprep.subr.mxu0 %v4442_v63 }
  0x56   :  { %1537 = vmatprep.mubr.f32.mxu0 %v4894_v38  ;;  %2806 = vmatprep.subr.mxu1 %v2260_v3 }
  0x57   :  { %4408 = vmatmul.mubr.msk.f32.gmra.mxu1 %vm248_vm7, %v1624_v56  ;;  %2635 = vmatpush1.msra.mxu0 %v4441_v34 }
  0x58   :  { %1740 = vmatprep.mubr.f32.mxu1 %v4894_v38  ;;  %2807 = vmatpush1.msra.mxu1 %v2259_v39 }
  0x59   :  { %4391 = vmatmul.mubr.msk.f32.gmra.mxu0 %vm248_vm7, %v1438_v24 }
  0x5a   :  { %1543 = vmatprep.mubr.f32.mxu0 %v4894_v38 }
  0x5b   :  { %4409 = vmatmul.mubr.msk.f32.gmra.mxu1 %vm248_vm7, %v1641_v52 }
  0x5c   :  { %1746 = vmatprep.mubr.f32.mxu1 %v4894_v38 }
  0x5d   :  { %4392 = vmatmul.mubr.msk.f32.gmra.mxu0 %vm248_vm7, %v1446_v58 }
  0x5f   :  { %4410 = vmatmul.mubr.msk.f32.gmra.mxu1 %vm248_vm7, %v1649_v2 }
  0xd4   :  { %v492_v43 = vpop.f32.mrf.mxu1 }
  0xd6   :  { %v494_v23 = vpop.f32.mrf.mxu1 }
  0xd9   :  { %v330_v37 = vpop.f32.mrf.mxu0 }
  0xda   :  { %v493_v61 = vadd.f32 %v492_v43, %v330_v37  ;;  %v5806_v37 = vsub.s32 0, %v4987_v14 }
  0xdb   :  { %v332_v41 = vpop.f32.mrf.mxu0 }
  0xdc   :  { %v495_v31 = vadd.f32 %v494_v23, %v332_v41 }
  0xdd   :  { %v498_v36 = vpop.f32.mrf.mxu1  ;;  %v336_v29 = vpop.f32.mrf.mxu0 }
  0xde   :  { %v499_v27 = vadd.f32 %v498_v36, %v336_v29 }
  0xdf   :  { %v500_v5 = vpop.f32.mrf.mxu1  ;;  %v338_v46 = vpop.f32.mrf.mxu0 }
  0xe0   :  { %v501_v24 = vadd.f32 %v500_v5, %v338_v46  ;;  %v1761_v5 = vld [vmem:[%s7284_s2] sm:$0x3] }
  0xe3   :  { %v504_v35 = vpop.f32.mrf.mxu1 }
  0xe5   :  { %v506_v22 = vpop.f32.mrf.mxu1 }
  0xe7   :  { %v510_v0 = vpop.f32.mrf.mxu1 }
  0xe8   :  { %v342_v32 = vpop.f32.mrf.mxu0 }
  0xe9   :  { %v512_v16 = vpop.f32.mrf.mxu1  ;;  %v505_v58 = vadd.f32 %v504_v35, %v342_v32  ;;  %v5812_v32 = vsub.s32 1, %v4987_v14 }
  0xea   :  { %v344_v7 = vpop.f32.mrf.mxu0 }
  0xeb   :  { %v868_v45 = vpop.f32.mrf.mxu1  ;;  %v507_v23 = vadd.f32 %v506_v22, %v344_v7  ;;  %v5815_v7 = vrot.slane %v1761_v5, %v5806_v37 }
  0xec   :  { %v348_v11 = vpop.f32.mrf.mxu0 }
  0xed   :  { %v870_v55 = vpop.f32.mrf.mxu1  ;;  %v511_v41 = vadd.f32 %v510_v0, %v348_v11 }
  0xee   :  { %v350_v12 = vpop.f32.mrf.mxu0 }
  0xef   :  { %v874_v59 = vpop.f32.mrf.mxu1 }
  0xf0   :  { %v665_v9 = vpop.f32.mrf.mxu0 }
  0xf1   :  { %v876_v1 = vpop.f32.mrf.mxu1  ;;  %v688_v33 = vadd.f32 %v665_v9, %v493_v61 }
  0xf2   :  { %v667_v50 = vpop.f32.mrf.mxu0 }
  0xf3   :  { %v880_v4 = vpop.f32.mrf.mxu1  ;;  %v689_v48 = vadd.f32 %v667_v50, %v495_v31  ;;  %v891_v51 = vadd.f32 %v868_v45, %v688_v33  ;;  %v513_v45 = vadd.f32 %v512_v16, %v350_v12  ;;  %v5818_v16 = vrot.slane %v1761_v5, %v5812_v32 }
  0xf4   :  { %v671_v10 = vpop.f32.mrf.mxu0 }
  0xf5   :  { %v5801_v42 = vpop.f32.mrf.mxu1  ;;  %v690_v52 = vadd.f32 %v671_v10, %v499_v27  ;;  %v892_v54 = vadd.f32 %v870_v55, %v689_v48 }
  0xf6   :  { %v673_v15 = vpop.f32.mrf.mxu0 }
  0xf7   :  { %v691_v60 = vadd.f32 %v673_v15, %v501_v24  ;;  %v893_v34 = vadd.f32 %v874_v59, %v690_v52 }
  0xf8   :  { %v677_v17 = vpop.f32.mrf.mxu0 }
  0xf9   :  { %v692_v63 = vadd.f32 %v677_v17, %v505_v58  ;;  %v894_v29 = vadd.f32 %v876_v1, %v691_v60 }
  0xfa   :  { %v679_v18 = vpop.f32.mrf.mxu0  ;;  %v886_v19 = vpop.f32.mrf.mxu1 }
  0xfb   :  { %v895_v55 = vadd.f32 %v880_v4, %v692_v63  ;;  %v693_v59 = vadd.f32 %v679_v18, %v507_v23 }
  0xfc   :  { %v683_v40 = vpop.f32.mrf.mxu0  ;;  %v5803_v49 = vpop.f32.mrf.mxu1 }
  0xfd   :  { %v694_v9 = vadd.f32 %v683_v40, %v511_v41  ;;  %v896_v12 = vadd.f32 %v5801_v42, %v693_v59 }
  0xfe   :  { %v685_v13 = vpop.f32.mrf.mxu0 }
  0xff   :  { %v1346_v20 = vpop.f32.mrf.mxu1  ;;  %v695_v11 = vadd.f32 %v685_v13, %v513_v45  ;;  %v897_v4 = vadd.f32 %v886_v19, %v694_v9 }
 0x100   :  { %v1119_v21 = vpop.f32.mrf.mxu0 }
 0x101   :  { %v1348_v30 = vpop.f32.mrf.mxu1  ;;  %v1142_v8 = vadd.f32 %v1119_v21, %v891_v51  ;;  %v898_v13 = vadd.f32 %v5803_v49, %v695_v11 }
 0x102   :  { %v1121_v57 = vpop.f32.mrf.mxu0 }
 0x103   :  { %v1352_v62 = vpop.f32.mrf.mxu1  ;;  %v1143_v39 = vadd.f32 %v1121_v57, %v892_v54  ;;  %v1369_v35 = vadd.f32 %v1346_v20, %v1142_v8 }
 0x104   :  { %v1125_v6 = vpop.f32.mrf.mxu0 }
 0x105   :  { %v1354_v56 = vpop.f32.mrf.mxu1  ;;  %v1144_v46 = vadd.f32 %v1125_v6, %v893_v34  ;;  %v1370_v15 = vadd.f32 %v1348_v30, %v1143_v39 }
 0x106   :  { %v1127_v47 = vpop.f32.mrf.mxu0 }
 0x107   :  { %v1145_v22 = vadd.f32 %v1127_v47, %v894_v29  ;;  %v1371_v21 = vadd.f32 %v1352_v62, %v1144_v46 }
 0x108   :  { %v1131_v25 = vpop.f32.mrf.mxu0 }
 0x109   :  { %v1146_v17 = vadd.f32 %v1131_v25, %v895_v55  ;;  %v1372_v30 = vadd.f32 %v1354_v56, %v1145_v22 }
 0x10a   :  { %v1133_v53 = vpop.f32.mrf.mxu0 }
 0x10b   :  { %v1358_v2 = vpop.f32.mrf.mxu1  ;;  %v1147_v27 = vadd.f32 %v1133_v53, %v896_v12  ;;  %v2257_v12 = vld [vmem:[%s7285_s3 + $0xd0] sm:$0xff] }
 0x10c   :  { %v1137_v28 = vpop.f32.mrf.mxu0  ;;  %v1373_v47 = vadd.f32 %v1358_v2, %v1146_v17  ;;  %v4440_v17 = vld [vmem:[%s7285_s3 + $0x278] sm:$0xff] }
 0x10d   :  { %v1360_v3 = vpop.f32.mrf.mxu1  ;;  %v1148_v25 = vadd.f32 %v1137_v28, %v897_v4  ;;  %2636 = vmatprep.subr.mxu0 %v4440_v17  ;;  %v4438_v4 = vld [vmem:[%s7285_s3 + $0x268] sm:$0xff] }
 0x10e   :  { %v1139_v43 = vpop.f32.mrf.mxu0  ;;  %v1374_v34 = vadd.f32 %v1360_v3, %v1147_v27  ;;  %v2248_v17 = vld [vmem:[%s7285_s3 + $0x88] sm:$0xff] }
 0x10f   :  { %v1364_v36 = vpop.f32.mrf.mxu1  ;;  %v1149_v42 = vadd.f32 %v1139_v43, %v898_v13  ;;  %v2255_v13 = vld [vmem:[%s7285_s3 + $0xc0] sm:$0xff] }
 0x110   :  { %v1375_v53 = vadd.f32 %v1364_v36, %v1148_v25 }
 0x111   :  { %v1366_v50 = vpop.f32.mrf.mxu1  ;;  %v1527_v10 = vpop.f32.mrf.mxu0 }
 0x112   :  { %v1550_v0 = vadd.f32 %v1527_v10, %v1369_v35  ;;  %v1376_v41 = vadd.f32 %v1366_v50, %v1149_v42  ;;  %v4436_v42 = vld [vmem:[%s7285_s3 + $0x258] sm:$0xff] }
 0x113   :  { %v1730_v1 = vpop.f32.mrf.mxu1  ;;  %v1529_v20 = vpop.f32.mrf.mxu0 }
 0x114   :  { %v1753_v57 = vadd.f32 %v1730_v1, %v1550_v0  ;;  %v1551_v61 = vadd.f32 %v1529_v20, %v1370_v15  ;;  %v2258_v1 = vld [vmem:[%s7285_s3 + $0xd8] sm:$0xff]  ;;  %v4439_v20 = vld [vmem:[%s7285_s3 + $0x270] sm:$0xff] }
 0x115   :  { %v1732_v18 = vpop.f32.mrf.mxu1  ;;  %v1533_v40 = vpop.f32.mrf.mxu0  ;;  %2808 = vmatprep.subr.mxu1 %v2258_v1  ;;  %2637 = vmatpush1.msra.mxu0 %v4439_v20 }
 0x116   :  { %v1773_v6 = vadd.f32 %v5815_v7, %v1753_v57  ;;  %v1754_v31 = vadd.f32 %v1732_v18, %v1551_v61  ;;  %v1552_v33 = vadd.f32 %v1533_v40, %v1371_v21  ;;  %v2256_v18 = vld [vmem:[%s7285_s3 + $0xc8] sm:$0xff]  ;;  %2809 = vmatpush1.msra.mxu1 %v2257_v12  ;;  %2638 = vmatprep.subr.mxu0 %v4438_v4  ;;  %v2247_v12 = vld [vmem:[%s7285_s3 + $0x80] sm:$0xff] }
 0x117   :  { %v1736_v62 = vpop.f32.mrf.mxu1  ;;  %v1535_v48 = vpop.f32.mrf.mxu0  ;;  %2810 = vmatprep.subr.mxu1 %v2256_v18  ;;  %v4428_v18 = vld [vmem:[%s7285_s3 + $0x218] sm:$0xff] }
 0x118   :  { %v1774_v24 = vadd.f32 %v5818_v16, %v1754_v31  ;;  %v1755_v51 = vadd.f32 %v1736_v62, %v1552_v33  ;;  %v1553_v52 = vadd.f32 %v1535_v48, %v1372_v30  ;;  %v1781_v19 = vmax.f32 %v1773_v6, 0.0  ;;  %v4437_v33 = vld [vmem:[%s7285_s3 + $0x260] sm:$0xff]  ;;  %2811 = vmatpush1.msra.mxu1 %v2255_v13 }
 0x119   :  { %v1738_v58 = vpop.f32.mrf.mxu1  ;;  %v1539_v54 = vpop.f32.mrf.mxu0  ;;  %2639 = vmatpush1.msra.mxu0 %v4437_v33 }
 0x11a   :  { %v1782_v56 = vmax.f32 %v1774_v24, 0.0  ;;  %v1775_v60 = vadd.f32 %v5815_v7, %v1755_v51  ;;  %v1756_v8 = vadd.f32 %v1738_v58, %v1553_v52  ;;  %v1554_v63 = vadd.f32 %v1539_v54, %v1373_v47  ;;  %2640 = vmatprep.subr.mxu0 %v4436_v42 }
 0x11b   :  { %v1742_v49 = vpop.f32.mrf.mxu1  ;;  %v1541_v2 = vpop.f32.mrf.mxu0 }
 0x11c   :  { %v1797_v39 = vcombine.low %v1781_v19, %v1782_v56  ;;  %v1798_v23 = vcombine.high %v1781_v19, %v1782_v56  ;;  %v1776_v28 = vadd.f32 %v5818_v16, %v1756_v8  ;;  %v1783_v5 = vmax.f32 %v1775_v60, 0.0  ;;  %v2254_v19 = vld [vmem:[%s7285_s3 + $0xb8] sm:$0xff]  ;;  %v2253_v60 = vld [vmem:[%s7285_s3 + $0xb0] sm:$0xff] }
 0x11d   :  { %v1757_v29 = vadd.f32 %v1742_v49, %v1554_v63  ;;  %v1555_v43 = vadd.f32 %v1541_v2, %v1374_v34  ;;  %v1744_v35 = vpop.f32.mrf.mxu1  ;;  %v1545_v46 = vpop.f32.mrf.mxu0  ;;  %2812 = vmatprep.subr.mxu1 %v2254_v19  ;;  %v4434_v49 = vld [vmem:[%s7285_s3 + $0x248] sm:$0xff] }
 0x11e   :  { %v5827_v45 = vrot.slane %v1798_v23, %v5020_v26  ;;  %v1784_v55 = vmax.f32 %v1776_v28, 0.0  ;;  %v1556_v59 = vadd.f32 %v1545_v46, %v1375_v53  ;;  %v1805_v3 = vrot.slane %v1797_v39, %v5020_v26  ;;  %v2252_v2 = vld [vmem:[%s7285_s3 + $0xa8] sm:$0xff]  ;;  %2813 = vmatpush1.msra.mxu1 %v2253_v60  ;;  %v4433_v23 = vld [vmem:[%s7285_s3 + $0x240] sm:$0xff]  ;;  %v2250_v46 = vld [vmem:[%s7285_s3 + $0x98] sm:$0xff] }
 0x11f   :  { %v1777_v9 = vadd.f32 %v5815_v7, %v1757_v29  ;;  %v1758_v36 = vadd.f32 %v1744_v35, %v1555_v43  ;;  %v1547_v10 = vpop.f32.mrf.mxu0  ;;  %v1748_v15 = vpop.f32.mrf.mxu1  ;;  %v2251_v28 = vld [vmem:[%s7285_s3 + $0xa0] sm:$0xff]  ;;  %2814 = vmatprep.subr.mxu1 %v2252_v2  ;;  %v4432_v35 = vld [vmem:[%s7285_s3 + $0x238] sm:$0xff]  ;;  %v2244_v19 = vld [vmem:[%s7285_s3 + $0x68] sm:$0xff] }
 0x120   :  { %v1815_v22 = vcombine.low %v1783_v5, %v1784_v55  ;;  %v1816_v0 = vcombine.high %v1783_v5, %v1784_v55  ;;  %v1557_v50 = vadd.f32 %v1547_v10, %v1376_v41  ;;  %v1759_v11 = vadd.f32 %v1748_v15, %v1556_v59  ;;  %2815 = vmatpush1.msra.mxu1 %v2251_v28  ;;  %v2249_v10 = vld [vmem:[%s7285_s3 + $0x90] sm:$0xff] }
 0x121   :  { %v1778_v21 = vadd.f32 %v5818_v16, %v1758_v36  ;;  %v1750_v57 = vpop.f32.mrf.mxu1  ;;  %v5841_v61 = vcombine.high %v1805_v3, %v1805_v3  ;;  %v1785_v40 = vmax.f32 %v1777_v9, 0.0  ;;  %v4411_v6 = vrot.slane %v1805_v3, 9  ;;  %v4431_v36 = vld [vmem:[%s7285_s3 + $0x230] sm:$0xff]  ;;  %2816 = vmatprep.subr.mxu1 %v2250_v46  ;;  %v4421_v46 = vld [vmem:[%s7285_s3 + $0x1e0] sm:$0xff] }
 0x122   :  { %v1760_v30 = vadd.f32 %v1750_v57, %v1557_v50  ;;  %v5854_v31 = vcombine.high %v5827_v45, %v5827_v45  ;;  %v1877_v62 = vrot.slane %v5827_v45, 7  ;;  %v5865_v48 = vrot.slane %v1816_v0, %v5020_v26  ;;  %2817 = vmatpush1.msra.mxu1 %v2249_v10  ;;  %v4429_v57 = vld [vmem:[%s7285_s3 + $0x220] sm:$0xff] }
 0x123   :  { %v1786_v47 = vmax.f32 %v1778_v21, 0.0  ;;  %v1874_v27 = vrot.slane %v5841_v61, 7  ;;  %v5868_v25 = vrot.slane %v1815_v22, %v5020_v26  ;;  %v5871_v24 = vadd.f32 %v5815_v7, %v1759_v11  ;;  %v4435_v7 = vld [vmem:[%s7285_s3 + $0x250] sm:$0xff]  ;;  %v4430_v11 = vld [vmem:[%s7285_s3 + $0x228] sm:$0xff]  ;;  %2818 = vmatprep.subr.mxu1 %v2248_v17 }
 0x124   :  { %v5874_v51 = vadd.f32 %v5818_v16, %v1760_v30  ;;  %v1880_v52 = vrot.slane %v5854_v31, 7  ;;  %v1879_v63 = vrot.slane %v1877_v62, 2  ;;  %v1832_v34 = vcombine.high %v5865_v48, %v5865_v48  ;;  %2641 = vmatpush1.msra.mxu0 %v4435_v7  ;;  %2819 = vmatpush1.msra.mxu1 %v2247_v12  ;;  %v4425_v7 = vld [vmem:[%s7285_s3 + $0x200] sm:$0xff]  ;;  %v4419_v17 = vld [vmem:[%s7285_s3 + $0x1d0] sm:$0xff]  ;;  %v2234_v12 = vld [vmem:[%s7285_s3 + $0x18] sm:$0xff] }
 0x125   :  { %v1833_v58 = vcombine.low %v1785_v40, %v1786_v47  ;;  %v1834_v54 = vcombine.high %v1785_v40, %v1786_v47  ;;  %v1875_v16 = vsel %vm5070_vm8, %v4411_v6, %v1874_v27  ;;  %v1876_v56 = vrot.slane %v1874_v27, 2  ;;  %2642 = vmatprep.subr.mxu0 %v4434_v49  ;;  %v2246_v40 = vld [vmem:[%s7285_s3 + $0x78] sm:$0xff]  ;;  %v4427_v27 = vld [vmem:[%s7285_s3 + $0x210] sm:$0xff] }
 0x126   :  { %v5891_v8 = vmax.f32 %v1805_v3, %v1875_v16  ;;  %v1787_v41 = vmax.f32 %v5871_v24, 0.0  ;;  %v1788_v5 = vmax.f32 %v5874_v51, 0.0  ;;  %v1881_v29 = vsel %vm5070_vm8, %v1879_v63, %v1880_v52  ;;  %2643 = vmatpush1.msra.mxu0 %v4433_v23  ;;  %2820 = vmatprep.subr.mxu1 %v2246_v40  ;;  %v2242_v49 = vld [vmem:[%s7285_s3 + $0x58] sm:$0xff]  ;;  %v2241_v23 = vld [vmem:[%s7285_s3 + $0x50] sm:$0xff] }
 0x127   :  { %v1841_v53 = vrot.slane %v1833_v58, %v5020_v26  ;;  %v5903_v39 = vrot.slane %v1834_v54, %v5020_v26  ;;  %v1883_v43 = vrot.slane %v5868_v25, 7  ;;  %v4412_v55 = vrot.slane %v1832_v34, 9  ;;  %2644 = vmatprep.subr.mxu0 %v4432_v35  ;;  %v2233_v40 = vld [vmem:[%s7285_s3 + $0x10] sm:$0xff] }
 0x128   :  { %1946 = vrot.lane.b32.xlu0 %v5891_v8, %s4895_s25  ;;  %v1878_v3 = vsel %vm5070_vm8, %v1876_v56, %v1877_v62  ;;  %v5935_v15 = vmax.f32 %v5827_v45, %v1881_v29  ;;  %v1882_v22 = vrot.slane %v1880_v52, 2  ;;  %v5953_v21 = vcombine.high %v5868_v25, %v5868_v25  ;;  %2645 = vmatpush1.msra.mxu0 %v4431_v36  ;;  %v2245_v62 = vld [vmem:[%s7285_s3 + $0x70] sm:$0xff]  ;;  %v2243_v56 = vld [vmem:[%s7285_s3 + $0x60] sm:$0xff]  ;;  %v4422_v29 = vld [vmem:[%s7285_s3 + $0x1e8] sm:$0xff] }
 0x129   :  { %v1893_v59 = vrot.slane %v1841_v53, 7  ;;  %v5926_v9 = vcombine.high %v1841_v53, %v1841_v53  ;;  %v5939_v0 = vcombine.high %v5903_v39, %v5903_v39  ;;  %v1899_v50 = vrot.slane %v5903_v39, 7  ;;  %2646 = vmatprep.subr.mxu0 %v4430_v11  ;;  %2821 = vmatpush1.msra.mxu1 %v2245_v62  ;;  %v2282_v62 = vld [vmem:[%s7285_s3 + $0x198] sm:$0xff] }
 0x12a   :  { %v1851_v30 = vcombine.low %v1787_v41, %v1788_v5  ;;  %2647 = vmatpush1.msra.mxu0 %v4429_v57  ;;  %v5977_v47 = vmax.f32 %v5841_v61, %v1878_v3  ;;  %v1884_v24 = vsel %vm5070_vm8, %v1882_v22, %v1883_v43  ;;  %v1885_v51 = vrot.slane %v1883_v43, 2  ;;  %v4426_v61 = vld [vmem:[%s7285_s3 + $0x208] sm:$0xff]  ;;  %2822 = vmatprep.subr.mxu1 %v2244_v19  ;;  %v4420_v22 = vld [vmem:[%s7285_s3 + $0x1d8] sm:$0xff]  ;;  %v4461_v19 = vld [vmem:[%s7285_s3 + $0x320] sm:$0xff] }
 0x12b   :  { %v1894_v45 = vsel %vm5070_vm8, %v4412_v55, %v1893_v59  ;;  %v1895_v1 = vrot.slane %v1893_v59, 2  ;;  %v1896_v20 = vrot.slane %v5926_v9, 7  ;;  %v1901_v33 = vrot.slane %v1899_v50, 2  ;;  %2648 = vmatprep.subr.mxu0 %v4428_v18  ;;  %2823 = vmatpush1.msra.mxu1 %v2243_v56  ;;  %v2240_v43 = vld [vmem:[%s7285_s3 + $0x48] sm:$0xff]  ;;  %v4416_v57 = vld [vmem:[%s7285_s3 + $0x1b8] sm:$0xff]  ;;  %v4415_v18 = vld [vmem:[%s7285_s3 + $0x1b0] sm:$0xff] }
 0x12c   :  { %1950 = vrot.lane.b32.xlu0 %v5935_v15, %s4895_s25  ;;  %v5963_v4 = vmax.f32 %v1832_v34, %v1894_v45  ;;  %v1902_v13 = vrot.slane %v5939_v0, 7  ;;  %v1886_v52 = vrot.slane %v5953_v21, 7  ;;  %v1858_v58 = vrot.slane %v1851_v30, %v5020_v26  ;;  %2649 = vmatpush1.msra.mxu0 %v4427_v27  ;;  %v4424_v34 = vld [vmem:[%s7285_s3 + $0x1f8] sm:$0xff]  ;;  %v4414_v30 = vld [vmem:[%s7285_s3 + $0x1a8] sm:$0xff]  ;;  %v2277_v56 = vld [vmem:[%s7285_s3 + $0x170] sm:$0xff] }
 0x12d   :  { %v1897_v6 = vsel %vm5070_vm8, %v1895_v1, %v1896_v20  ;;  %v1898_v16 = vrot.slane %v1896_v20, 2  ;;  %v6010_v60 = vmax.f32 %v5854_v31, %v1884_v24  ;;  %2650 = vmatprep.subr.mxu0 %v4426_v61  ;;  %v1889_v2 = vrot.slane %v5865_v48, 7  ;;  %2824 = vmatprep.subr.mxu1 %v2242_v49  ;;  %v2236_v1 = vld [vmem:[%s7285_s3 + $0x28] sm:$0xff]  ;;  %v4417_v20 = vld [vmem:[%s7285_s3 + $0x1c0] sm:$0xff]  ;;  %v4464_v27 = vld [vmem:[%s7285_s3 + $0x338] sm:$0xff] }
 0x12e   :  { %1958 = vrot.lane.b32.xlu1 %v5963_v4, %s4895_s25  ;;  %v5993_v42 = vmax.f32 %v1841_v53, %v1897_v6  ;;  %v1903_v54 = vsel %vm5070_vm8, %v1901_v33, %v1902_v13  ;;  %v1887_v26 = vsel %vm5070_vm8, %v1885_v51, %v1886_v52  ;;  %v1888_v63 = vrot.slane %v1886_v52, 2  ;;  %2651 = vmatpush1.msra.mxu0 %v4425_v7  ;;  %v4423_v53 = vld [vmem:[%s7285_s3 + $0x1f0] sm:$0xff]  ;;  %v2232_v6 = vld [vmem:[%s7285_s3 + $0x8] sm:$0xff]  ;;  %v4413_v33 = vld [vmem:[%s7285_s3 + $0x1a0] sm:$0xff] }
 0x12f   :  { %v6024_v31 = vmax.f32 %v5903_v39, %v1903_v54  ;;  %v1900_v28 = vsel %vm5070_vm8, %v1898_v16, %v1899_v50  ;;  %v1904_v41 = vrot.slane %v1902_v13, 2  ;;  %v1905_v48 = vrot.slane %v1858_v58, 7  ;;  %2652 = vmatprep.subr.mxu0 %v4424_v34  ;;  %2825 = vmatpush1.msra.mxu1 %v2241_v23  ;;  %v2238_v50 = vld [vmem:[%s7285_s3 + $0x38] sm:$0xff]  ;;  %v2231_v13 = vld [vmem:[%s7285_s3] sm:$0xff]  ;;  %v4463_v24 = vld [vmem:[%s7285_s3 + $0x330] sm:$0xff] }
 0x130   :  { %1948 = vrot.lane.b32.xlu0 %v5977_v47, %s4895_s25  ;;  %v1859_v5 = vcombine.high %v1858_v58, %v1858_v58  ;;  %v6037_v39 = vmax.f32 %v5868_v25, %v1887_v26  ;;  %2653 = vmatpush1.msra.mxu0 %v4423_v53  ;;  %v1890_v35 = vsel %vm5070_vm8, %v1888_v63, %v1889_v2  ;;  %v2239_v25 = vld [vmem:[%s7285_s3 + $0x40] sm:$0xff]  ;;  %v2281_v51 = vld [vmem:[%s7285_s3 + $0x190] sm:$0xff]  ;;  %v4462_v52 = vld [vmem:[%s7285_s3 + $0x328] sm:$0xff] }
 0x131   :  { %2654 = vmatprep.subr.mxu0 %v4422_v29  ;;  %v6056_v55 = vmax.f32 %v5926_v9, %v1900_v28  ;;  %2826 = vmatprep.subr.mxu1 %v2240_v43  ;;  %v1906_v59 = vsel %vm5070_vm8, %v1904_v41, %v1905_v48  ;;  %v1907_v3 = vrot.slane %v1905_v48, 2  ;;  %v6063_v10 = vmax.f32 %v5953_v21, %v1890_v35  ;;  %v2235_v21 = vld [vmem:[%s7285_s3 + $0x20] sm:$0xff]  ;;  %v2280_v61 = vld [vmem:[%s7285_s3 + $0x188] sm:$0xff]  ;;  %v2278_v54 = vld [vmem:[%s7285_s3 + $0x178] sm:$0xff] }
 0x132   :  { %1960 = vrot.lane.b32.xlu1 %v5993_v42, %s4895_s25  ;;  %v1908_v36 = vrot.slane %v1859_v5, 7  ;;  %2655 = vmatpush1.msra.mxu0 %v4421_v46  ;;  %v6068_v9 = vmax.f32 %v5939_v0, %v1906_v59  ;;  %v2237_v0 = vld [vmem:[%s7285_s3 + $0x30] sm:$0xff]  ;;  %v2279_v7 = vld [vmem:[%s7285_s3 + $0x180] sm:$0xff]  ;;  %v4458_v26 = vld [vmem:[%s7285_s3 + $0x308] sm:$0xff] }
 0x133   :  { %2827 = vmatpush1.msra.mxu1 %v2239_v25  ;;  %2656 = vmatprep.subr.mxu0 %v4420_v22  ;;  %v4459_v16 = vld [vmem:[%s7285_s3 + $0x310] sm:$0xff]  ;;  %v2276_v63 = vld [vmem:[%s7285_s3 + $0x168] sm:$0xff]  ;;  %v4457_v34 = vld [vmem:[%s7285_s3 + $0x300] sm:$0xff] }
 0x134   :  { %1952 = vrot.lane.b32.xlu0 %v6010_v60, %s4895_s25  ;;  %v1909_v11 = vsel %vm5070_vm8, %v1907_v3, %v1908_v36  ;;  %2828 = vmatprep.subr.mxu1 %v2238_v50  ;;  %v2275_v49 = vld [vmem:[%s7285_s3 + $0x160] sm:$0xff]  ;;  %v4456_v2 = vld [vmem:[%s7285_s3 + $0x2f8] sm:$0xff]  ;;  %v4455_v23 = vld [vmem:[%s7285_s3 + $0x2f0] sm:$0xff] }
 0x135   :  { %2657 = vmatpush1.msra.mxu0 %v4419_v17  ;;  %2829 = vmatpush1.msra.mxu1 %v2237_v0  ;;  %v6086_v45 = vmax.f32 %v1858_v58, %v1909_v11  ;;  %v4460_v58 = vld [vmem:[%s7285_s3 + $0x318] sm:$0xff]  ;;  %v2273_v28 = vld [vmem:[%s7285_s3 + $0x150] sm:$0xff]  ;;  %v4454_v41 = vld [vmem:[%s7285_s3 + $0x2e8] sm:$0xff] }
 0x136   :  { %1964 = vrot.lane.b32.xlu1 %v6024_v31, %s4895_s25  ;;  %2658 = vmatprep.subr.mxu0 %v4418_v44  ;;  %v2274_v53 = vld [vmem:[%s7285_s3 + $0x158] sm:$0xff]  ;;  %v2272_v48 = vld [vmem:[%s7285_s3 + $0x148] sm:$0xff]  ;;  %v4453_v5 = vld [vmem:[%s7285_s3 + $0x2e0] sm:$0xff] }
 0x137   :  { %2830 = vmatprep.subr.mxu1 %v2236_v1  ;;  %2659 = vmatpush1.msra.mxu0 %v4417_v20  ;;  %v2271_v29 = vld [vmem:[%s7285_s3 + $0x140] sm:$0xff]  ;;  %v4452_v43 = vld [vmem:[%s7285_s3 + $0x2d8] sm:$0xff]  ;;  %v4451_v46 = vld [vmem:[%s7285_s3 + $0x2d0] sm:$0xff] }
 0x138   :  { %1954 = vrot.lane.b32.xlu0 %v6037_v39, %s4895_s25  ;;  %2831 = vmatpush1.msra.mxu1 %v2235_v21  ;;  %v2270_v35 = vld [vmem:[%s7285_s3 + $0x138] sm:$0xff]  ;;  %v2269_v25 = vld [vmem:[%s7285_s3 + $0x130] sm:$0xff]  ;;  %v4450_v59 = vld [vmem:[%s7285_s3 + $0x2c8] sm:$0xff] }
 0x139   :  { %2660 = vmatprep.subr.mxu0 %v4416_v57  ;;  %2832 = vmatprep.subr.mxu1 %v2234_v12  ;;  %v2268_v3 = vld [vmem:[%s7285_s3 + $0x128] sm:$0xff]  ;;  %v4449_v36 = vld [vmem:[%s7285_s3 + $0x2c0] sm:$0xff]  ;;  %v4448_v50 = vld [vmem:[%s7285_s3 + $0x2b8] sm:$0xff] }
 0x13a   :  { %1962 = vrot.lane.b32.xlu1 %v6056_v55, %s4895_s25  ;;  %2661 = vmatpush1.msra.mxu0 %v4415_v18  ;;  %v2267_v22 = vld [vmem:[%s7285_s3 + $0x120] sm:$0xff]  ;;  %v2266_v11 = vld [vmem:[%s7285_s3 + $0x118] sm:$0xff]  ;;  %v4447_v17 = vld [vmem:[%s7285_s3 + $0x2b0] sm:$0xff] }
 0x13b   :  { %2833 = vmatpush1.msra.mxu1 %v2233_v40  ;;  %2662 = vmatprep.subr.mxu0 %v4414_v30  ;;  %v2265_v0 = vld [vmem:[%s7285_s3 + $0x110] sm:$0xff]  ;;  %v4446_v44 = vld [vmem:[%s7285_s3 + $0x2a8] sm:$0xff]  ;;  %v4445_v20 = vld [vmem:[%s7285_s3 + $0x2a0] sm:$0xff]  ;;  %v4896_v30 = vmov 1966171168  }
 0x13c   :  { %1956 = vrot.lane.b32.xlu0 %v6063_v10, %s4895_s25  ;;  %2834 = vmatprep.subr.mxu1 %v2232_v6  ;;  %v2264_v1 = vld [vmem:[%s7285_s3 + $0x108] sm:$0xff]  ;;  %v2263_v21 = vld [vmem:[%s7285_s3 + $0x100] sm:$0xff]  ;;  %v4502_v57 = vld [vmem:[%s7285_s3 + $0x438] sm:$0xff]  ;;  %v2154_v6 = vunpack.c.l.s4 %v4896_v30 }
 0x13d   :  { %2663 = vmatpush1.msra.mxu0 %v4413_v33  ;;  %2835 = vmatpush1.msra.mxu1 %v2231_v13  ;;  %v4557_v12 = vld [vmem:[%s7285_s3 + $0x5d8] sm:$0xff] }
 0x13e   :  { %1966 = vrot.lane.b32.xlu1 %v6068_v9, %s4895_s25  ;;  %2676 = vmatprep.subr.mxu0 %v4464_v27 }
 0x13f   :  { %2848 = vmatprep.subr.mxu1 %v2282_v62  ;;  %2677 = vmatpush2.msra.mxu0 %v4463_v24  ;;  %v2155_v24 = vunpack.c.0.s8 %v2154_v6 }
 0x140   :  { %2849 = vmatpush2.msra.mxu1 %v2281_v51  ;;  %2678 = vmatprep.subr.mxu0 %v4462_v52 }
 0x141   :  { %2850 = vmatprep.subr.mxu1 %v2280_v61  ;;  %2679 = vmatpush2.msra.mxu0 %v4461_v19  ;;  %v6255_v61 = vsub.s32 2, %v4987_v14 }
 0x142   :  { %1968 = vrot.lane.b32.xlu1 %v6086_v45, %s4895_s25  ;;  %2851 = vmatpush2.msra.mxu1 %v2279_v7 }
 0x143   :  { %2680 = vmatprep.subr.mxu0 %v4460_v58  ;;  %2852 = vmatprep.subr.mxu1 %v2278_v54  ;;  %v6259_v58 = vsub.s32 3, %v4987_v14 }
 0x144   :  { %2681 = vmatpush2.msra.mxu0 %v4459_v16  ;;  %2853 = vmatpush2.msra.mxu1 %v2277_v56 }
 0x145   :  { %2682 = vmatprep.subr.mxu0 %v4458_v26  ;;  %2854 = vmatprep.subr.mxu1 %v2276_v63  ;;  %v6264_v63 = vsub.s32 %v2155_v24, %v4987_v14 }
 0x146   :  { %2683 = vmatpush2.msra.mxu0 %v4457_v34  ;;  %2855 = vmatpush2.msra.mxu1 %v2275_v49 }
 0x147   :  { %2684 = vmatprep.subr.mxu0 %v4456_v2  ;;  %2856 = vmatprep.subr.mxu1 %v2274_v53 }
 0x148   :  { %2685 = vmatpush2.msra.mxu0 %v4455_v23  ;;  %2857 = vmatpush2.msra.mxu1 %v2273_v28 }
 0x149   :  { %2686 = vmatprep.subr.mxu0 %v4454_v41  ;;  %2858 = vmatprep.subr.mxu1 %v2272_v48 }
 0x14a   :  { %2687 = vmatpush2.msra.mxu0 %v4453_v5  ;;  %2859 = vmatpush2.msra.mxu1 %v2271_v29 }
 0x14b   :  { %2688 = vmatprep.subr.mxu0 %v4452_v43  ;;  %2860 = vmatprep.subr.mxu1 %v2270_v35 }
 0x14c   :  { %2689 = vmatpush2.msra.mxu0 %v4451_v46  ;;  %2861 = vmatpush2.msra.mxu1 %v2269_v25 }
 0x14d   :  { %2690 = vmatprep.subr.mxu0 %v4450_v59  ;;  %2862 = vmatprep.subr.mxu1 %v2268_v3 }
 0x14e   :  { %2691 = vmatpush2.msra.mxu0 %v4449_v36  ;;  %2863 = vmatpush2.msra.mxu1 %v2267_v22 }
 0x14f   :  { %2692 = vmatprep.subr.mxu0 %v4448_v50  ;;  %2864 = vmatprep.subr.mxu1 %v2266_v11 }
 0x150   :  { %2693 = vmatpush2.msra.mxu0 %v4447_v17  ;;  %2865 = vmatpush2.msra.mxu1 %v2265_v0 }
 0x151   :  { %2694 = vmatprep.subr.mxu0 %v4446_v44  ;;  %2866 = vmatprep.subr.mxu1 %v2264_v1 }
 0x152   :  { %2695 = vmatpush2.msra.mxu0 %v4445_v20  ;;  %2867 = vmatpush2.msra.mxu1 %v2263_v21 }
 0x153   :  { %3151 = vmatprep.subr.mxu0 %v4502_v57  ;;  %3500 = vmatprep.subr.mxu1 %v4557_v12 }
 0x19a   :  { %v1947_v18 = vpop.permute.xlu0 %1946 }
 0x19b   :  { %v1970_v40 = vrot.slane %v1947_v18, 2 }
 0x19d   :  { %v1983_v13 = vsel %vm1982_vm9, %v1947_v18, %v1970_v40 }
 0x19e   :  { %v1951_v33 = vpop.permute.xlu0 %1950  ;;  %v2007_v19 = vmax.f32 %v5891_v8, %v1983_v13 }
 0x19f   :  { %v1972_v27 = vrot.slane %v1951_v33, 2 }
 0x1a0   :  { %v1959_v62 = vpop.permute.xlu1 %1958  ;;  %v2024_v2 = vrot.slane %v2007_v19, %v5806_v37  ;;  %v2028_v8 = vrot.slane %v2007_v19, %v6255_v61  ;;  %v2290_v41 = vrot.slane %v2007_v19, %v6259_v58 }
 0x1a1   :  { %v1985_v51 = vsel %vm1982_vm9, %v1951_v33, %v1972_v27  ;;  %v1976_v52 = vrot.slane %v1959_v62, 2 }
 0x1a2   :  { %v1949_v7 = vpop.permute.xlu0 %1948  ;;  %v2009_v54 = vmax.f32 %v5935_v15, %v1985_v51  ;;  %v2286_v15 = vrot.slane %v2007_v19, %v5812_v32 }
 0x1a3   :  { %v1989_v16 = vsel %vm1982_vm9, %v1959_v62, %v1976_v52  ;;  %v1971_v56 = vrot.slane %v1949_v7, 2 }
 0x1a4   :  { %v1961_v26 = vpop.permute.xlu1 %1960  ;;  %v2013_v53 = vmax.f32 %v5963_v4, %v1989_v16  ;;  %v2068_v48 = vrot.slane %v2009_v54, %v5806_v37  ;;  %v2072_v14 = vrot.slane %v2009_v54, %v6255_v61  ;;  %v2330_v3 = vrot.slane %v2009_v54, %v6259_v58 }
 0x1a5   :  { %v1984_v34 = vsel %vm1982_vm9, %v1949_v7, %v1971_v56  ;;  %v1977_v49 = vrot.slane %v1961_v26, 2 }
 0x1a6   :  { %v2008_v23 = vmax.f32 %v5977_v47, %v1984_v34  ;;  %v1953_v28 = vpop.permute.xlu0 %1952  ;;  %v2326_v47 = vrot.slane %v2009_v54, %v5812_v32  ;;  %v2032_v36 = vrot.slane %v2013_v53, %v5806_v37  ;;  %v2036_v22 = vrot.slane %v2013_v53, %v6255_v61 }
 0x1a7   :  { %v1990_v46 = vsel %vm1982_vm9, %v1961_v26, %v1977_v49  ;;  %v1973_v25 = vrot.slane %v1953_v28, 2  ;;  %v2294_v50 = vrot.slane %v2013_v53, %v5812_v32  ;;  %v2298_v11 = vrot.slane %v2013_v53, %v6259_v58 }
 0x1a8   :  { %v2046_v5 = vrot.slane %v2008_v23, %v5806_v37  ;;  %v2050_v29 = vrot.slane %v2008_v23, %v6255_v61  ;;  %v2306_v43 = vrot.slane %v2008_v23, %v5812_v32  ;;  %v2310_v35 = vrot.slane %v2008_v23, %v6259_v58  ;;  %v1965_v4 = vpop.permute.xlu1 %1964 }
 0x1a9   :  { %v1979_v59 = vrot.slane %v1965_v4, 2  ;;  %v2014_v12 = vmax.f32 %v5993_v42, %v1990_v46  ;;  %v1986_v6 = vsel %vm1982_vm9, %v1953_v28, %v1973_v25 }
 0x1aa   :  { %v2129_v17 = vsel %vm127_vm1, %v2024_v2, %v2046_v5  ;;  %v2130_v0 = vsel %vm127_vm1, %v2028_v8, %v2050_v29  ;;  %v2383_v44 = vsel %vm127_vm1, %v2286_v15, %v2306_v43  ;;  %v1955_v1 = vpop.permute.xlu0 %1954  ;;  %v2384_v20 = vsel %vm127_vm1, %v2290_v41, %v2310_v35 }
 0x1ab   :  { %v2903_v21 = vsel %vm127_vm1, %v2046_v5, %v2068_v48  ;;  %v2904_v57 = vsel %vm127_vm1, %v2050_v29, %v2072_v14  ;;  %v3252_v40 = vsel %vm127_vm1, %v2306_v43, %v2326_v47  ;;  %v3253_v30 = vsel %vm127_vm1, %v2310_v35, %v2330_v3 }
 0x1ac   :  { %v1963_v18 = vpop.permute.xlu1 %1962  ;;  %v1992_v33 = vsel %vm1982_vm9, %v1965_v4, %v1979_v59  ;;  %v6298_v13 = vrot.slane %v2014_v12, %v5806_v37  ;;  %v6301_v27 = vrot.slane %v2014_v12, %v6255_v61  ;;  %v6304_v62 = vrot.slane %v2014_v12, %v5812_v32 }
 0x1ad   :  { %v1974_v42 = vrot.slane %v1955_v1, 2  ;;  %v6307_v24 = vrot.slane %v2014_v12, %v6259_v58  ;;  %v2133_v51 = vsel %vm257_vm0, %v2129_v17, %v2068_v48  ;;  %v2010_v52 = vmax.f32 %v6010_v60, %v1986_v6 }
 0x1ae   :  { %v2016_v19 = vmax.f32 %v6024_v31, %v1992_v33  ;;  %v2134_v7 = vsel %vm257_vm0, %v2130_v0, %v2072_v14  ;;  %v2387_v54 = vsel %vm257_vm0, %v2383_v44, %v2326_v47  ;;  %v2388_v16 = vsel %vm257_vm0, %v2384_v20, %v2330_v3  ;;  %v1957_v25 = vpop.permute.xlu0 %1956 }
 0x1af   :  { %v1978_v56 = vrot.slane %v1963_v18, 2  ;;  %v2090_v26 = vrot.slane %v2010_v52, %v5806_v37  ;;  %v2094_v34 = vrot.slane %v2010_v52, %v6255_v61  ;;  %v2346_v49 = vrot.slane %v2010_v52, %v5812_v32 }
 0x1b0   :  { %v2350_v2 = vrot.slane %v2010_v52, %v6259_v58  ;;  %v2131_v60 = vsel %vm127_vm1, %v2032_v36, %v6298_v13  ;;  %v2132_v31 = vsel %vm127_vm1, %v2036_v22, %v6301_v27  ;;  %v2385_v8 = vsel %vm127_vm1, %v2294_v50, %v6304_v62  ;;  %v6326_v23 = vpop.permute.xlu1 %1966 }
 0x1b1   :  { %v1987_v53 = vsel %vm1982_vm9, %v1955_v1, %v1974_v42  ;;  %v2386_v28 = vsel %vm127_vm1, %v2298_v11, %v6307_v24  ;;  %v2098_v15 = vrot.slane %v2016_v19, %v5806_v37  ;;  %v2102_v41 = vrot.slane %v2016_v19, %v6255_v61 }
 0x1b2   :  { %v6333_v48 = vrot.slane %v2016_v19, %v5812_v32  ;;  %v2138_v14 = vsel %vm2137_vm10, %v2133_v51, %v2090_v26  ;;  %v2139_v5 = vsel %vm2137_vm10, %v2134_v7, %v2094_v34  ;;  %v2391_v29 = vsel %vm2137_vm10, %v2387_v54, %v2346_v49 }
 0x1b3   :  { %v2358_v43 = vrot.slane %v2016_v19, %v6259_v58  ;;  %v2392_v35 = vsel %vm2137_vm10, %v2388_v16, %v2350_v2  ;;  %v2907_v4 = vsel %vm257_vm0, %v2903_v21, %v2090_v26  ;;  %v2011_v47 = vmax.f32 %v6037_v39, %v1987_v53 }
 0x1b4   :  { %v1991_v46 = vsel %vm1982_vm9, %v1963_v18, %v1978_v56  ;;  %v2908_v59 = vsel %vm257_vm0, %v2904_v57, %v2094_v34  ;;  %v3256_v3 = vsel %vm257_vm0, %v3252_v40, %v2346_v49  ;;  %v3257_v36 = vsel %vm257_vm0, %v3253_v30, %v2350_v2  ;;  %v1969_v21 = vpop.permute.xlu1 %1968 }
 0x1b5   :  { %v2015_v22 = vmax.f32 %v6056_v55, %v1991_v46  ;;  %v2112_v50 = vrot.slane %v2011_v47, %v5806_v37  ;;  %v2116_v11 = vrot.slane %v2011_v47, %v6255_v61  ;;  %v2366_v17 = vrot.slane %v2011_v47, %v5812_v32 }
 0x1b6   :  { %v2370_v0 = vrot.slane %v2011_v47, %v6259_v58  ;;  %v1975_v20 = vrot.slane %v1957_v25, 2  ;;  %v1980_v52 = vrot.slane %v6326_v23, 2  ;;  %v1981_v19 = vrot.slane %v1969_v21, 2 }
 0x1b7   :  { %v2076_v39 = vrot.slane %v2015_v22, %v5806_v37  ;;  %v2080_v44 = vrot.slane %v2015_v22, %v6255_v61  ;;  %v2334_v1 = vrot.slane %v2015_v22, %v5812_v32  ;;  %v2143_v57 = vsel %vm2142_vm11, %v2138_v14, %v2112_v50 }
 0x1b8   :  { %v2144_v55 = vsel %vm2142_vm11, %v2139_v5, %v2116_v11  ;;  %v2395_v12 = vsel %vm2142_vm11, %v2391_v29, %v2366_v17  ;;  %v2396_v18 = vsel %vm2142_vm11, %v2392_v35, %v2370_v0  ;;  %v2338_v33 = vrot.slane %v2015_v22, %v6259_v58 }
 0x1b9   :  { %v2151_v40 = vcombine.low %v2143_v57, %v2144_v55  ;;  %v2152_v30 = vcombine.high %v2143_v57, %v2144_v55  ;;  %v2403_v6 = vcombine.low %v2395_v12, %v2396_v18  ;;  %v2404_v42 = vcombine.high %v2395_v12, %v2396_v18 }
 0x1ba   :  { %v2911_v51 = vsel %vm2137_vm10, %v2907_v4, %v2112_v50  ;;  %v2912_v54 = vsel %vm2137_vm10, %v2908_v59, %v2116_v11  ;;  %v3260_v16 = vsel %vm2137_vm10, %v3256_v3, %v2366_v17  ;;  %v3261_v56 = vsel %vm2137_vm10, %v3257_v36, %v2370_v0 }
 0x1bb   :  { %v6362_v7 = vrot.slane %v2151_v40, %v6264_v63  ;;  %v6368_v26 = vrot.slane %v2152_v30, %v6264_v63  ;;  %v2135_v34 = vsel %vm257_vm0, %v2131_v60, %v2076_v39  ;;  %v2136_v49 = vsel %vm257_vm0, %v2132_v31, %v2080_v44 }
 0x1bc   :  { %v2389_v2 = vsel %vm257_vm0, %v2385_v8, %v2334_v1  ;;  %v2411_v53 = vrot.slane %v2403_v6, %v6264_v63  ;;  %v2390_v14 = vsel %vm257_vm0, %v2386_v28, %v2338_v33  ;;  %v2905_v5 = vsel %vm127_vm1, %v6298_v13, %v2076_v39 }
 0x1bd   :  { %v2906_v29 = vsel %vm127_vm1, %v6301_v27, %v2080_v44  ;;  %v6380_v35 = vrot.slane %v2404_v42, %v6264_v63  ;;  %v3254_v60 = vsel %vm127_vm1, %v6304_v62, %v2334_v1  ;;  %v3255_v31 = vsel %vm127_vm1, %v6307_v24, %v2338_v33 }
 0x1be   :  { %v1988_v8 = vsel %vm1982_vm9, %v1957_v25, %v1975_v20  ;;  %v2140_v28 = vsel %vm2137_vm10, %v2135_v34, %v2098_v15  ;;  %v2141_v13 = vsel %vm2137_vm10, %v2136_v49, %v2102_v41  ;;  %v2393_v27 = vsel %vm2137_vm10, %v2389_v2, %v6333_v48 }
 0x1bf   :  { %v2012_v4 = vmax.f32 %v6063_v10, %v1988_v8  ;;  %v2394_v47 = vsel %vm2137_vm10, %v2390_v14, %v2358_v43  ;;  %v2909_v46 = vsel %vm257_vm0, %v2905_v5, %v2098_v15  ;;  %v2910_v62 = vsel %vm257_vm0, %v2906_v29, %v2102_v41 }
 0x1c0   :  { %v1993_v24 = vsel %vm1982_vm9, %v6326_v23, %v1980_v52  ;;  %v3258_v36 = vsel %vm257_vm0, %v3254_v60, %v6333_v48  ;;  %v3259_v22 = vsel %vm257_vm0, %v3255_v31, %v2358_v43  ;;  %v1994_v41 = vsel %vm1982_vm9, %v1969_v21, %v1981_v19 }
 0x1c1   :  { %v2886_v25 = vrot.slane %v2012_v4, %v5806_v37  ;;  %v2890_v10 = vrot.slane %v2012_v4, %v6255_v61  ;;  %v3235_v59 = vrot.slane %v2012_v4, %v5812_v32  ;;  %v3239_v3 = vrot.slane %v2012_v4, %v6259_v58 }
 0x1c2   :  { %v2017_v15 = vmax.f32 %v6068_v9, %v1993_v24  ;;  %v2018_v57 = vmax.f32 %v6086_v45, %v1994_v41  ;;  %v2419_v55 = vcombine.high %v2411_v53, %v2411_v53  ;;  %v2426_v12 = vrot.slane %v2411_v53, %v6264_v63 }
 0x1c3   :  { %v2915_v50 = vsel %vm2142_vm11, %v2911_v51, %v2886_v25  ;;  %v2916_v23 = vsel %vm2142_vm11, %v2912_v54, %v2890_v10  ;;  %v3264_v11 = vsel %vm2142_vm11, %v3260_v16, %v3235_v59  ;;  %v3265_v17 = vsel %vm2142_vm11, %v3261_v56, %v3239_v3 }
 0x1c4   :  { %v2923_v0 = vcombine.low %v2915_v50, %v2916_v23  ;;  %v2924_v39 = vcombine.high %v2915_v50, %v2916_v23  ;;  %v3272_v44 = vcombine.low %v3264_v11, %v3265_v17  ;;  %v3273_v1 = vcombine.high %v3264_v11, %v3265_v17 }
 0x1c5   :  { %v2120_v48 = vrot.slane %v2017_v15, %v5806_v37  ;;  %v2124_v43 = vrot.slane %v2017_v15, %v6255_v61  ;;  %v2374_v9 = vrot.slane %v2017_v15, %v5812_v32  ;;  %v2378_v20 = vrot.slane %v2017_v15, %v6259_v58 }
 0x1c6   :  { %v6415_v21 = vrot.slane %v2923_v0, %v6264_v63  ;;  %v6428_v33 = vrot.slane %v2924_v39, %v6264_v63  ;;  %v6431_v42 = vrot.slane %v3272_v44, %v6264_v63  ;;  %v6434_v45 = vrot.slane %v3273_v1, %v6264_v63 }
 0x1c7   :  { %v6420_v18 = vsel %vm2142_vm11, %v2140_v28, %v2120_v48  ;;  %v6423_v40 = vsel %vm2142_vm11, %v2141_v13, %v2124_v43  ;;  %v2397_v30 = vsel %vm2142_vm11, %v2393_v27, %v2374_v9  ;;  %v2398_v6 = vsel %vm2142_vm11, %v2394_v47, %v2378_v20 }
 0x1c8   :  { %v2443_v51 = vcombine.low %v2397_v30, %v2398_v6  ;;  %v2191_v52 = vcombine.low %v6420_v18, %v6423_v40  ;;  %v2192_v19 = vcombine.high %v6420_v18, %v6423_v40  ;;  %v2913_v54 = vsel %vm2137_vm10, %v2909_v46, %v2120_v48 }
 0x1c9   :  { %v2914_v16 = vsel %vm2137_vm10, %v2910_v62, %v2124_v43  ;;  %v3262_v34 = vsel %vm2137_vm10, %v3258_v36, %v2374_v9  ;;  %v2894_v49 = vrot.slane %v2018_v57, %v5806_v37  ;;  %v2898_v2 = vrot.slane %v2018_v57, %v6255_v61 }
 0x1ca   :  { %v2451_v56 = vrot.slane %v2443_v51, %v6264_v63  ;;  %v3263_v53 = vsel %vm2137_vm10, %v3259_v22, %v2378_v20  ;;  %v3243_v14 = vrot.slane %v2018_v57, %v5812_v32  ;;  %v3247_v5 = vrot.slane %v2018_v57, %v6259_v58 }
 0x1cb   :  { %v2440_v29 = vrot.slane %v2419_v55, %v6264_v63  ;;  %v6451_v60 = vsel %vm2142_vm11, %v2913_v54, %v2894_v49  ;;  %v6454_v31 = vsel %vm2142_vm11, %v2914_v16, %v2898_v2  ;;  %v2433_v58 = vrot.slane %v6380_v35, %v6264_v63 }
 0x1cc   :  { %v2459_v8 = vcombine.high %v2451_v56, %v2451_v56  ;;  %v2466_v4 = vrot.slane %v2451_v56, %v6264_v63  ;;  %v2963_v61 = vcombine.low %v6451_v60, %v6454_v31  ;;  %v6460_v28 = vsel %vm2142_vm11, %v3262_v34, %v3243_v14 }
 0x1cd   :  { %v6463_v13 = vsel %vm2142_vm11, %v3263_v53, %v3247_v5  ;;  %v2199_v27 = vrot.slane %v2191_v52, %v6264_v63  ;;  %v2444_v47 = vcombine.high %v2397_v30, %v2398_v6  ;;  %v2536_v25 = vcombine.low %v2426_v12, %v2440_v29 }
 0x1ce   :  { %v2480_v46 = vrot.slane %v2459_v8, %v6264_v63  ;;  %v2481_v62 = vcombine.high %v2466_v4, %v2466_v4  ;;  %v3312_v24 = vcombine.low %v6460_v28, %v6463_v13  ;;  %v4465_v10 = vcombine.high %v2426_v12, %v2440_v29 }
 0x1cf   :  { %v2538_v59 = vcombine.low %v2433_v58, %v2466_v4  ;;  %v6472_v3 = vrot.slane %v2963_v61, %v6264_v63  ;;  %v2167_v35 = vcombine.high %v6362_v7, %v6362_v7  ;;  %v2174_v22 = vrot.slane %v6362_v7, %v6264_v63  ;;  %v4501_v4 = vld [vmem:[%s7285_s3 + $0x430] sm:$0xff] }
 0x1d0   :  { %v2539_v36 = vcombine.low %v2480_v46, %v2481_v62  ;;  %v2546_v15 = vrot.slane %v2536_v25, %v6264_v63  ;;  %v2553_v41 = vrot.slane %v4465_v10, %v6264_v63  ;;  %v2181_v23 = vrot.slane %v6368_v26, %v6264_v63  ;;  %v4500_v62 = vld [vmem:[%s7285_s3 + $0x428] sm:$0xff] }
 0x1d1   :  { %v2560_v50 = vrot.slane %v2538_v59, %v6264_v63  ;;  %v2188_v17 = vrot.slane %v2167_v35, %v6264_v63  ;;  %v2207_v0 = vcombine.high %v2199_v27, %v2199_v27  ;;  %v2214_v39 = vrot.slane %v2199_v27, %v6264_v63  ;;  %v4499_v59 = vld [vmem:[%s7285_s3 + $0x420] sm:$0xff] }
 0x1d2   :  { %v2567_v11 = vrot.slane %v2539_v36, %v6264_v63  ;;  %v2568_v44 = vcombine.low %v2546_v15, %v2553_v41  ;;  %v2569_v1 = vcombine.high %v2546_v15, %v2553_v41  ;;  %v2458_v7 = vrot.slane %v2444_v47, %v6264_v63 }
 0x1d3   :  { %v2482_v48 = vcombine.high %v2480_v46, %v2480_v46  ;;  %v2228_v20 = vrot.slane %v2207_v0, %v6264_v63  ;;  %v2229_v57 = vcombine.high %v2214_v39, %v2214_v39  ;;  %v2709_v26 = vcombine.low %v2174_v22, %v2188_v17 }
 0x1d4   :  { %v2570_v43 = vcombine.low %v2560_v50, %v2567_v11  ;;  %v2571_v9 = vcombine.high %v2560_v50, %v2567_v11  ;;  %v2585_v55 = vrot.slane %v2569_v1, %v6264_v63  ;;  %v4468_v12 = vcombine.high %v2174_v22, %v2188_v17  ;;  %v4497_v50 = vld [vmem:[%s7285_s3 + $0x410] sm:$0xff] }
 0x1d5   :  { %v2711_v30 = vcombine.low %v2181_v23, %v2214_v39  ;;  %v2712_v51 = vcombine.low %v2228_v20, %v2229_v57  ;;  %v2578_v52 = vrot.slane %v2568_v44, %v6264_v63  ;;  %v2719_v16 = vrot.slane %v2709_v26, %v6264_v63  ;;  %v4556_v1 = vld [vmem:[%s7285_s3 + $0x5d0] sm:$0xff]  ;;  %v4496_v57 = vld [vmem:[%s7285_s3 + $0x408] sm:$0xff]  ;;  %v4554_v26 = vld [vmem:[%s7285_s3 + $0x5c0] sm:$0xff] }
 0x1d6   :  { %v2599_v6 = vrot.slane %v2571_v9, %v6264_v63  ;;  %v2592_v54 = vrot.slane %v2570_v43, %v6264_v63  ;;  %v2726_v56 = vrot.slane %v4468_v12, %v6264_v63  ;;  %v2473_v49 = vrot.slane %v2458_v7, %v6264_v63 }
 0x1d7   :  { %v2733_v34 = vrot.slane %v2711_v30, %v6264_v63  ;;  %v2740_v53 = vrot.slane %v2712_v51, %v6264_v63  ;;  %v2206_v5 = vrot.slane %v2192_v19, %v6264_v63  ;;  %v2230_v58 = vcombine.high %v2228_v20, %v2228_v20  ;;  %v4555_v20 = vld [vmem:[%s7285_s3 + $0x5c8] sm:$0xff] }
 0x1d8   :  { %v2601_v2 = vcombine.low %v2585_v55, %v2599_v6  ;;  %v2600_v14 = vcombine.low %v2578_v52, %v2592_v54  ;;  %v2741_v29 = vcombine.low %v2719_v16, %v2726_v56  ;;  %v2742_v8 = vcombine.high %v2719_v16, %v2726_v56  ;;  %v4553_v52 = vld [vmem:[%s7285_s3 + $0x5b8] sm:$0xff] }
 0x1d9   :  { %v2602_v61 = vcombine.low %v2482_v48, %v2473_v49  ;;  %v2743_v27 = vcombine.low %v2733_v34, %v2740_v53  ;;  %v2744_v47 = vcombine.high %v2733_v34, %v2740_v53  ;;  %v2221_v46 = vrot.slane %v2206_v5, %v6264_v63  ;;  %v4552_v34 = vld [vmem:[%s7285_s3 + $0x5b0] sm:$0xff]  ;;  %v4551_v5 = vld [vmem:[%s7285_s3 + $0x5a8] sm:$0xff] }
 0x1da   :  { %4466 = vmatprep.mubr.msk.f32.mxu0 %vm2627_vm12, %v2601_v2  ;;  %v2939_v18 = vcombine.high %v6415_v21, %v6415_v21  ;;  %v6512_v40 = vrot.slane %v3312_v24, %v6264_v63  ;;  %v2758_v19 = vrot.slane %v2742_v8, %v6264_v63  ;;  %v2751_v25 = vrot.slane %v2741_v29, %v6264_v63  ;;  %v4498_v24 = vld [vmem:[%s7285_s3 + $0x418] sm:$0xff]  ;;  %v4495_v2 = vld [vmem:[%s7285_s3 + $0x400] sm:$0xff] }
 0x1db   :  { %2697 = vmatmul.mubr.f32.vlgmr.msra.gmra.mxu0 %v2600_v14  ;;  %v2609_v10 = vrot.slane %v2602_v61, %v6264_v63  ;;  %v2772_v36 = vrot.slane %v2744_v47, %v6264_v63  ;;  %v2765_v35 = vrot.slane %v2743_v27, %v6264_v63  ;;  %v2775_v22 = vcombine.low %v2230_v58, %v2221_v46  ;;  %v4494_v8 = vld [vmem:[%s7285_s3 + $0x3f8] sm:$0xff]  ;;  %v4550_v27 = vld [vmem:[%s7285_s3 + $0x5a0] sm:$0xff] }
 0x1dc   :  { %3152 = vmatpush1.msra.mxu0 %v4501_v4  ;;  %v2946_v15 = vrot.slane %v6415_v21, %v6264_v63  ;;  %v2953_v23 = vrot.slane %v6428_v33, %v6264_v63  ;;  %v2960_v11 = vrot.slane %v2939_v18, %v6264_v63  ;;  %v2979_v17 = vcombine.high %v6472_v3, %v6472_v3  ;;  %v4492_v18 = vld [vmem:[%s7285_s3 + $0x3e8] sm:$0xff] }
 0x1dd   :  { %v2610_v41 = vcombine.high %v2609_v10, %v2609_v10  ;;  %3153 = vmatprep.subr.mxu0 %v4500_v62  ;;  %v2774_v0 = vcombine.low %v2758_v19, %v2772_v36  ;;  %v2773_v39 = vcombine.low %v2751_v25, %v2765_v35  ;;  %v2782_v44 = vrot.slane %v2775_v22, %v6264_v63  ;;  %v4549_v62 = vld [vmem:[%s7285_s3 + $0x598] sm:$0xff] }
 0x1de   :  { %3154 = vmatpush1.msra.mxu0 %v4499_v59  ;;  %v2986_v21 = vrot.slane %v6472_v3, %v6264_v63  ;;  %v6543_v33 = vrot.slane %v2979_v17, %v6264_v63  ;;  %v3056_v48 = vcombine.low %v2946_v15, %v2960_v11  ;;  %v4523_v43 = vcombine.high %v2946_v15, %v2960_v11  ;;  %v4491_v59 = vld [vmem:[%s7285_s3 + $0x3e0] sm:$0xff]  ;;  %v4490_v15 = vld [vmem:[%s7285_s3 + $0x3d8] sm:$0xff] }
 0x1df   :  { %v2624_v7 = vrot.slane %v2610_v41, %v6264_v63  ;;  %3155 = vmatprep.subr.mxu0 %v4498_v24  ;;  %4469 = vmatprep.mubr.msk.f32.mxu1 %vm2627_vm12, %v2774_v0  ;;  %v2783_v9 = vcombine.high %v2782_v44, %v2782_v44  ;;  %v2617_v3 = vrot.slane %v2609_v10, %v6264_v63  ;;  %v4547_v24 = vld [vmem:[%s7285_s3 + $0x588] sm:$0xff]  ;;  %v4545_v0 = vld [vmem:[%s7285_s3 + $0x578] sm:$0xff] }
 0x1e0   :  { %3156 = vmatpush1.msra.mxu0 %v4497_v50  ;;  %v3001_v55 = vcombine.high %v2986_v21, %v2986_v21  ;;  %2869 = vmatmul.mubr.f32.vlgmr.msra.gmra.mxu1 %v2773_v39  ;;  %v3058_v12 = vcombine.low %v2953_v23, %v2986_v21  ;;  %v6558_v30 = vrot.slane %v3056_v48, %v6264_v63  ;;  %v4546_v23 = vld [vmem:[%s7285_s3 + $0x580] sm:$0xff]  ;;  %v4489_v39 = vld [vmem:[%s7285_s3 + $0x3d0] sm:$0xff]  ;;  %v4488_v21 = vld [vmem:[%s7285_s3 + $0x3c8] sm:$0xff] }
 0x1e1   :  { %4467 = vmatprep.mubr.msk.f32.mxu0 %vm2627_vm12, %v2624_v7  ;;  %v6561_v6 = vrot.slane %v4523_v43, %v6264_v63  ;;  %3501 = vmatpush1.msra.mxu1 %v4556_v1  ;;  %v2797_v51 = vrot.slane %v2783_v9, %v6264_v63  ;;  %v3288_v16 = vcombine.high %v6431_v42, %v6431_v42  ;;  %v4543_v43 = vld [vmem:[%s7285_s3 + $0x568] sm:$0xff]  ;;  %v4487_v9 = vld [vmem:[%s7285_s3 + $0x3c0] sm:$0xff] }
 0x1e2   :  { %2703 = vmatmul.mubr.f32.gmra.mxu0 %v2617_v3  ;;  %v3059_v54 = vcombine.low %v6543_v33, %v3001_v55  ;;  %3502 = vmatprep.subr.mxu1 %v4555_v20  ;;  %v2790_v56 = vrot.slane %v2782_v44, %v6264_v63  ;;  %v6581_v53 = vrot.slane %v3058_v12, %v6264_v63  ;;  %v4544_v44 = vld [vmem:[%s7285_s3 + $0x570] sm:$0xff]  ;;  %v4542_v20 = vld [vmem:[%s7285_s3 + $0x560] sm:$0xff]  ;;  %v4486_v3 = vld [vmem:[%s7285_s3 + $0x3b8] sm:$0xff] }
 0x1e3   :  { %3157 = vmatprep.subr.mxu0 %v4496_v57  ;;  %v3089_v49 = vcombine.high %v6558_v30, %v6561_v6  ;;  %4470 = vmatprep.mubr.msk.f32.mxu1 %vm2627_vm12, %v2797_v51  ;;  %v3295_v29 = vrot.slane %v6431_v42, %v6264_v63  ;;  %v3302_v4 = vrot.slane %v6434_v45, %v6264_v63  ;;  %v4493_v42 = vld [vmem:[%s7285_s3 + $0x3f0] sm:$0xff]  ;;  %v4541_v55 = vld [vmem:[%s7285_s3 + $0x558] sm:$0xff]  ;;  %v4484_v51 = vld [vmem:[%s7285_s3 + $0x3a8] sm:$0xff] }
 0x1e4   :  { %3503 = vmatpush1.msra.mxu1 %v4554_v26  ;;  %v6584_v14 = vrot.slane %v3059_v54, %v6264_v63  ;;  %v3309_v61 = vrot.slane %v3288_v16, %v6264_v63  ;;  %v3328_v58 = vcombine.high %v6512_v40, %v6512_v40  ;;  %v3335_v45 = vrot.slane %v6512_v40, %v6264_v63  ;;  %v4548_v40 = vld [vmem:[%s7285_s3 + $0x590] sm:$0xff]  ;;  %v4539_v16 = vld [vmem:[%s7285_s3 + $0x548] sm:$0xff] }
 0x1e5   :  { %3504 = vmatprep.subr.mxu1 %v4553_v52  ;;  %2875 = vmatmul.mubr.f32.gmra.mxu1 %v2790_v56  ;;  %v3105_v46 = vrot.slane %v3089_v49, %v6264_v63  ;;  %v4485_v26 = vld [vmem:[%s7285_s3 + $0x3b0] sm:$0xff]  ;;  %v4483_v56 = vld [vmem:[%s7285_s3 + $0x3a0] sm:$0xff] }
 0x1e6   :  { %3505 = vmatpush1.msra.mxu1 %v4552_v34  ;;  %v3091_v47 = vcombine.high %v6581_v53, %v6584_v14  ;;  %3158 = vmatpush1.msra.mxu0 %v4495_v2  ;;  %v6617_v19 = vrot.slane %v3328_v58, %v6264_v63  ;;  %v3405_v25 = vcombine.low %v3295_v29, %v3309_v61  ;;  %v4540_v12 = vld [vmem:[%s7285_s3 + $0x550] sm:$0xff]  ;;  %v4538_v34 = vld [vmem:[%s7285_s3 + $0x540] sm:$0xff]  ;;  %v4482_v2 = vld [vmem:[%s7285_s3 + $0x398] sm:$0xff] }
 0x1e7   :  { %3506 = vmatprep.subr.mxu1 %v4551_v5  ;;  %v4578_v10 = vcombine.high %v3295_v29, %v3309_v61  ;;  %3159 = vmatprep.subr.mxu0 %v4494_v8  ;;  %v3350_v35 = vcombine.high %v3335_v45, %v3335_v45  ;;  %v3407_v22 = vcombine.low %v3302_v4, %v3335_v45  ;;  %v4537_v5 = vld [vmem:[%s7285_s3 + $0x538] sm:$0xff]  ;;  %v4481_v29 = vld [vmem:[%s7285_s3 + $0x390] sm:$0xff]  ;;  %v4480_v4 = vld [vmem:[%s7285_s3 + $0x388] sm:$0xff] }
 0x1e8   :  { %v3119_v36 = vrot.slane %v3091_v47, %v6264_v63  ;;  %3507 = vmatpush1.msra.mxu1 %v4550_v27  ;;  %3160 = vmatpush1.msra.mxu0 %v4493_v42  ;;  %v6633_v41 = vrot.slane %v3405_v25, %v6264_v63  ;;  %v4536_v8 = vld [vmem:[%s7285_s3 + $0x530] sm:$0xff]  ;;  %v4535_v61 = vld [vmem:[%s7285_s3 + $0x528] sm:$0xff]  ;;  %v4479_v58 = vld [vmem:[%s7285_s3 + $0x380] sm:$0xff] }
 0x1e9   :  { %v6636_v50 = vrot.slane %v4578_v10, %v6264_v63  ;;  %3508 = vmatprep.subr.mxu1 %v4549_v62  ;;  %3161 = vmatprep.subr.mxu0 %v4492_v18  ;;  %v3408_v17 = vcombine.low %v6617_v19, %v3350_v35  ;;  %v6656_v1 = vrot.slane %v3407_v22, %v6264_v63  ;;  %v4534_v27 = vld [vmem:[%s7285_s3 + $0x520] sm:$0xff]  ;;  %v4478_v42 = vld [vmem:[%s7285_s3 + $0x378] sm:$0xff]  ;;  %v4532_v45 = vld [vmem:[%s7285_s3 + $0x510] sm:$0xff] }
 0x1ea   :  { %v3121_v11 = vcombine.low %v3105_v46, %v3119_v36  ;;  %3509 = vmatpush1.msra.mxu1 %v4548_v40  ;;  %3162 = vmatpush1.msra.mxu0 %v4491_v59  ;;  %v4533_v47 = vld [vmem:[%s7285_s3 + $0x518] sm:$0xff]  ;;  %v4477_v46 = vld [vmem:[%s7285_s3 + $0x370] sm:$0xff]  ;;  %v4476_v62 = vld [vmem:[%s7285_s3 + $0x368] sm:$0xff] }
 0x1eb   :  { %3510 = vmatprep.subr.mxu1 %v4547_v24  ;;  %3163 = vmatprep.subr.mxu0 %v4490_v15  ;;  %v6659_v7 = vrot.slane %v3408_v17, %v6264_v63  ;;  %v3438_v48 = vcombine.high %v6633_v41, %v6636_v50  ;;  %v4531_v18 = vld [vmem:[%s7285_s3 + $0x508] sm:$0xff]  ;;  %v4475_v25 = vld [vmem:[%s7285_s3 + $0x360] sm:$0xff]  ;;  %v4474_v40 = vld [vmem:[%s7285_s3 + $0x358] sm:$0xff]  ;;  %v3313_v17 = vcombine.high %v6460_v28, %v6463_v13 }
 0x1ec   :  { %4524 = vmatprep.mubr.msk.f32.mxu0 %vm2627_vm12, %v3121_v11  ;;  %3511 = vmatpush1.msra.mxu1 %v4546_v23  ;;  %v4530_v10 = vld [vmem:[%s7285_s3 + $0x500] sm:$0xff]  ;;  %v4529_v59 = vld [vmem:[%s7285_s3 + $0x4f8] sm:$0xff]  ;;  %v4473_v36 = vld [vmem:[%s7285_s3 + $0x350] sm:$0xff]  ;;  %v2964_v11 = vcombine.high %v6451_v60, %v6454_v31 }
 0x1ed   :  { %3512 = vmatprep.subr.mxu1 %v4545_v0  ;;  %3164 = vmatpush1.msra.mxu0 %v4489_v39  ;;  %v3440_v57 = vcombine.high %v6656_v1, %v6659_v7  ;;  %v3454_v52 = vrot.slane %v3438_v48, %v6264_v63  ;;  %v4528_v35 = vld [vmem:[%s7285_s3 + $0x4f0] sm:$0xff]  ;;  %v4472_v22 = vld [vmem:[%s7285_s3 + $0x348] sm:$0xff]  ;;  %v4471_v15 = vld [vmem:[%s7285_s3 + $0x340] sm:$0xff] }
 0x1ee   :  { %3513 = vmatpush1.msra.mxu1 %v4544_v44  ;;  %3165 = vmatprep.subr.mxu0 %v4488_v21  ;;  %v4527_v24 = vld [vmem:[%s7285_s3 + $0x4e8] sm:$0xff]  ;;  %v4526_v23 = vld [vmem:[%s7285_s3 + $0x4e0] sm:$0xff]  ;;  %v4522_v0 = vld [vmem:[%s7285_s3 + $0x4d8] sm:$0xff] }
 0x1ef   :  { %3514 = vmatprep.subr.mxu1 %v4543_v43  ;;  %3166 = vmatpush1.msra.mxu0 %v4487_v9  ;;  %v3468_v54 = vrot.slane %v3440_v57, %v6264_v63  ;;  %v4577_v39 = vld [vmem:[%s7285_s3 + $0x678] sm:$0xff]  ;;  %v4521_v44 = vld [vmem:[%s7285_s3 + $0x4d0] sm:$0xff]  ;;  %v4520_v31 = vld [vmem:[%s7285_s3 + $0x4c8] sm:$0xff]  ;;  %v2978_v9 = vrot.slane %v2964_v11, %v6264_v63 }
 0x1f0   :  { %3515 = vmatpush1.msra.mxu1 %v4542_v20  ;;  %3167 = vmatprep.subr.mxu0 %v4486_v3  ;;  %v4576_v60 = vld [vmem:[%s7285_s3 + $0x670] sm:$0xff]  ;;  %v4575_v28 = vld [vmem:[%s7285_s3 + $0x668] sm:$0xff]  ;;  %v4519_v13 = vld [vmem:[%s7285_s3 + $0x4c0] sm:$0xff]  ;;  %v3327_v20 = vrot.slane %v3313_v17, %v6264_v63 }
 0x1f1   :  { %3516 = vmatprep.subr.mxu1 %v4541_v55  ;;  %3168 = vmatpush1.msra.mxu0 %v4485_v26  ;;  %v3470_v49 = vcombine.low %v3454_v52, %v3468_v54  ;;  %v4574_v21 = vld [vmem:[%s7285_s3 + $0x660] sm:$0xff]  ;;  %v4518_v48 = vld [vmem:[%s7285_s3 + $0x4b8] sm:$0xff]  ;;  %v4517_v3 = vld [vmem:[%s7285_s3 + $0x4b0] sm:$0xff] }
 0x1f2   :  { %3517 = vmatpush1.msra.mxu1 %v4540_v12  ;;  %3169 = vmatprep.subr.mxu0 %v4484_v51  ;;  %v4573_v43 = vld [vmem:[%s7285_s3 + $0x658] sm:$0xff]  ;;  %v4572_v57 = vld [vmem:[%s7285_s3 + $0x650] sm:$0xff]  ;;  %v4516_v55 = vld [vmem:[%s7285_s3 + $0x4a8] sm:$0xff]  ;;  %v3002_v12 = vcombine.high %v6543_v33, %v6543_v33  ;;  %v3351_v51 = vcombine.high %v6617_v19, %v6617_v19  ;;  %v2993_v19 = vrot.slane %v2978_v9, %v6264_v63 }
 0x1f3   :  { %3518 = vmatprep.subr.mxu1 %v4539_v16  ;;  %3170 = vmatpush1.msra.mxu0 %v4483_v56  ;;  %v4571_v26 = vld [vmem:[%s7285_s3 + $0x648] sm:$0xff]  ;;  %v4515_v52 = vld [vmem:[%s7285_s3 + $0x4a0] sm:$0xff]  ;;  %v4514_v16 = vld [vmem:[%s7285_s3 + $0x498] sm:$0xff]  ;;  %v3342_v56 = vrot.slane %v3327_v20, %v6264_v63 }
 0x1f4   :  { %4579 = vmatprep.mubr.msk.f32.mxu1 %vm2627_vm12, %v3470_v49  ;;  %3519 = vmatpush1.msra.mxu1 %v4538_v34  ;;  %v4570_v54 = vld [vmem:[%s7285_s3 + $0x640] sm:$0xff]  ;;  %v4569_v33 = vld [vmem:[%s7285_s3 + $0x638] sm:$0xff]  ;;  %v4513_v34 = vld [vmem:[%s7285_s3 + $0x490] sm:$0xff] }
 0x1f5   :  { %3171 = vmatprep.subr.mxu0 %v4482_v2  ;;  %3520 = vmatprep.subr.mxu1 %v4537_v5  ;;  %v4568_v49 = vld [vmem:[%s7285_s3 + $0x630] sm:$0xff]  ;;  %v4512_v2 = vld [vmem:[%s7285_s3 + $0x488] sm:$0xff] }
 0x1f6   :  { %3172 = vmatpush1.msra.mxu0 %v4481_v29  ;;  %3521 = vmatpush1.msra.mxu1 %v4536_v8  ;;  %v4567_v5 = vld [vmem:[%s7285_s3 + $0x628] sm:$0xff]  ;;  %v3122_v29 = vcombine.low %v3002_v12, %v2993_v19  ;;  %v3471_v8 = vcombine.low %v3351_v51, %v3342_v56  ;;  %v4591_v12 = vld [vmem:[%s7287_s5 + $0xd0] sm:$0xff]  ;;  %v4588_v19 = vld [vmem:[%s7287_s5 + $0xb8] sm:$0xff] }
 0x1f7   :  { %3173 = vmatprep.subr.mxu0 %v4480_v4  ;;  %3522 = vmatprep.subr.mxu1 %v4535_v61  ;;  %v4511_v4 = vld [vmem:[%s7285_s3 + $0x480] sm:$0xff]  ;;  %v4594_v9 = vld [vmem:[%s7287_s5 + $0xe8] sm:$0xff]  ;;  %v3763_v51 = vld [vmem:[%s7287_s5 + $0x50] sm:$0xff] }
 0x1f8   :  { %3174 = vmatpush1.msra.mxu0 %v4479_v58  ;;  %3523 = vmatpush1.msra.mxu1 %v4534_v27  ;;  %v4566_v61 = vld [vmem:[%s7285_s3 + $0x620] sm:$0xff]  ;;  %v4510_v58 = vld [vmem:[%s7285_s3 + $0x478] sm:$0xff]  ;;  %v3766_v20 = vld [vmem:[%s7287_s5 + $0x68] sm:$0xff] }
 0x1f9   :  { %3175 = vmatprep.subr.mxu0 %v4478_v42  ;;  %3524 = vmatprep.subr.mxu1 %v4533_v47  ;;  %v4565_v27 = vld [vmem:[%s7285_s3 + $0x618] sm:$0xff]  ;;  %v3090_v42 = vcombine.low %v6581_v53, %v6584_v14  ;;  %v3439_v47 = vcombine.low %v6656_v1, %v6659_v7  ;;  %v4563_v53 = vld [vmem:[%s7285_s3 + $0x608] sm:$0xff]  ;;  %v3129_v14 = vrot.slane %v3122_v29, %v6264_v63  ;;  %v4587_v56 = vld [vmem:[%s7287_s5 + $0xb0] sm:$0xff] }
 0x1fa   :  { %3176 = vmatpush1.msra.mxu0 %v4477_v46  ;;  %3525 = vmatpush1.msra.mxu1 %v4532_v45  ;;  %v4509_v46 = vld [vmem:[%s7285_s3 + $0x470] sm:$0xff]  ;;  %v3478_v1 = vrot.slane %v3471_v8, %v6264_v63  ;;  %v3088_v7 = vcombine.low %v6558_v30, %v6561_v6  ;;  %v4561_v30 = vld [vmem:[%s7285_s3 + $0x5f8] sm:$0xff] }
 0x1fb   :  { %3177 = vmatprep.subr.mxu0 %v4476_v62  ;;  %3526 = vmatprep.subr.mxu1 %v4531_v18  ;;  %v4564_v45 = vld [vmem:[%s7285_s3 + $0x610] sm:$0xff]  ;;  %v4508_v62 = vld [vmem:[%s7285_s3 + $0x468] sm:$0xff]  ;;  %v3437_v18 = vcombine.low %v6633_v41, %v6636_v50  ;;  %v3112_v50 = vrot.slane %v3090_v42, %v6264_v63 }
 0x1fc   :  { %3178 = vmatpush1.msra.mxu0 %v4475_v25  ;;  %3527 = vmatpush1.msra.mxu1 %v4530_v10  ;;  %v4507_v25 = vld [vmem:[%s7285_s3 + $0x460] sm:$0xff]  ;;  %v4505_v6 = vld [vmem:[%s7285_s3 + $0x450] sm:$0xff]  ;;  %v3098_v11 = vrot.slane %v3088_v7, %v6264_v63 }
 0x1fd   :  { %3179 = vmatprep.subr.mxu0 %v4474_v40  ;;  %3528 = vmatprep.subr.mxu1 %v4529_v59  ;;  %v4562_v10 = vld [vmem:[%s7285_s3 + $0x600] sm:$0xff]  ;;  %v4506_v40 = vld [vmem:[%s7285_s3 + $0x458] sm:$0xff]  ;;  %v4560_v41 = vld [vmem:[%s7285_s3 + $0x5f0] sm:$0xff]  ;;  %v3461_v59 = vrot.slane %v3439_v47, %v6264_v63  ;;  %v3447_v17 = vrot.slane %v3437_v18, %v6264_v63 }
 0x1fe   :  { %3180 = vmatpush1.msra.mxu0 %v4473_v36  ;;  %3529 = vmatpush1.msra.mxu1 %v4528_v35  ;;  %v4504_v36 = vld [vmem:[%s7285_s3 + $0x448] sm:$0xff] }
 0x1ff   :  { %3181 = vmatprep.subr.mxu0 %v4472_v22  ;;  %3530 = vmatprep.subr.mxu1 %v4527_v24  ;;  %v4559_v35 = vld [vmem:[%s7285_s3 + $0x5e8] sm:$0xff]  ;;  %v3130_v22 = vcombine.high %v3129_v14, %v3129_v14  ;;  %v3479_v24 = vcombine.high %v3478_v1, %v3478_v1 }
 0x200   :  { %3182 = vmatpush1.msra.mxu0 %v4471_v15  ;;  %3531 = vmatpush1.msra.mxu1 %v4526_v23  ;;  %v4503_v15 = vld [vmem:[%s7285_s3 + $0x440] sm:$0xff] }
 0x201   :  { %3195 = vmatprep.subr.mxu0 %v4522_v0  ;;  %3544 = vmatprep.subr.mxu1 %v4577_v39  ;;  %v4558_v23 = vld [vmem:[%s7285_s3 + $0x5e0] sm:$0xff]  ;;  %v3120_v0 = vcombine.low %v3098_v11, %v3112_v50  ;;  %v3469_v39 = vcombine.low %v3447_v17, %v3461_v59 }
 0x202   :  { %3196 = vmatpush2.msra.mxu0 %v4521_v44  ;;  %3545 = vmatpush2.msra.mxu1 %v4576_v60  ;;  %v3144_v44 = vrot.slane %v3130_v22, %v6264_v63  ;;  %v3493_v60 = vrot.slane %v3479_v24, %v6264_v63 }
 0x203   :  { %3197 = vmatprep.subr.mxu0 %v4520_v31  ;;  %3546 = vmatprep.subr.mxu1 %v4575_v28  ;;  %v3137_v31 = vrot.slane %v3129_v14, %v6264_v63  ;;  %v3486_v28 = vrot.slane %v3478_v1, %v6264_v63 }
 0x204   :  { %3198 = vmatpush2.msra.mxu0 %v4519_v13  ;;  %3547 = vmatpush2.msra.mxu1 %v4574_v21  ;;  %v4596_v13 = vld [vmem:[%s7287_s5 + $0xf8] sm:$0xff]  ;;  %v4595_v21 = vld [vmem:[%s7287_s5 + $0xf0] sm:$0xff] }
 0x205   :  { %3199 = vmatprep.subr.mxu0 %v4518_v48  ;;  %3548 = vmatprep.subr.mxu1 %v4573_v43  ;;  %v3768_v48 = vld [vmem:[%s7287_s5 + $0x78] sm:$0xff]  ;;  %v3767_v43 = vld [vmem:[%s7287_s5 + $0x70] sm:$0xff] }
 0x206   :  { %3200 = vmatpush2.msra.mxu0 %v4517_v3  ;;  %3549 = vmatpush2.msra.mxu1 %v4572_v57  ;;  %v4593_v3 = vld [vmem:[%s7287_s5 + $0xe0] sm:$0xff] }
 0x207   :  { %3201 = vmatprep.subr.mxu0 %v4516_v55  ;;  %3550 = vmatprep.subr.mxu1 %v4571_v26  ;;  %v3765_v57 = vld [vmem:[%s7287_s5 + $0x60] sm:$0xff]  ;;  %v4592_v55 = vld [vmem:[%s7287_s5 + $0xd8] sm:$0xff] }
 0x208   :  { %3202 = vmatpush2.msra.mxu0 %v4515_v52  ;;  %3551 = vmatpush2.msra.mxu1 %v4570_v54  ;;  %v3764_v26 = vld [vmem:[%s7287_s5 + $0x58] sm:$0xff]  ;;  %v4590_v52 = vld [vmem:[%s7287_s5 + $0xc8] sm:$0xff] }
 0x209   :  { %3203 = vmatprep.subr.mxu0 %v4514_v16  ;;  %3552 = vmatprep.subr.mxu1 %v4569_v33  ;;  %v3762_v54 = vld [vmem:[%s7287_s5 + $0x48] sm:$0xff]  ;;  %v4589_v16 = vld [vmem:[%s7287_s5 + $0xc0] sm:$0xff] }
 0x20a   :  { %3204 = vmatpush2.msra.mxu0 %v4513_v34  ;;  %3553 = vmatpush2.msra.mxu1 %v4568_v49  ;;  %v3761_v33 = vld [vmem:[%s7287_s5 + $0x40] sm:$0xff] }
 0x20b   :  { %3205 = vmatprep.subr.mxu0 %v4512_v2  ;;  %3554 = vmatprep.subr.mxu1 %v4567_v5 }
 0x20c   :  { %3206 = vmatpush2.msra.mxu0 %v4511_v4  ;;  %3555 = vmatpush2.msra.mxu1 %v4566_v61 }
 0x20d   :  { %3207 = vmatprep.subr.mxu0 %v4510_v58  ;;  %3556 = vmatprep.subr.mxu1 %v4565_v27  ;;  %v3581_v58 = vld [vmem:[%s7286_s4] sm:$0x3]  ;;  %s4275_s4 = sshll.u32 %s4899_s24, 4  ;;  %s4276_s4 = int_to_ptr.vmem [resolvable:$true] %s4275_s4 }
 0x20e   :  { %3208 = vmatpush2.msra.mxu0 %v4509_v46  ;;  %3557 = vmatpush2.msra.mxu1 %v4564_v45  ;;  %s4871_s0 = scalar_lea.vmem %s4276_s4, 32  ;;  %p4876_p1 = scmp.lt.s32.totalorder %s4276_s4, %s4276_s4 }
 0x20f   :  { %3209 = vmatprep.subr.mxu0 %v4508_v62  ;;  %3558 = vmatprep.subr.mxu1 %v4563_v53  ;;  %v3586_v62 = vrot.slane %v3581_v58, %v5806_v37  ;;  %p4872_p0 = scmp.ne.s32.totalorder %s4276_s4, %s4871_s0  ;;  %p4877_p2 = scmp.lt.s32.totalorder %s4871_s0, %s4871_s0 }
 0x210   :  { %3210 = vmatpush2.msra.mxu0 %v4507_v25  ;;  %3559 = vmatpush2.msra.mxu1 %v4562_v10  ;;  %v3590_v25 = vrot.slane %v3581_v58, %v5812_v32  ;;  %v4586_v32 = vld [vmem:[%s7287_s5 + $0xa8] sm:$0xff]  ;;  %v3756_v58 = vld [vmem:[%s7287_s5 + $0x18] sm:$0xff] }
 0x211   :  { %3211 = vmatprep.subr.mxu0 %v4506_v40  ;;  %3560 = vmatprep.subr.mxu1 %v4561_v30  ;;  %p4878_p3 = por %p4877_p2, %p4876_p1 }
 0x212   :  { %3212 = vmatpush2.msra.mxu0 %v4505_v6  ;;  %3561 = vmatpush2.msra.mxu1 %v4560_v41 }
 0x213   :  { %3213 = vmatprep.subr.mxu0 %v4504_v36  ;;  %3562 = vmatprep.subr.mxu1 %v4559_v35  ;;  %p4879_p4 = pnand %p4878_p3, %p4872_p0 }
 0x214   :  { %3214 = vmatpush2.msra.mxu0 %v4503_v15  ;;  %3563 = vmatpush2.msra.mxu1 %v4558_v23 }
 0x215   :  { %3216 = vmatmul.mubr.f32.vlgmr.msra.gmra.mxu0 %v3120_v0  ;;  %3565 = vmatmul.mubr.f32.vlgmr.msra.gmra.mxu1 %v3469_v39 }
 0x216   :  { %4525 = vmatprep.mubr.msk.f32.mxu0 %vm2627_vm12, %v3144_v44  ;;  %4580 = vmatprep.mubr.msk.f32.mxu1 %vm2627_vm12, %v3493_v60  ;;  %v3760_v44 = vld [vmem:[%s7287_s5 + $0x38] sm:$0xff] }
 0x217   :  { %4705 = vmatprep.subr.mxu0 %v4894_v38  ;;  %4740 = vmatprep.subr.mxu1 %v4894_v38 }
 0x218   :  { %4706 = vmatpush3.msra.mxu0 %v4596_v13  ;;  %4741 = vmatpush3.msra.mxu1 %v3768_v48 }
 0x219   :  { %3222 = vmatmul.mubr.f32.gmra.mxu0 %v3137_v31  ;;  %3571 = vmatmul.mubr.f32.gmra.mxu1 %v3486_v28 }
 0x21a   :  { %4707 = vmatprep.subr.mxu0 %v4894_v38  ;;  %4742 = vmatprep.subr.mxu1 %v4894_v38 }
 0x21b   :  { %4708 = vmatpush3.msra.mxu0 %v4595_v21  ;;  %4743 = vmatpush3.msra.mxu1 %v3767_v43 }
 0x21c   :  { %4709 = vmatprep.subr.mxu0 %v4894_v38  ;;  %4744 = vmatprep.subr.mxu1 %v4894_v38 }
 0x21d   :  { %4710 = vmatpush3.msra.mxu0 %v4594_v9  ;;  %4745 = vmatpush3.msra.mxu1 %v3766_v20 }
 0x21e   :  { %4711 = vmatprep.subr.mxu0 %v4894_v38  ;;  %4746 = vmatprep.subr.mxu1 %v4894_v38 }
 0x21f   :  { %4712 = vmatpush3.msra.mxu0 %v4593_v3  ;;  %4747 = vmatpush3.msra.mxu1 %v3765_v57 }
 0x220   :  { %4713 = vmatprep.subr.mxu0 %v4894_v38  ;;  %4748 = vmatprep.subr.mxu1 %v4894_v38 }
 0x221   :  { %4714 = vmatpush3.msra.mxu0 %v4592_v55  ;;  %4749 = vmatpush3.msra.mxu1 %v3764_v26 }
 0x222   :  { %4715 = vmatprep.subr.mxu0 %v4894_v38  ;;  %4750 = vmatprep.subr.mxu1 %v4894_v38 }
 0x223   :  { %4716 = vmatpush3.msra.mxu0 %v4591_v12  ;;  %4751 = vmatpush3.msra.mxu1 %v3763_v51 }
 0x224   :  { %4717 = vmatprep.subr.mxu0 %v4894_v38  ;;  %4752 = vmatprep.subr.mxu1 %v4894_v38 }
 0x225   :  { %4718 = vmatpush3.msra.mxu0 %v4590_v52  ;;  %4753 = vmatpush3.msra.mxu1 %v3762_v54  ;;  %v4585_v52 = vld [vmem:[%s7287_s5 + $0xa0] sm:$0xff]  ;;  %v3759_v54 = vld [vmem:[%s7287_s5 + $0x30] sm:$0xff] }
 0x226   :  { %4719 = vmatprep.subr.mxu0 %v4894_v38  ;;  %4754 = vmatprep.subr.mxu1 %v4894_v38 }
 0x227   :  { %4720 = vmatpush3.msra.mxu0 %v4589_v16  ;;  %4755 = vmatpush3.msra.mxu1 %v3761_v33  ;;  %v4584_v16 = vld [vmem:[%s7287_s5 + $0x98] sm:$0xff]  ;;  %v3758_v33 = vld [vmem:[%s7287_s5 + $0x28] sm:$0xff] }
 0x228   :  { %4721 = vmatprep.subr.mxu0 %v4894_v38  ;;  %4756 = vmatprep.subr.mxu1 %v4894_v38 }
 0x229   :  { %4722 = vmatpush3.msra.mxu0 %v4588_v19  ;;  %4757 = vmatpush3.msra.mxu1 %v3760_v44  ;;  %v4611_v44 = vld [vmem:[%s7287_s5 + $0x170] sm:$0xff] }
 0x22a   :  { %4723 = vmatprep.subr.mxu0 %v4894_v38  ;;  %4758 = vmatprep.subr.mxu1 %v4894_v38 }
 0x22b   :  { %4724 = vmatpush3.msra.mxu0 %v4587_v56  ;;  %4759 = vmatpush3.msra.mxu1 %v3759_v54  ;;  %v4623_v54 = vld [vmem:[%s7287_s5 + $0x1d0] sm:$0xff] }
 0x22c   :  { %4725 = vmatprep.subr.mxu0 %v4894_v38  ;;  %4760 = vmatprep.subr.mxu1 %v4894_v38 }
 0x22d   :  { %4726 = vmatpush3.msra.mxu0 %v4586_v32  ;;  %4761 = vmatpush3.msra.mxu1 %v3758_v33 }
 0x22e   :  { %4727 = vmatprep.subr.mxu0 %v4894_v38  ;;  %4762 = vmatprep.subr.mxu1 %v4894_v38 }
 0x22f   :  { %4728 = vmatpush3.msra.mxu0 %v4585_v52  ;;  %4737 = vmatprep.mubr.msk.f32.mxu0 %vm4898_vm13, %v4894_v38  ;;  %v4605_v52 = vld [vmem:[%s7287_s5 + $0x140] sm:$0xff] }
 0x230   :  { %4729 = vmatprep.subr.mxu0 %v4894_v38  ;;  %4772 = vmatprep.mubr.msk.f32.mxu1 %vm4898_vm13, %v4894_v38 }
 0x231   :  { %4730 = vmatpush3.msra.mxu0 %v4584_v16 }
 0x232   :  { %4731 = vmatprep.subr.mxu0 %v4894_v38 }
 0x29b   :  { %v2698_v34 = vpop.f32.mrf.mxu0 }
 0x29d   :  { %v2700_v2 = vpop.f32.mrf.mxu0 }
 0x2a0   :  { %v2870_v49 = vpop.f32.mrf.mxu1 }
 0x2a1   :  { %v2871_v27 = vadd.f32 %v2870_v49, %v2698_v34 }
 0x2a2   :  { %v2872_v5 = vpop.f32.mrf.mxu1  ;;  %v2704_v29 = vpop.f32.mrf.mxu0 }
 0x2a3   :  { %v2873_v46 = vadd.f32 %v2872_v5, %v2700_v2  ;;  %v4583_v2 = vld [vmem:[%s7287_s5 + $0x90] sm:$0xff]  ;;  %v3757_v5 = vld [vmem:[%s7287_s5 + $0x20] sm:$0xff] }
 0x2a4   :  { %v2706_v4 = vpop.f32.mrf.mxu0  ;;  %4732 = vmatpush3.msra.mxu0 %v4583_v2  ;;  %4763 = vmatpush3.msra.mxu1 %v3757_v5  ;;  %v4603_v2 = vld [vmem:[%s7287_s5 + $0x130] sm:$0xff]  ;;  %v4621_v5 = vld [vmem:[%s7287_s5 + $0x1c0] sm:$0xff] }
 0x2a5   :  { %v2876_v8 = vpop.f32.mrf.mxu1  ;;  %4733 = vmatprep.subr.mxu0 %v4894_v38  ;;  %4764 = vmatprep.subr.mxu1 %v4894_v38 }
 0x2a6   :  { %v2877_v1 = vadd.f32 %v2876_v8, %v2704_v29  ;;  %4765 = vmatpush3.msra.mxu1 %v3756_v58  ;;  %v4620_v58 = vld [vmem:[%s7287_s5 + $0x1b8] sm:$0xff] }
 0x2a7   :  { %v2878_v61 = vpop.f32.mrf.mxu1  ;;  %4766 = vmatprep.subr.mxu1 %v4894_v38 }
 0x2a8   :  { %v2879_v30 = vadd.f32 %v2878_v61, %v2706_v4  ;;  %v4582_v61 = vld [vmem:[%s7287_s5 + $0x88] sm:$0xff] }
 0x2a9   :  { %4734 = vmatpush3.msra.mxu0 %v4582_v61  ;;  %v4602_v61 = vld [vmem:[%s7287_s5 + $0x128] sm:$0xff] }
 0x2aa   :  { %4735 = vmatprep.subr.mxu0 %v4894_v38 }
 0x2d5   :  { %v3217_v42 = vpop.f32.mrf.mxu0  ;;  %v3566_v47 = vpop.f32.mrf.mxu1 }
 0x2d6   :  { %v3228_v45 = vadd.f32 %v3217_v42, %v2871_v27  ;;  %v4581_v42 = vld [vmem:[%s7287_s5 + $0x80] sm:$0xff] }
 0x2d7   :  { %v3219_v53 = vpop.f32.mrf.mxu0  ;;  %v3568_v14 = vpop.f32.mrf.mxu1  ;;  %4736 = vmatpush3.msra.mxu0 %v4581_v42 }
 0x2d8   :  { %v3577_v7 = vadd.f32 %v3566_v47, %v3228_v45  ;;  %v3229_v18 = vadd.f32 %v3219_v53, %v2873_v46  ;;  %v3755_v47 = vld [vmem:[%s7287_s5 + $0x10] sm:$0xff]  ;;  %v3754_v53 = vld [vmem:[%s7287_s5 + $0x8] sm:$0xff]  ;;  %4775 = vmatprep.subr.mxu0 %v4894_v38 }
 0x2d9   :  { %v3223_v10 = vpop.f32.mrf.mxu0  ;;  %v3572_v40 = vpop.f32.mrf.mxu1  ;;  %4767 = vmatpush3.msra.mxu1 %v3755_v47 }
 0x2da   :  { %v3593_v6 = vadd.f32 %v3586_v62, %v3577_v7  ;;  %v3578_v41 = vadd.f32 %v3568_v14, %v3229_v18  ;;  %v3230_v50 = vadd.f32 %v3223_v10, %v2877_v1  ;;  %4768 = vmatprep.subr.mxu1 %v4894_v38  ;;  %v3753_v1 = vld [vmem:[%s7287_s5] sm:$0xff] }
 0x2db   :  { %v3225_v59 = vpop.f32.mrf.mxu0  ;;  %v3574_v24 = vpop.f32.mrf.mxu1  ;;  %4769 = vmatpush3.msra.mxu1 %v3754_v53 }
 0x2dc   :  { %v3594_v36 = vadd.f32 %v3590_v25, %v3578_v41  ;;  %v3579_v35 = vadd.f32 %v3572_v40, %v3230_v50  ;;  %v3231_v22 = vadd.f32 %v3225_v59, %v2879_v30  ;;  %v3597_v15 = vmax.f32 %v3593_v6, 0.0  ;;  %4770 = vmatprep.subr.mxu1 %v4894_v38 }
 0x2dd   :  { %4771 = vmatpush3.msra.mxu1 %v3753_v1 }
 0x2de   :  { %v3598_v37 = vmax.f32 %v3594_v36, 0.0  ;;  %v3580_v23 = vadd.f32 %v3574_v24, %v3231_v22  ;;  %v3595_v0 = vadd.f32 %v3586_v62, %v3579_v35  ;;  %4810 = vmatprep.subr.mxu1 %v4894_v38 }
 0x2e0   :  { %v3605_v11 = vcombine.low %v3597_v15, %v3598_v37  ;;  %v3606_v17 = vcombine.high %v3597_v15, %v3598_v37  ;;  %v3596_v39 = vadd.f32 %v3590_v25, %v3580_v23  ;;  %v3599_v48 = vmax.f32 %v3595_v0, 0.0 }
 0x2e2   :  { %v3613_v60 = vrot.slane %v3605_v11, %v6264_v63  ;;  %v3620_v31 = vrot.slane %v3606_v17, %v6264_v63  ;;  %v3600_v28 = vmax.f32 %v3596_v39, 0.0  ;;  %v4612_v39 = vld [vmem:[%s7287_s5 + $0x178] sm:$0xff] }
 0x2e4   :  { %v3621_v13 = vcombine.high %v3613_v60, %v3613_v60  ;;  %v3622_v21 = vcombine.high %v3620_v31, %v3620_v31  ;;  %v3629_v43 = vrot.slane %v3613_v60, %v6264_v63  ;;  %v3636_v9 = vrot.slane %v3620_v31, %v6264_v63  ;;  %v4610_v31 = vld [vmem:[%s7287_s5 + $0x168] sm:$0xff] }
 0x2e5   :  { %v3655_v20 = vcombine.low %v3599_v48, %v3600_v28  ;;  %v4628_v28 = vld [vmem:[%s7287_s5 + $0x1f8] sm:$0xff] }
 0x2e6   :  { %v3643_v3 = vrot.slane %v3621_v13, %v6264_v63  ;;  %v3651_v57 = vcombine.high %v3629_v43, %v3629_v43  ;;  %v3650_v55 = vrot.slane %v3622_v21, %v6264_v63  ;;  %v3652_v12 = vcombine.high %v3636_v9, %v3636_v9  ;;  %v4609_v13 = vld [vmem:[%s7287_s5 + $0x160] sm:$0xff]  ;;  %v4627_v21 = vld [vmem:[%s7287_s5 + $0x1f0] sm:$0xff] }
 0x2e7   :  { %v3662_v19 = vrot.slane %v3655_v20, %v6264_v63 }
 0x2e8   :  { %v7018_v26 = vmax.f32 %v3643_v3, %v3651_v57  ;;  %v3654_v51 = vcombine.high %v3650_v55, %v3650_v55  ;;  %v7041_v34 = vmax.f32 %v3629_v43, %v3643_v3  ;;  %v3653_v49 = vcombine.high %v3643_v3, %v3643_v3  ;;  %v4608_v43 = vld [vmem:[%s7287_s5 + $0x158] sm:$0xff]  ;;  %v4607_v3 = vld [vmem:[%s7287_s5 + $0x150] sm:$0xff] }
 0x2e9   :  { %v3692_v29 = vmax.f32 %v3650_v55, %v3652_v12  ;;  %v3670_v8 = vrot.slane %v3662_v19, %v6264_v63  ;;  %v3663_v4 = vcombine.high %v3662_v19, %v3662_v19  ;;  %v4606_v55 = vld [vmem:[%s7287_s5 + $0x148] sm:$0xff]  ;;  %v4604_v19 = vld [vmem:[%s7287_s5 + $0x138] sm:$0xff] }
 0x2ea   :  { %3706 = vrot.lane.b32.xlu0 %v7018_v26, %s4897_s14  ;;  %v7035_v56 = vmax.f32 %v3652_v12, %v3654_v51  ;;  %v7062_v27 = vmax.f32 %v3651_v57, %v3653_v49  ;;  %v7080_v62 = vmax.f32 %v3653_v49, %v3636_v9  ;;  %v4626_v9 = vld [vmem:[%s7287_s5 + $0x1e8] sm:$0xff]  ;;  %v4625_v57 = vld [vmem:[%s7287_s5 + $0x1e0] sm:$0xff] }
 0x2eb   :  { %v7073_v46 = vmax.f32 %v3654_v51, %v3670_v8  ;;  %v3677_v45 = vrot.slane %v3663_v4, %v6264_v63 }
 0x2ec   :  { %3714 = vrot.lane.b32.xlu1 %v7035_v56, %s4897_s14 }
 0x2ed   :  { %v7090_v14 = vmax.f32 %v3670_v8, %v3677_v45  ;;  %v4619_v45 = vld [vmem:[%s7287_s5 + $0x1b0] sm:$0xff] }
 0x2ee   :  { %3704 = vrot.lane.b32.xlu0 %v7041_v34, %s4897_s14 }
 0x2f0   :  { %3712 = vrot.lane.b32.xlu1 %v3692_v29, %s4897_s14 }
 0x2f2   :  { %3708 = vrot.lane.b32.xlu0 %v7062_v27, %s4897_s14 }
 0x2f4   :  { %3716 = vrot.lane.b32.xlu1 %v7073_v46, %s4897_s14 }
 0x2f6   :  { %3710 = vrot.lane.b32.xlu0 %v7080_v62, %s4897_s14 }
 0x2f8   :  { %3718 = vrot.lane.b32.xlu1 %v7090_v14, %s4897_s14 }
 0x35c   :  { %v3707_v7 = vpop.permute.xlu0 %3706 }
 0x35d   :  { %v3721_v18 = vrot.slane %v3707_v7, 1 }
 0x35e   :  { %v3715_v25 = vpop.permute.xlu1 %3714 }
 0x35f   :  { %v3730_v10 = vsel %vm3728_vm14, %v3707_v7, %v3721_v18  ;;  %v3725_v40 = vrot.slane %v3715_v25, 1  ;;  %v4618_v18 = vld [vmem:[%s7287_s5 + $0x1a8] sm:$0xff] }
 0x360   :  { %v3705_v30 = vpop.permute.xlu0 %3704  ;;  %v3746_v50 = vmax.f32 %v7018_v26, %v3730_v10  ;;  %v4624_v26 = vld [vmem:[%s7287_s5 + $0x1d8] sm:$0xff]  ;;  %v4617_v10 = vld [vmem:[%s7287_s5 + $0x1a0] sm:$0xff] }
 0x361   :  { %v3734_v6 = vsel %vm3728_vm14, %v3715_v25, %v3725_v40  ;;  %v3720_v41 = vrot.slane %v3705_v30, 1 }
 0x362   :  { %v3750_v59 = vmax.f32 %v7035_v56, %v3734_v6  ;;  %v3713_v36 = vpop.permute.xlu1 %3712  ;;  %v4622_v56 = vld [vmem:[%s7287_s5 + $0x1c8] sm:$0xff]  ;;  %v4616_v6 = vld [vmem:[%s7287_s5 + $0x198] sm:$0xff] }
 0x363   :  { %v3729_v35 = vsel %vm3728_vm14, %v3705_v30, %v3720_v41  ;;  %v3724_v22 = vrot.slane %v3713_v36, 1  ;;  %v4597_v41 = vld [vmem:[%s7287_s5 + $0x100] sm:$0xff] }
 0x364   :  { %v3788_v24 = vcombine.low %v3746_v50, %v3750_v59  ;;  %v3745_v23 = vmax.f32 %v7041_v34, %v3729_v35  ;;  %v3709_v20 = vpop.permute.xlu0 %3708  ;;  %v4615_v50 = vld [vmem:[%s7287_s5 + $0x190] sm:$0xff]  ;;  %v4614_v35 = vld [vmem:[%s7287_s5 + $0x188] sm:$0xff] }
 0x365   :  { %v3733_v15 = vsel %vm3728_vm14, %v3713_v36, %v3724_v22  ;;  %v3722_v16 = vrot.slane %v3709_v20, 1  ;;  %v4613_v22 = vld [vmem:[%s7287_s5 + $0x180] sm:$0xff] }
 0x366   :  { %v3795_v37 = vrot.slane %v3788_v24, %v6264_v63  ;;  %v3749_v11 = vmax.f32 %v3692_v29, %v3733_v15  ;;  %v3717_v48 = vpop.permute.xlu1 %3716  ;;  %v4186_v15 = vld [vmem:[%s7289_s7 + $0x18] sm:$0xff] }
 0x367   :  { %v3726_v12 = vrot.slane %v3717_v48, 1  ;;  %v3731_v29 = vsel %vm3728_vm14, %v3709_v20, %v3722_v16 }
 0x368   :  { %v3802_v17 = vrot.slane %v3795_v37, %v6264_v63  ;;  %v3876_v0 = vcombine.low %v3745_v23, %v3749_v11  ;;  %v3711_v33 = vpop.permute.xlu0 %3710  ;;  %v3747_v47 = vmax.f32 %v7062_v27, %v3731_v29  ;;  %v4600_v27 = vld [vmem:[%s7287_s5 + $0x118] sm:$0xff]  ;;  %v4185_v37 = vld [vmem:[%s7289_s7 + $0x10] sm:$0xff]  ;;  %v4183_v23 = vld [vmem:[%s7289_s7] sm:$0xff] }
 0x369   :  { %v3735_v34 = vsel %vm3728_vm14, %v3717_v48, %v3726_v12  ;;  %v3723_v8 = vrot.slane %v3711_v33, 1 }
 0x36a   :  { %v3883_v32 = vrot.slane %v3876_v0, %v6264_v63  ;;  %4738 = vmatmul.mubr.f32.vlgmr.msra.gmra.mxu0 %v3802_v17  ;;  %v3719_v51 = vpop.permute.xlu1 %3718  ;;  %v3751_v4 = vmax.f32 %v7073_v46, %v3735_v34  ;;  %v4601_v46 = vld [vmem:[%s7287_s5 + $0x120] sm:$0xff] }
 0x36b   :  { %4776 = vmatpush3.msra.mxu0 %v4612_v39  ;;  %4807 = vmatprep.mubr.msk.f32.mxu0 %vm4898_vm13, %v4894_v38  ;;  %v3727_v49 = vrot.slane %v3719_v51, 1  ;;  %v3732_v53 = vsel %vm3728_vm14, %v3711_v33, %v3723_v8 }
 0x36c   :  { %v3890_v60 = vrot.slane %v3883_v32, %v6264_v63  ;;  %4777 = vmatprep.subr.mxu0 %v4894_v38  ;;  %v3981_v1 = vcombine.low %v3747_v47, %v3751_v4  ;;  %v3748_v25 = vmax.f32 %v7080_v62, %v3732_v53  ;;  %v4598_v62 = vld [vmem:[%s7287_s5 + $0x108] sm:$0xff] }
 0x36d   :  { %4778 = vmatpush3.msra.mxu0 %v4611_v44  ;;  %v3736_v42 = vsel %vm3728_vm14, %v3719_v51, %v3727_v49 }
 0x36e   :  { %4779 = vmatprep.subr.mxu0 %v4894_v38  ;;  %4773 = vmatmul.mubr.f32.vlgmr.msra.gmra.mxu1 %v3890_v60  ;;  %v3752_v7 = vmax.f32 %v7090_v14, %v3736_v42  ;;  %v4599_v14 = vld [vmem:[%s7287_s5 + $0x110] sm:$0xff]  ;;  %v3988_v40 = vrot.slane %v3981_v1, %v6264_v63 }
 0x36f   :  { %4780 = vmatpush3.msra.mxu0 %v4610_v31  ;;  %4811 = vmatpush3.msra.mxu1 %v4628_v28 }
 0x370   :  { %4781 = vmatprep.subr.mxu0 %v4894_v38  ;;  %4812 = vmatprep.subr.mxu1 %v4894_v38  ;;  %v4087_v30 = vcombine.low %v3748_v25, %v3752_v7  ;;  %v3995_v36 = vrot.slane %v3988_v40, %v6264_v63 }
 0x371   :  { %4782 = vmatpush3.msra.mxu0 %v4609_v13  ;;  %4813 = vmatpush3.msra.mxu1 %v4627_v21  ;;  %v4629_v13 = vld [vmem:[%s7288_s6] ss:$0 sm:$0xff] }
 0x372   :  { %4783 = vmatprep.subr.mxu0 %v4894_v38  ;;  %4814 = vmatprep.subr.mxu1 %v4894_v38  ;;  %v4094_v59 = vrot.slane %v4087_v30, %v6264_v63 }
 0x373   :  { %4784 = vmatpush3.msra.mxu0 %v4608_v43  ;;  %4815 = vmatpush3.msra.mxu1 %v4626_v9 }
 0x374   :  { %4785 = vmatprep.subr.mxu0 %v4894_v38  ;;  %4816 = vmatprep.subr.mxu1 %v4894_v38  ;;  %v4101_v24 = vrot.slane %v4094_v59, %v6264_v63  ;;  %v4184_v63 = vld [vmem:[%s7289_s7 + $0x8] sm:$0xff] }
 0x375   :  { %4786 = vmatpush3.msra.mxu0 %v4607_v3  ;;  %4817 = vmatpush3.msra.mxu1 %v4625_v57 }
 0x376   :  { %4787 = vmatprep.subr.mxu0 %v4894_v38  ;;  %4818 = vmatprep.subr.mxu1 %v4894_v38 }
 0x377   :  { %4788 = vmatpush3.msra.mxu0 %v4606_v55  ;;  %4819 = vmatpush3.msra.mxu1 %v4624_v26 }
 0x378   :  { %4789 = vmatprep.subr.mxu0 %v4894_v38  ;;  %4820 = vmatprep.subr.mxu1 %v4894_v38 }
 0x379   :  { %4790 = vmatpush3.msra.mxu0 %v4605_v52  ;;  %4821 = vmatpush3.msra.mxu1 %v4623_v54 }
 0x37a   :  { %4791 = vmatprep.subr.mxu0 %v4894_v38  ;;  %4822 = vmatprep.subr.mxu1 %v4894_v38 }
 0x37b   :  { %4792 = vmatpush3.msra.mxu0 %v4604_v19  ;;  %4823 = vmatpush3.msra.mxu1 %v4622_v56 }
 0x37c   :  { %4793 = vmatprep.subr.mxu0 %v4894_v38  ;;  %4824 = vmatprep.subr.mxu1 %v4894_v38 }
 0x37d   :  { %4794 = vmatpush3.msra.mxu0 %v4603_v2  ;;  %4825 = vmatpush3.msra.mxu1 %v4621_v5 }
 0x37e   :  { %4795 = vmatprep.subr.mxu0 %v4894_v38  ;;  %4826 = vmatprep.subr.mxu1 %v4894_v38 }
 0x37f   :  { %4796 = vmatpush3.msra.mxu0 %v4602_v61  ;;  %4827 = vmatpush3.msra.mxu1 %v4620_v58 }
 0x380   :  { %4797 = vmatprep.subr.mxu0 %v4894_v38  ;;  %4828 = vmatprep.subr.mxu1 %v4894_v38 }
 0x381   :  { %4798 = vmatpush3.msra.mxu0 %v4601_v46  ;;  %4829 = vmatpush3.msra.mxu1 %v4619_v45 }
 0x382   :  { %4799 = vmatprep.subr.mxu0 %v4894_v38  ;;  %4830 = vmatprep.subr.mxu1 %v4894_v38 }
 0x383   :  { %4800 = vmatpush3.msra.mxu0 %v4600_v27  ;;  %4831 = vmatpush3.msra.mxu1 %v4618_v18 }
 0x384   :  { %4801 = vmatprep.subr.mxu0 %v4894_v38  ;;  %4832 = vmatprep.subr.mxu1 %v4894_v38 }
 0x385   :  { %4802 = vmatpush3.msra.mxu0 %v4599_v14  ;;  %4833 = vmatpush3.msra.mxu1 %v4617_v10 }
 0x386   :  { %4803 = vmatprep.subr.mxu0 %v4894_v38  ;;  %4834 = vmatprep.subr.mxu1 %v4894_v38 }
 0x387   :  { %4804 = vmatpush3.msra.mxu0 %v4598_v62  ;;  %4835 = vmatpush3.msra.mxu1 %v4616_v6 }
 0x388   :  { %4805 = vmatprep.subr.mxu0 %v4894_v38  ;;  %4836 = vmatprep.subr.mxu1 %v4894_v38 }
 0x389   :  { %4806 = vmatpush3.msra.mxu0 %v4597_v41  ;;  %4837 = vmatpush3.msra.mxu1 %v4615_v50 }
 0x38a   :  { %4808 = vmatmul.mubr.f32.vlgmr.msra.gmra.mxu0 %v3995_v36  ;;  %4838 = vmatprep.subr.mxu1 %v4894_v38 }
 0x38b   :  { %4839 = vmatpush3.msra.mxu1 %v4614_v35  ;;  %4842 = vmatprep.mubr.msk.f32.mxu1 %vm4898_vm13, %v4894_v38 }
 0x38c   :  { %4840 = vmatprep.subr.mxu1 %v4894_v38  ;;  %4845 = vmatprep.subr.mxu0 %v4894_v38 }
 0x38d   :  { %4841 = vmatpush3.msra.mxu1 %v4613_v22  ;;  %4853 = vmatprep.mubr.msk.f32.mxu0 %vm4898_vm13, %v4894_v38 }
 0x38e   :  { %4843 = vmatmul.mubr.f32.vlgmr.msra.gmra.mxu1 %v4101_v24  ;;  %4846 = vmatpush3.msra.mxu0 %v4186_v15 }
 0x38f   :  { %4847 = vmatprep.subr.mxu0 %v4894_v38 }
 0x390   :  { %4848 = vmatpush3.msra.mxu0 %v4185_v37 }
 0x391   :  { %4849 = vmatprep.subr.mxu0 %v4894_v38 }
 0x392   :  { %4850 = vmatpush3.msra.mxu0 %v4184_v63 }
 0x393   :  { %4851 = vmatprep.subr.mxu0 %v4894_v38  ;;  %v4630_v38 = vld [vmem:[%s7290_s8] ss:$0 sm:$0xff] }
 0x394   :  { %4852 = vmatpush3.msra.mxu0 %v4183_v23 }
 0x42a   :  { %v3870_v11 = vpop.f32.mrf.mxu0 }
 0x42c   :  { %v4739_v17 = vpop.f32.mrf.mxu0 }
 0x42e   :  { %v3958_v0 = vpop.f32.mrf.mxu1 }
 0x42f   :  { %v3959_v44 = vadd.f32 %v3958_v0, %v3870_v11 }
 0x430   :  { %v4774_v39 = vpop.f32.mrf.mxu1 }
 0x44a   :  { %v4063_v32 = vpop.f32.mrf.mxu0 }
 0x44b   :  { %v4067_v31 = vadd.f32 %v4063_v32, %v3959_v44 }
 0x44c   :  { %v4809_v60 = vpop.f32.mrf.mxu0 }
 0x44e   :  { %v4169_v28 = vpop.f32.mrf.mxu1 }
 0x44f   :  { %v4173_v21 = vadd.f32 %v4169_v28, %v4067_v31 }
 0x450   :  { %v4844_v48 = vpop.f32.mrf.mxu1 }
 0x451   :  { %v4181_v43 = vadd.f32 %v4629_v13, %v4173_v21 }
 0x453   :  { %v4182_v9 = vmax.f32 %v4181_v43, 0.0 }
 0x455   :  { %4854 = vmatmul.mubr.msk.f32.vlgmr.msra.gmra.mxu0 %vm4194_vm15, %v4182_v9 }
 0x515   :  { %v4264_v20 = vpop.f32.mrf.mxu0 }
 0x516   :  { %v4265_v3 = vadd.f32 %v4630_v38, %v4264_v20 }
 0x517   :  { %v4855_v57 = vpop.f32.mrf.mxu0 }
 0x518   :  { %4268 = vst [vmem:[#allocation2] sm:$0x3] %v4265_v3 }
 0x519   :  { %4882 = shalt.err (!%p4879_p4)
}
 0x51a   :  { %4278 = dma.vmem_to_hbm [thread:$0]  %s4276_s4, 32, %s7291_s9, [#allocation3]  }
 0x51b   :  { %4891 = dma.done.wait [#allocation3], 32  }
 0x51c   :  { %4892 = vsyncadd [#allocation3], 4294967264 }
 0x51d   :  { %4282 = vsyncpa [#allocation3], 1 }

</bundles_post_ra>
